<compile_context>
chip_gen: v5e
topology: v5e:2x2
jax: 0.10.0
libtpu: 0.0.40
codegen_flags: <defaults>
</compile_context>

<pallas_src>
import functools

import jax
import jax.numpy as jnp
from jax import lax
from jax.experimental import pallas as pl
from jax.experimental.pallas import tpu as pltpu


# ----------------------------------------------------------------------------
# Mini-BERT config
# ----------------------------------------------------------------------------
VOCAB = 100
MAX_POS = 32
TYPE_VOCAB = 2
HIDDEN = 32
N_LAYERS = 2
N_HEADS = 4
HEAD_DIM = HIDDEN // N_HEADS
INTERMEDIATE = 64
OUT_FEA = 3          # classifier output dim of MyModel.linear
OUT_PAD = 128        # lane-dense classifier slab; sliced to OUT_FEA outside
LN_EPS = 1e-12


# ----------------------------------------------------------------------------
# In-kernel helpers (pure value math)
# ----------------------------------------------------------------------------
def _layernorm(x, g, b):
    mean = jnp.mean(x, axis=-1, keepdims=True)
    cen = x - mean
    var = jnp.mean(cen * cen, axis=-1, keepdims=True)
    return cen * lax.rsqrt(var + LN_EPS) * g + b


def _gelu(x):
    # exact (erf-based) GELU, matching BERT
    return 0.5 * x * (1.0 + lax.erf(x * 0.7071067811865476))


# ----------------------------------------------------------------------------
# Single fused kernel: whole mini-BERT forward
# ----------------------------------------------------------------------------
def _fused_bert_kernel(
    emb_ref, mask_ref,
    emb_ln_g_ref, emb_ln_b_ref,
    qkv_w_ref, qkv_b_ref,
    ao_w_ref, ao_b_ref,
    ln1_g_ref, ln1_b_ref,
    ff1_w_ref, ff1_b_ref,
    ff2_w_ref, ff2_b_ref,
    ln2_g_ref, ln2_b_ref,
    cls_w_ref, cls_b_ref,
    out_ref,
    attn_scratch,
    *, batch, seq, n_layers, n_heads, head_dim, scale,
):
    hidden_dim = n_heads * head_dim

    # --- embedding LayerNorm (no residual; no zeros buffer) ---
    hidden = _layernorm(emb_ref[...], emb_ln_g_ref[...], emb_ln_b_ref[...])   # [B*S, H]

    for l in range(n_layers):
        # --- fused Q/K/V projection: one [H, 3H] matmul ---
        qkv = jnp.dot(hidden, qkv_w_ref[l],
                      preferred_element_type=jnp.float32) + qkv_b_ref[l]       # [B*S, 3H]
        q = qkv[:, 0 * hidden_dim:1 * hidden_dim]
        k = qkv[:, 1 * hidden_dim:2 * hidden_dim]
        v = qkv[:, 2 * hidden_dim:3 * hidden_dim]

        ao_w = ao_w_ref[l]                                                     # [H, H]

        # --- attention: statically unrolled over (batch, head); per-head
        #     context is folded straight into the output projection ---
        for b in range(batch):
            rows = slice(b * seq, (b + 1) * seq)                               # 8-aligned
            m_b = mask_ref[b]                                                  # [1, S] additive
            acc = jnp.zeros((seq, hidden_dim), jnp.float32)
            for h in range(n_heads):
                cols = slice(h * head_dim, (h + 1) * head_dim)
                q_bh = q[rows, cols]                                           # [S, Dh]
                k_bh = k[rows, cols]
                v_bh = v[rows, cols]
                s = lax.dot_general(q_bh, k_bh, (((1,), (1,)), ((), ())),
                                    preferred_element_type=jnp.float32) * scale  # [S, S]
                s = s + m_b
                s = s - jnp.max(s, axis=-1, keepdims=True)
                p = jnp.exp(s)
                p = p * pl.reciprocal(jnp.sum(p, axis=-1, keepdims=True), approx=True)
                ctx = jnp.dot(p, v_bh, preferred_element_type=jnp.float32)     # [S, Dh]
                acc = acc + jnp.dot(ctx, ao_w[cols, :],
                                    preferred_element_type=jnp.float32)        # [S, H]
            attn_scratch[rows, :] = acc

        attn_out = attn_scratch[...] + ao_b_ref[l]
        hidden = _layernorm(attn_out + hidden, ln1_g_ref[l], ln1_b_ref[l])

        # --- feed-forward ---
        ff = jnp.dot(hidden, ff1_w_ref[l],
                     preferred_element_type=jnp.float32) + ff1_b_ref[l]
        ff = _gelu(ff)
        ff = jnp.dot(ff, ff2_w_ref[l],
                     preferred_element_type=jnp.float32) + ff2_b_ref[l]
        hidden = _layernorm(ff + hidden, ln2_g_ref[l], ln2_b_ref[l])

    # --- classifier on all rows (lane-padded to 128 for a dense store);
    #     the CLS rows are selected in the (cheap) JAX glue outside. ---
    # TODO(synk): nn.Dropout(0.1) is identity in eval mode; training-mode dropout
    # would use pltpu.prng_seed + pltpu.stateful_bernoulli here.
    logits_all = jnp.dot(hidden, cls_w_ref[...],
                         preferred_element_type=jnp.float32) + cls_b_ref[...]  # [B*S, 128]
    out_ref[...] = logits_all.astype(out_ref.dtype)


# ----------------------------------------------------------------------------
# Deterministic parameter init (per-layer params stacked on a leading axis)
# ----------------------------------------------------------------------------
def init_params(key):
    def nrm(k, shape, scale=0.02):
        return scale * jax.random.normal(k, shape, dtype=jnp.float32)

    keys = iter(jax.random.split(key, 16))
    p = {
        "word_emb": nrm(next(keys), (VOCAB, HIDDEN)),
        "pos_emb": nrm(next(keys), (MAX_POS, HIDDEN)),
        "type_emb": nrm(next(keys), (TYPE_VOCAB, HIDDEN)),
        "emb_ln_g": jnp.ones((1, HIDDEN), jnp.float32),
        "emb_ln_b": jnp.zeros((1, HIDDEN), jnp.float32),
        "qkv_w": nrm(next(keys), (N_LAYERS, HIDDEN, 3 * HIDDEN)),
        "qkv_b": jnp.zeros((N_LAYERS, 1, 3 * HIDDEN), jnp.float32),
        "ao_w": nrm(next(keys), (N_LAYERS, HIDDEN, HIDDEN)),
        "ao_b": jnp.zeros((N_LAYERS, 1, HIDDEN), jnp.float32),
        "ln1_g": jnp.ones((N_LAYERS, 1, HIDDEN), jnp.float32),
        "ln1_b": jnp.zeros((N_LAYERS, 1, HIDDEN), jnp.float32),
        "ff1_w": nrm(next(keys), (N_LAYERS, HIDDEN, INTERMEDIATE)),
        "ff1_b": jnp.zeros((N_LAYERS, 1, INTERMEDIATE), jnp.float32),
        "ff2_w": nrm(next(keys), (N_LAYERS, INTERMEDIATE, HIDDEN)),
        "ff2_b": jnp.zeros((N_LAYERS, 1, HIDDEN), jnp.float32),
        "ln2_g": jnp.ones((N_LAYERS, 1, HIDDEN), jnp.float32),
        "ln2_b": jnp.zeros((N_LAYERS, 1, HIDDEN), jnp.float32),
    }
    cls_w = nrm(next(keys), (HIDDEN, OUT_FEA))
    p["cls_w_pad"] = jnp.zeros((HIDDEN, OUT_PAD), jnp.float32).at[:, :OUT_FEA].set(cls_w)
    p["cls_b_pad"] = jnp.zeros((1, OUT_PAD), jnp.float32)
    return p


# ----------------------------------------------------------------------------
# Forward pass: embedding gathers in glue, everything else in one pallas_call
# ----------------------------------------------------------------------------
def model_forward(params, input_ids, attention_mask, token_type_ids):
    B, S = input_ids.shape

    # --- embeddings (data-dependent gathers stay in JAX glue) ---
    word = jnp.take(params["word_emb"], input_ids, axis=0)                     # [B,S,H]
    pos = jnp.take(params["pos_emb"], jnp.arange(S), axis=0)[None, :, :]       # [1,S,H]
    typ = jnp.take(params["type_emb"], token_type_ids, axis=0)                 # [B,S,H]
    emb = (word + pos + typ).reshape(B * S, HIDDEN).astype(jnp.float32)

    # additive attention mask, one copy per batch (no per-head repeat): [B,1,S]
    add_mask = ((1.0 - attention_mask.astype(jnp.float32)) * -10000.0)[:, None, :]

    scale = 1.0 / float(HEAD_DIM) ** 0.5

    kernel = functools.partial(
        _fused_bert_kernel,
        batch=B, seq=S, n_layers=N_LAYERS,
        n_heads=N_HEADS, head_dim=HEAD_DIM, scale=scale,
    )

    logits_slab = pl.pallas_call(
        kernel,
        out_shape=jax.ShapeDtypeStruct((B * S, OUT_PAD), jnp.float32),
        scratch_shapes=[pltpu.VMEM((B * S, HIDDEN), jnp.float32)],
    )(
        emb, add_mask,
        params["emb_ln_g"], params["emb_ln_b"],
        params["qkv_w"], params["qkv_b"],
        params["ao_w"], params["ao_b"],
        params["ln1_g"], params["ln1_b"],
        params["ff1_w"], params["ff1_b"],
        params["ff2_w"], params["ff2_b"],
        params["ln2_g"], params["ln2_b"],
        params["cls_w_pad"], params["cls_b_pad"],
    )

    # CLS token row per batch, then strip lane padding -> [B, OUT_FEA]
    logits = logits_slab.reshape(B, S, OUT_PAD)[:, 0, :OUT_FEA]
    return logits


# ----------------------------------------------------------------------------
# Main
# ----------------------------------------------------------------------------
if __name__ == "__main__":
    key = jax.random.PRNGKey(0)
    k_param, k_ids = jax.random.split(key)

    B, S = 2, 8
    params = init_params(k_param)

    input_ids = jax.random.randint(k_ids, (B, S), 0, VOCAB, dtype=jnp.int32)
    attention_mask = jnp.array(
        [[1, 1, 1, 1, 1, 1, 1, 1],
         [1, 1, 1, 1, 1, 1, 0, 0]], dtype=jnp.int32)
    token_type_ids = jnp.zeros((B, S), dtype=jnp.int32)

    fwd = jax.jit(model_forward)
    logits = fwd(params, input_ids, attention_mask, token_type_ids)
    jax.block_until_ready(logits)
    assert logits.shape == (B, OUT_FEA)
    print("KERNEL_OK")
</pallas_src>

<mosaic_0001>
module attributes {stable_mosaic.version = 11 : i64} {
  func.func @_fused_bert_kernel(%arg0: memref<16x32xf32, #tpu.memory_space<vmem>>, %arg1: memref<2x1x8xf32, #tpu.memory_space<vmem>>, %arg2: memref<1x32xf32, #tpu.memory_space<vmem>>, %arg3: memref<1x32xf32, #tpu.memory_space<vmem>>, %arg4: memref<2x32x96xf32, #tpu.memory_space<vmem>>, %arg5: memref<2x1x96xf32, #tpu.memory_space<vmem>>, %arg6: memref<2x32x32xf32, #tpu.memory_space<vmem>>, %arg7: memref<2x1x32xf32, #tpu.memory_space<vmem>>, %arg8: memref<2x1x32xf32, #tpu.memory_space<vmem>>, %arg9: memref<2x1x32xf32, #tpu.memory_space<vmem>>, %arg10: memref<2x32x64xf32, #tpu.memory_space<vmem>>, %arg11: memref<2x1x64xf32, #tpu.memory_space<vmem>>, %arg12: memref<2x64x32xf32, #tpu.memory_space<vmem>>, %arg13: memref<2x1x32xf32, #tpu.memory_space<vmem>>, %arg14: memref<2x1x32xf32, #tpu.memory_space<vmem>>, %arg15: memref<2x1x32xf32, #tpu.memory_space<vmem>>, %arg16: memref<32x128xf32, #tpu.memory_space<vmem>>, %arg17: memref<1x128xf32, #tpu.memory_space<vmem>>, %arg18: memref<16x128xf32, #tpu.memory_space<vmem>>, %arg19: memref<16x32xf32, #tpu.memory_space<vmem>>) attributes {dimension_semantics = [], scalar_prefetch = 0 : i64, scratch_operands = 1 : i64, tpu.core_type = #tpu.core_type<tc>} {
    %c0 = arith.constant 0 : index
    %c0_0 = arith.constant 0 : index
    %0 = vector.load %arg0[%c0, %c0_0] : memref<16x32xf32, #tpu.memory_space<vmem>>, vector<16x32xf32>
    %c0_1 = arith.constant 0 : index
    %c0_2 = arith.constant 0 : index
    %1 = vector.load %arg2[%c0_1, %c0_2] : memref<1x32xf32, #tpu.memory_space<vmem>>, vector<1x32xf32>
    %c0_3 = arith.constant 0 : index
    %c0_4 = arith.constant 0 : index
    %2 = vector.load %arg3[%c0_3, %c0_4] : memref<1x32xf32, #tpu.memory_space<vmem>>, vector<1x32xf32>
    %cst = arith.constant dense<0.000000e+00> : vector<16xf32>
    %3 = vector.multi_reduction <add>, %0, %cst [1] : vector<16x32xf32> to vector<16xf32>
    %4 = vector.shape_cast %3 : vector<16xf32> to vector<16x1xf32>
    %cst_5 = arith.constant 3.200000e+01 : f32
    %5 = vector.broadcast %cst_5 : f32 to vector<16x1xf32>
    %6 = arith.divf %4, %5 : vector<16x1xf32>
    %7 = vector.broadcast %6 : vector<16x1xf32> to vector<16x32xf32>
    %8 = arith.subf %0, %7 : vector<16x32xf32>
    %9 = arith.mulf %8, %8 : vector<16x32xf32>
    %cst_6 = arith.constant dense<0.000000e+00> : vector<16xf32>
    %10 = vector.multi_reduction <add>, %9, %cst_6 [1] : vector<16x32xf32> to vector<16xf32>
    %11 = vector.shape_cast %10 : vector<16xf32> to vector<16x1xf32>
    %cst_7 = arith.constant 3.200000e+01 : f32
    %12 = vector.broadcast %cst_7 : f32 to vector<16x1xf32>
    %13 = arith.divf %11, %12 : vector<16x1xf32>
    %cst_8 = arith.constant 9.99999996E-13 : f32
    %14 = vector.broadcast %cst_8 : f32 to vector<16x1xf32>
    %15 = arith.addf %13, %14 : vector<16x1xf32>
    %16 = math.rsqrt %15 : vector<16x1xf32>
    %17 = vector.broadcast %16 : vector<16x1xf32> to vector<16x32xf32>
    %18 = arith.mulf %8, %17 : vector<16x32xf32>
    %19 = vector.broadcast %1 : vector<1x32xf32> to vector<16x32xf32>
    %20 = arith.mulf %18, %19 : vector<16x32xf32>
    %21 = vector.broadcast %2 : vector<1x32xf32> to vector<16x32xf32>
    %22 = arith.addf %20, %21 : vector<16x32xf32>
    %c0_9 = arith.constant 0 : index
    %c0_10 = arith.constant 0 : index
    %c0_11 = arith.constant 0 : index
    %23 = vector.load %arg4[%c0_9, %c0_10, %c0_11] : memref<2x32x96xf32, #tpu.memory_space<vmem>>, vector<1x32x96xf32>
    %24 = vector.shape_cast %23 : vector<1x32x96xf32> to vector<32x96xf32>
    %cst_12 = arith.constant dense<0.000000e+00> : vector<16x96xf32>
    %25 = tpu.matmul %22, %24, %cst_12 {dimension_numbers = #tpu.dot_dimension_numbers<[1], [0], [0], [1], [0, 0, 1, 1], [], []>} : vector<16x32xf32>, vector<32x96xf32>, vector<16x96xf32> -> vector<16x96xf32>
    %c0_13 = arith.constant 0 : index
    %c0_14 = arith.constant 0 : index
    %c0_15 = arith.constant 0 : index
    %26 = vector.load %arg5[%c0_13, %c0_14, %c0_15] : memref<2x1x96xf32, #tpu.memory_space<vmem>>, vector<1x1x96xf32>
    %27 = vector.shape_cast %26 : vector<1x1x96xf32> to vector<1x96xf32>
    %28 = vector.broadcast %27 : vector<1x96xf32> to vector<16x96xf32>
    %29 = arith.addf %25, %28 : vector<16x96xf32>
    %30 = vector.extract_strided_slice %29 {offsets = [0, 0], sizes = [16, 32], strides = [1, 1]} : vector<16x96xf32> to vector<16x32xf32>
    %31 = vector.extract_strided_slice %29 {offsets = [0, 32], sizes = [16, 32], strides = [1, 1]} : vector<16x96xf32> to vector<16x32xf32>
    %32 = vector.extract_strided_slice %29 {offsets = [0, 64], sizes = [16, 32], strides = [1, 1]} : vector<16x96xf32> to vector<16x32xf32>
    %c0_16 = arith.constant 0 : index
    %c0_17 = arith.constant 0 : index
    %c0_18 = arith.constant 0 : index
    %33 = vector.load %arg6[%c0_16, %c0_17, %c0_18] : memref<2x32x32xf32, #tpu.memory_space<vmem>>, vector<1x32x32xf32>
    %34 = vector.shape_cast %33 : vector<1x32x32xf32> to vector<32x32xf32>
    %c0_19 = arith.constant 0 : index
    %c0_20 = arith.constant 0 : index
    %c0_21 = arith.constant 0 : index
    %35 = vector.load %arg1[%c0_19, %c0_20, %c0_21] : memref<2x1x8xf32, #tpu.memory_space<vmem>>, vector<1x1x8xf32>
    %36 = vector.shape_cast %35 : vector<1x1x8xf32> to vector<1x8xf32>
    %cst_22 = arith.constant 0.000000e+00 : f32
    %37 = vector.broadcast %cst_22 : f32 to vector<8x32xf32>
    %38 = vector.extract_strided_slice %30 {offsets = [0, 0], sizes = [8, 8], strides = [1, 1]} : vector<16x32xf32> to vector<8x8xf32>
    %39 = vector.extract_strided_slice %31 {offsets = [0, 0], sizes = [8, 8], strides = [1, 1]} : vector<16x32xf32> to vector<8x8xf32>
    %40 = vector.extract_strided_slice %32 {offsets = [0, 0], sizes = [8, 8], strides = [1, 1]} : vector<16x32xf32> to vector<8x8xf32>
    %cst_23 = arith.constant dense<0.000000e+00> : vector<8x8xf32>
    %41 = tpu.matmul %38, %39, %cst_23 {dimension_numbers = #tpu.dot_dimension_numbers<[1], [1], [0], [0], [0, 0, 1, 0], [], []>} : vector<8x8xf32>, vector<8x8xf32>, vector<8x8xf32> -> vector<8x8xf32>
    %cst_24 = arith.constant 0.353553385 : f32
    %42 = vector.broadcast %cst_24 : f32 to vector<8x8xf32>
    %43 = arith.mulf %41, %42 : vector<8x8xf32>
    %44 = vector.broadcast %36 : vector<1x8xf32> to vector<8x8xf32>
    %45 = arith.addf %43, %44 : vector<8x8xf32>
    %cst_25 = arith.constant dense<0xFF800000> : vector<8xf32>
    %46 = vector.multi_reduction <maximumf>, %45, %cst_25 [1] : vector<8x8xf32> to vector<8xf32>
    %47 = vector.shape_cast %46 : vector<8xf32> to vector<8x1xf32>
    %48 = vector.broadcast %47 : vector<8x1xf32> to vector<8x8xf32>
    %49 = arith.subf %45, %48 : vector<8x8xf32>
    %50 = math.exp %49 : vector<8x8xf32>
    %cst_26 = arith.constant dense<0.000000e+00> : vector<8xf32>
    %51 = vector.multi_reduction <add>, %50, %cst_26 [1] : vector<8x8xf32> to vector<8xf32>
    %52 = vector.shape_cast %51 : vector<8xf32> to vector<8x1xf32>
    %53 = tpu.reciprocal %52 {approx = true} : vector<8x1xf32> -> vector<8x1xf32>
    %54 = vector.broadcast %53 : vector<8x1xf32> to vector<8x8xf32>
    %55 = arith.mulf %50, %54 : vector<8x8xf32>
    %cst_27 = arith.constant dense<0.000000e+00> : vector<8x8xf32>
    %56 = tpu.matmul %55, %40, %cst_27 {dimension_numbers = #tpu.dot_dimension_numbers<[1], [0], [0], [1], [0, 0, 1, 1], [], []>} : vector<8x8xf32>, vector<8x8xf32>, vector<8x8xf32> -> vector<8x8xf32>
    %57 = vector.extract_strided_slice %34 {offsets = [0, 0], sizes = [8, 32], strides = [1, 1]} : vector<32x32xf32> to vector<8x32xf32>
    %cst_28 = arith.constant dense<0.000000e+00> : vector<8x32xf32>
    %58 = tpu.matmul %56, %57, %cst_28 {dimension_numbers = #tpu.dot_dimension_numbers<[1], [0], [0], [1], [0, 0, 1, 1], [], []>} : vector<8x8xf32>, vector<8x32xf32>, vector<8x32xf32> -> vector<8x32xf32>
    %59 = arith.addf %37, %58 : vector<8x32xf32>
    %60 = vector.extract_strided_slice %30 {offsets = [0, 8], sizes = [8, 8], strides = [1, 1]} : vector<16x32xf32> to vector<8x8xf32>
    %61 = vector.extract_strided_slice %31 {offsets = [0, 8], sizes = [8, 8], strides = [1, 1]} : vector<16x32xf32> to vector<8x8xf32>
    %62 = vector.extract_strided_slice %32 {offsets = [0, 8], sizes = [8, 8], strides = [1, 1]} : vector<16x32xf32> to vector<8x8xf32>
    %cst_29 = arith.constant dense<0.000000e+00> : vector<8x8xf32>
    %63 = tpu.matmul %60, %61, %cst_29 {dimension_numbers = #tpu.dot_dimension_numbers<[1], [1], [0], [0], [0, 0, 1, 0], [], []>} : vector<8x8xf32>, vector<8x8xf32>, vector<8x8xf32> -> vector<8x8xf32>
    %cst_30 = arith.constant 0.353553385 : f32
    %64 = vector.broadcast %cst_30 : f32 to vector<8x8xf32>
    %65 = arith.mulf %63, %64 : vector<8x8xf32>
    %66 = vector.broadcast %36 : vector<1x8xf32> to vector<8x8xf32>
    %67 = arith.addf %65, %66 : vector<8x8xf32>
    %cst_31 = arith.constant dense<0xFF800000> : vector<8xf32>
    %68 = vector.multi_reduction <maximumf>, %67, %cst_31 [1] : vector<8x8xf32> to vector<8xf32>
    %69 = vector.shape_cast %68 : vector<8xf32> to vector<8x1xf32>
    %70 = vector.broadcast %69 : vector<8x1xf32> to vector<8x8xf32>
    %71 = arith.subf %67, %70 : vector<8x8xf32>
    %72 = math.exp %71 : vector<8x8xf32>
    %cst_32 = arith.constant dense<0.000000e+00> : vector<8xf32>
    %73 = vector.multi_reduction <add>, %72, %cst_32 [1] : vector<8x8xf32> to vector<8xf32>
    %74 = vector.shape_cast %73 : vector<8xf32> to vector<8x1xf32>
    %75 = tpu.reciprocal %74 {approx = true} : vector<8x1xf32> -> vector<8x1xf32>
    %76 = vector.broadcast %75 : vector<8x1xf32> to vector<8x8xf32>
    %77 = arith.mulf %72, %76 : vector<8x8xf32>
    %cst_33 = arith.constant dense<0.000000e+00> : vector<8x8xf32>
    %78 = tpu.matmul %77, %62, %cst_33 {dimension_numbers = #tpu.dot_dimension_numbers<[1], [0], [0], [1], [0, 0, 1, 1], [], []>} : vector<8x8xf32>, vector<8x8xf32>, vector<8x8xf32> -> vector<8x8xf32>
    %79 = vector.extract_strided_slice %34 {offsets = [8, 0], sizes = [8, 32], strides = [1, 1]} : vector<32x32xf32> to vector<8x32xf32>
    %cst_34 = arith.constant dense<0.000000e+00> : vector<8x32xf32>
    %80 = tpu.matmul %78, %79, %cst_34 {dimension_numbers = #tpu.dot_dimension_numbers<[1], [0], [0], [1], [0, 0, 1, 1], [], []>} : vector<8x8xf32>, vector<8x32xf32>, vector<8x32xf32> -> vector<8x32xf32>
    %81 = arith.addf %59, %80 : vector<8x32xf32>
    %82 = vector.extract_strided_slice %30 {offsets = [0, 16], sizes = [8, 8], strides = [1, 1]} : vector<16x32xf32> to vector<8x8xf32>
    %83 = vector.extract_strided_slice %31 {offsets = [0, 16], sizes = [8, 8], strides = [1, 1]} : vector<16x32xf32> to vector<8x8xf32>
    %84 = vector.extract_strided_slice %32 {offsets = [0, 16], sizes = [8, 8], strides = [1, 1]} : vector<16x32xf32> to vector<8x8xf32>
    %cst_35 = arith.constant dense<0.000000e+00> : vector<8x8xf32>
    %85 = tpu.matmul %82, %83, %cst_35 {dimension_numbers = #tpu.dot_dimension_numbers<[1], [1], [0], [0], [0, 0, 1, 0], [], []>} : vector<8x8xf32>, vector<8x8xf32>, vector<8x8xf32> -> vector<8x8xf32>
    %cst_36 = arith.constant 0.353553385 : f32
    %86 = vector.broadcast %cst_36 : f32 to vector<8x8xf32>
    %87 = arith.mulf %85, %86 : vector<8x8xf32>
    %88 = vector.broadcast %36 : vector<1x8xf32> to vector<8x8xf32>
    %89 = arith.addf %87, %88 : vector<8x8xf32>
    %cst_37 = arith.constant dense<0xFF800000> : vector<8xf32>
    %90 = vector.multi_reduction <maximumf>, %89, %cst_37 [1] : vector<8x8xf32> to vector<8xf32>
    %91 = vector.shape_cast %90 : vector<8xf32> to vector<8x1xf32>
    %92 = vector.broadcast %91 : vector<8x1xf32> to vector<8x8xf32>
    %93 = arith.subf %89, %92 : vector<8x8xf32>
    %94 = math.exp %93 : vector<8x8xf32>
    %cst_38 = arith.constant dense<0.000000e+00> : vector<8xf32>
    %95 = vector.multi_reduction <add>, %94, %cst_38 [1] : vector<8x8xf32> to vector<8xf32>
    %96 = vector.shape_cast %95 : vector<8xf32> to vector<8x1xf32>
    %97 = tpu.reciprocal %96 {approx = true} : vector<8x1xf32> -> vector<8x1xf32>
    %98 = vector.broadcast %97 : vector<8x1xf32> to vector<8x8xf32>
    %99 = arith.mulf %94, %98 : vector<8x8xf32>
    %cst_39 = arith.constant dense<0.000000e+00> : vector<8x8xf32>
    %100 = tpu.matmul %99, %84, %cst_39 {dimension_numbers = #tpu.dot_dimension_numbers<[1], [0], [0], [1], [0, 0, 1, 1], [], []>} : vector<8x8xf32>, vector<8x8xf32>, vector<8x8xf32> -> vector<8x8xf32>
    %101 = vector.extract_strided_slice %34 {offsets = [16, 0], sizes = [8, 32], strides = [1, 1]} : vector<32x32xf32> to vector<8x32xf32>
    %cst_40 = arith.constant dense<0.000000e+00> : vector<8x32xf32>
    %102 = tpu.matmul %100, %101, %cst_40 {dimension_numbers = #tpu.dot_dimension_numbers<[1], [0], [0], [1], [0, 0, 1, 1], [], []>} : vector<8x8xf32>, vector<8x32xf32>, vector<8x32xf32> -> vector<8x32xf32>
    %103 = arith.addf %81, %102 : vector<8x32xf32>
    %104 = vector.extract_strided_slice %30 {offsets = [0, 24], sizes = [8, 8], strides = [1, 1]} : vector<16x32xf32> to vector<8x8xf32>
    %105 = vector.extract_strided_slice %31 {offsets = [0, 24], sizes = [8, 8], strides = [1, 1]} : vector<16x32xf32> to vector<8x8xf32>
    %106 = vector.extract_strided_slice %32 {offsets = [0, 24], sizes = [8, 8], strides = [1, 1]} : vector<16x32xf32> to vector<8x8xf32>
    %cst_41 = arith.constant dense<0.000000e+00> : vector<8x8xf32>
    %107 = tpu.matmul %104, %105, %cst_41 {dimension_numbers = #tpu.dot_dimension_numbers<[1], [1], [0], [0], [0, 0, 1, 0], [], []>} : vector<8x8xf32>, vector<8x8xf32>, vector<8x8xf32> -> vector<8x8xf32>
    %cst_42 = arith.constant 0.353553385 : f32
    %108 = vector.broadcast %cst_42 : f32 to vector<8x8xf32>
    %109 = arith.mulf %107, %108 : vector<8x8xf32>
    %110 = vector.broadcast %36 : vector<1x8xf32> to vector<8x8xf32>
    %111 = arith.addf %109, %110 : vector<8x8xf32>
    %cst_43 = arith.constant dense<0xFF800000> : vector<8xf32>
    %112 = vector.multi_reduction <maximumf>, %111, %cst_43 [1] : vector<8x8xf32> to vector<8xf32>
    %113 = vector.shape_cast %112 : vector<8xf32> to vector<8x1xf32>
    %114 = vector.broadcast %113 : vector<8x1xf32> to vector<8x8xf32>
    %115 = arith.subf %111, %114 : vector<8x8xf32>
    %116 = math.exp %115 : vector<8x8xf32>
    %cst_44 = arith.constant dense<0.000000e+00> : vector<8xf32>
    %117 = vector.multi_reduction <add>, %116, %cst_44 [1] : vector<8x8xf32> to vector<8xf32>
    %118 = vector.shape_cast %117 : vector<8xf32> to vector<8x1xf32>
    %119 = tpu.reciprocal %118 {approx = true} : vector<8x1xf32> -> vector<8x1xf32>
    %120 = vector.broadcast %119 : vector<8x1xf32> to vector<8x8xf32>
    %121 = arith.mulf %116, %120 : vector<8x8xf32>
    %cst_45 = arith.constant dense<0.000000e+00> : vector<8x8xf32>
    %122 = tpu.matmul %121, %106, %cst_45 {dimension_numbers = #tpu.dot_dimension_numbers<[1], [0], [0], [1], [0, 0, 1, 1], [], []>} : vector<8x8xf32>, vector<8x8xf32>, vector<8x8xf32> -> vector<8x8xf32>
    %123 = vector.extract_strided_slice %34 {offsets = [24, 0], sizes = [8, 32], strides = [1, 1]} : vector<32x32xf32> to vector<8x32xf32>
    %cst_46 = arith.constant dense<0.000000e+00> : vector<8x32xf32>
    %124 = tpu.matmul %122, %123, %cst_46 {dimension_numbers = #tpu.dot_dimension_numbers<[1], [0], [0], [1], [0, 0, 1, 1], [], []>} : vector<8x8xf32>, vector<8x32xf32>, vector<8x32xf32> -> vector<8x32xf32>
    %125 = arith.addf %103, %124 : vector<8x32xf32>
    %c0_47 = arith.constant 0 : index
    %c0_48 = arith.constant 0 : index
    %126 = vector.load %arg19[%c0_47, %c0_48] : memref<16x32xf32, #tpu.memory_space<vmem>>, vector<8x32xf32>
    tpu.vector_store %arg19[%c0_47, %c0_48], %125 {strides = array<i32>} : memref<16x32xf32, #tpu.memory_space<vmem>>, vector<8x32xf32>,
    %c1 = arith.constant 1 : index
    %c0_49 = arith.constant 0 : index
    %c0_50 = arith.constant 0 : index
    %127 = vector.load %arg1[%c1, %c0_49, %c0_50] : memref<2x1x8xf32, #tpu.memory_space<vmem>>, vector<1x1x8xf32>
    %128 = vector.shape_cast %127 : vector<1x1x8xf32> to vector<1x8xf32>
    %cst_51 = arith.constant 0.000000e+00 : f32
    %129 = vector.broadcast %cst_51 : f32 to vector<8x32xf32>
    %130 = vector.extract_strided_slice %30 {offsets = [8, 0], sizes = [8, 8], strides = [1, 1]} : vector<16x32xf32> to vector<8x8xf32>
    %131 = vector.extract_strided_slice %31 {offsets = [8, 0], sizes = [8, 8], strides = [1, 1]} : vector<16x32xf32> to vector<8x8xf32>
    %132 = vector.extract_strided_slice %32 {offsets = [8, 0], sizes = [8, 8], strides = [1, 1]} : vector<16x32xf32> to vector<8x8xf32>
    %cst_52 = arith.constant dense<0.000000e+00> : vector<8x8xf32>
    %133 = tpu.matmul %130, %131, %cst_52 {dimension_numbers = #tpu.dot_dimension_numbers<[1], [1], [0], [0], [0, 0, 1, 0], [], []>} : vector<8x8xf32>, vector<8x8xf32>, vector<8x8xf32> -> vector<8x8xf32>
    %cst_53 = arith.constant 0.353553385 : f32
    %134 = vector.broadcast %cst_53 : f32 to vector<8x8xf32>
    %135 = arith.mulf %133, %134 : vector<8x8xf32>
    %136 = vector.broadcast %128 : vector<1x8xf32> to vector<8x8xf32>
    %137 = arith.addf %135, %136 : vector<8x8xf32>
    %cst_54 = arith.constant dense<0xFF800000> : vector<8xf32>
    %138 = vector.multi_reduction <maximumf>, %137, %cst_54 [1] : vector<8x8xf32> to vector<8xf32>
    %139 = vector.shape_cast %138 : vector<8xf32> to vector<8x1xf32>
    %140 = vector.broadcast %139 : vector<8x1xf32> to vector<8x8xf32>
    %141 = arith.subf %137, %140 : vector<8x8xf32>
    %142 = math.exp %141 : vector<8x8xf32>
    %cst_55 = arith.constant dense<0.000000e+00> : vector<8xf32>
    %143 = vector.multi_reduction <add>, %142, %cst_55 [1] : vector<8x8xf32> to vector<8xf32>
    %144 = vector.shape_cast %143 : vector<8xf32> to vector<8x1xf32>
    %145 = tpu.reciprocal %144 {approx = true} : vector<8x1xf32> -> vector<8x1xf32>
    %146 = vector.broadcast %145 : vector<8x1xf32> to vector<8x8xf32>
    %147 = arith.mulf %142, %146 : vector<8x8xf32>
    %cst_56 = arith.constant dense<0.000000e+00> : vector<8x8xf32>
    %148 = tpu.matmul %147, %132, %cst_56 {dimension_numbers = #tpu.dot_dimension_numbers<[1], [0], [0], [1], [0, 0, 1, 1], [], []>} : vector<8x8xf32>, vector<8x8xf32>, vector<8x8xf32> -> vector<8x8xf32>
    %149 = vector.extract_strided_slice %34 {offsets = [0, 0], sizes = [8, 32], strides = [1, 1]} : vector<32x32xf32> to vector<8x32xf32>
    %cst_57 = arith.constant dense<0.000000e+00> : vector<8x32xf32>
    %150 = tpu.matmul %148, %149, %cst_57 {dimension_numbers = #tpu.dot_dimension_numbers<[1], [0], [0], [1], [0, 0, 1, 1], [], []>} : vector<8x8xf32>, vector<8x32xf32>, vector<8x32xf32> -> vector<8x32xf32>
    %151 = arith.addf %129, %150 : vector<8x32xf32>
    %152 = vector.extract_strided_slice %30 {offsets = [8, 8], sizes = [8, 8], strides = [1, 1]} : vector<16x32xf32> to vector<8x8xf32>
    %153 = vector.extract_strided_slice %31 {offsets = [8, 8], sizes = [8, 8], strides = [1, 1]} : vector<16x32xf32> to vector<8x8xf32>
    %154 = vector.extract_strided_slice %32 {offsets = [8, 8], sizes = [8, 8], strides = [1, 1]} : vector<16x32xf32> to vector<8x8xf32>
    %cst_58 = arith.constant dense<0.000000e+00> : vector<8x8xf32>
    %155 = tpu.matmul %152, %153, %cst_58 {dimension_numbers = #tpu.dot_dimension_numbers<[1], [1], [0], [0], [0, 0, 1, 0], [], []>} : vector<8x8xf32>, vector<8x8xf32>, vector<8x8xf32> -> vector<8x8xf32>
    %cst_59 = arith.constant 0.353553385 : f32
    %156 = vector.broadcast %cst_59 : f32 to vector<8x8xf32>
    %157 = arith.mulf %155, %156 : vector<8x8xf32>
    %158 = vector.broadcast %128 : vector<1x8xf32> to vector<8x8xf32>
    %159 = arith.addf %157, %158 : vector<8x8xf32>
    %cst_60 = arith.constant dense<0xFF800000> : vector<8xf32>
    %160 = vector.multi_reduction <maximumf>, %159, %cst_60 [1] : vector<8x8xf32> to vector<8xf32>
    %161 = vector.shape_cast %160 : vector<8xf32> to vector<8x1xf32>
    %162 = vector.broadcast %161 : vector<8x1xf32> to vector<8x8xf32>
    %163 = arith.subf %159, %162 : vector<8x8xf32>
    %164 = math.exp %163 : vector<8x8xf32>
    %cst_61 = arith.constant dense<0.000000e+00> : vector<8xf32>
    %165 = vector.multi_reduction <add>, %164, %cst_61 [1] : vector<8x8xf32> to vector<8xf32>
    %166 = vector.shape_cast %165 : vector<8xf32> to vector<8x1xf32>
    %167 = tpu.reciprocal %166 {approx = true} : vector<8x1xf32> -> vector<8x1xf32>
    %168 = vector.broadcast %167 : vector<8x1xf32> to vector<8x8xf32>
    %169 = arith.mulf %164, %168 : vector<8x8xf32>
    %cst_62 = arith.constant dense<0.000000e+00> : vector<8x8xf32>
    %170 = tpu.matmul %169, %154, %cst_62 {dimension_numbers = #tpu.dot_dimension_numbers<[1], [0], [0], [1], [0, 0, 1, 1], [], []>} : vector<8x8xf32>, vector<8x8xf32>, vector<8x8xf32> -> vector<8x8xf32>
    %171 = vector.extract_strided_slice %34 {offsets = [8, 0], sizes = [8, 32], strides = [1, 1]} : vector<32x32xf32> to vector<8x32xf32>
    %cst_63 = arith.constant dense<0.000000e+00> : vector<8x32xf32>
    %172 = tpu.matmul %170, %171, %cst_63 {dimension_numbers = #tpu.dot_dimension_numbers<[1], [0], [0], [1], [0, 0, 1, 1], [], []>} : vector<8x8xf32>, vector<8x32xf32>, vector<8x32xf32> -> vector<8x32xf32>
    %173 = arith.addf %151, %172 : vector<8x32xf32>
    %174 = vector.extract_strided_slice %30 {offsets = [8, 16], sizes = [8, 8], strides = [1, 1]} : vector<16x32xf32> to vector<8x8xf32>
    %175 = vector.extract_strided_slice %31 {offsets = [8, 16], sizes = [8, 8], strides = [1, 1]} : vector<16x32xf32> to vector<8x8xf32>
    %176 = vector.extract_strided_slice %32 {offsets = [8, 16], sizes = [8, 8], strides = [1, 1]} : vector<16x32xf32> to vector<8x8xf32>
    %cst_64 = arith.constant dense<0.000000e+00> : vector<8x8xf32>
    %177 = tpu.matmul %174, %175, %cst_64 {dimension_numbers = #tpu.dot_dimension_numbers<[1], [1], [0], [0], [0, 0, 1, 0], [], []>} : vector<8x8xf32>, vector<8x8xf32>, vector<8x8xf32> -> vector<8x8xf32>
    %cst_65 = arith.constant 0.353553385 : f32
    %178 = vector.broadcast %cst_65 : f32 to vector<8x8xf32>
    %179 = arith.mulf %177, %178 : vector<8x8xf32>
    %180 = vector.broadcast %128 : vector<1x8xf32> to vector<8x8xf32>
    %181 = arith.addf %179, %180 : vector<8x8xf32>
    %cst_66 = arith.constant dense<0xFF800000> : vector<8xf32>
    %182 = vector.multi_reduction <maximumf>, %181, %cst_66 [1] : vector<8x8xf32> to vector<8xf32>
    %183 = vector.shape_cast %182 : vector<8xf32> to vector<8x1xf32>
    %184 = vector.broadcast %183 : vector<8x1xf32> to vector<8x8xf32>
    %185 = arith.subf %181, %184 : vector<8x8xf32>
    %186 = math.exp %185 : vector<8x8xf32>
    %cst_67 = arith.constant dense<0.000000e+00> : vector<8xf32>
    %187 = vector.multi_reduction <add>, %186, %cst_67 [1] : vector<8x8xf32> to vector<8xf32>
    %188 = vector.shape_cast %187 : vector<8xf32> to vector<8x1xf32>
    %189 = tpu.reciprocal %188 {approx = true} : vector<8x1xf32> -> vector<8x1xf32>
    %190 = vector.broadcast %189 : vector<8x1xf32> to vector<8x8xf32>
    %191 = arith.mulf %186, %190 : vector<8x8xf32>
    %cst_68 = arith.constant dense<0.000000e+00> : vector<8x8xf32>
    %192 = tpu.matmul %191, %176, %cst_68 {dimension_numbers = #tpu.dot_dimension_numbers<[1], [0], [0], [1], [0, 0, 1, 1], [], []>} : vector<8x8xf32>, vector<8x8xf32>, vector<8x8xf32> -> vector<8x8xf32>
    %193 = vector.extract_strided_slice %34 {offsets = [16, 0], sizes = [8, 32], strides = [1, 1]} : vector<32x32xf32> to vector<8x32xf32>
    %cst_69 = arith.constant dense<0.000000e+00> : vector<8x32xf32>
    %194 = tpu.matmul %192, %193, %cst_69 {dimension_numbers = #tpu.dot_dimension_numbers<[1], [0], [0], [1], [0, 0, 1, 1], [], []>} : vector<8x8xf32>, vector<8x32xf32>, vector<8x32xf32> -> vector<8x32xf32>
    %195 = arith.addf %173, %194 : vector<8x32xf32>
    %196 = vector.extract_strided_slice %30 {offsets = [8, 24], sizes = [8, 8], strides = [1, 1]} : vector<16x32xf32> to vector<8x8xf32>
    %197 = vector.extract_strided_slice %31 {offsets = [8, 24], sizes = [8, 8], strides = [1, 1]} : vector<16x32xf32> to vector<8x8xf32>
    %198 = vector.extract_strided_slice %32 {offsets = [8, 24], sizes = [8, 8], strides = [1, 1]} : vector<16x32xf32> to vector<8x8xf32>
    %cst_70 = arith.constant dense<0.000000e+00> : vector<8x8xf32>
    %199 = tpu.matmul %196, %197, %cst_70 {dimension_numbers = #tpu.dot_dimension_numbers<[1], [1], [0], [0], [0, 0, 1, 0], [], []>} : vector<8x8xf32>, vector<8x8xf32>, vector<8x8xf32> -> vector<8x8xf32>
    %cst_71 = arith.constant 0.353553385 : f32
    %200 = vector.broadcast %cst_71 : f32 to vector<8x8xf32>
    %201 = arith.mulf %199, %200 : vector<8x8xf32>
    %202 = vector.broadcast %128 : vector<1x8xf32> to vector<8x8xf32>
    %203 = arith.addf %201, %202 : vector<8x8xf32>
    %cst_72 = arith.constant dense<0xFF800000> : vector<8xf32>
    %204 = vector.multi_reduction <maximumf>, %203, %cst_72 [1] : vector<8x8xf32> to vector<8xf32>
    %205 = vector.shape_cast %204 : vector<8xf32> to vector<8x1xf32>
    %206 = vector.broadcast %205 : vector<8x1xf32> to vector<8x8xf32>
    %207 = arith.subf %203, %206 : vector<8x8xf32>
    %208 = math.exp %207 : vector<8x8xf32>
    %cst_73 = arith.constant dense<0.000000e+00> : vector<8xf32>
    %209 = vector.multi_reduction <add>, %208, %cst_73 [1] : vector<8x8xf32> to vector<8xf32>
    %210 = vector.shape_cast %209 : vector<8xf32> to vector<8x1xf32>
    %211 = tpu.reciprocal %210 {approx = true} : vector<8x1xf32> -> vector<8x1xf32>
    %212 = vector.broadcast %211 : vector<8x1xf32> to vector<8x8xf32>
    %213 = arith.mulf %208, %212 : vector<8x8xf32>
    %cst_74 = arith.constant dense<0.000000e+00> : vector<8x8xf32>
    %214 = tpu.matmul %213, %198, %cst_74 {dimension_numbers = #tpu.dot_dimension_numbers<[1], [0], [0], [1], [0, 0, 1, 1], [], []>} : vector<8x8xf32>, vector<8x8xf32>, vector<8x8xf32> -> vector<8x8xf32>
    %215 = vector.extract_strided_slice %34 {offsets = [24, 0], sizes = [8, 32], strides = [1, 1]} : vector<32x32xf32> to vector<8x32xf32>
    %cst_75 = arith.constant dense<0.000000e+00> : vector<8x32xf32>
    %216 = tpu.matmul %214, %215, %cst_75 {dimension_numbers = #tpu.dot_dimension_numbers<[1], [0], [0], [1], [0, 0, 1, 1], [], []>} : vector<8x8xf32>, vector<8x32xf32>, vector<8x32xf32> -> vector<8x32xf32>
    %217 = arith.addf %195, %216 : vector<8x32xf32>
    %c8 = arith.constant 8 : index
    %c0_76 = arith.constant 0 : index
    %218 = vector.load %arg19[%c8, %c0_76] : memref<16x32xf32, #tpu.memory_space<vmem>>, vector<8x32xf32>
    tpu.vector_store %arg19[%c8, %c0_76], %217 {strides = array<i32>} : memref<16x32xf32, #tpu.memory_space<vmem>>, vector<8x32xf32>,
    %c0_77 = arith.constant 0 : index
    %c0_78 = arith.constant 0 : index
    %219 = vector.load %arg19[%c0_77, %c0_78] : memref<16x32xf32, #tpu.memory_space<vmem>>, vector<16x32xf32>
    %c0_79 = arith.constant 0 : index
    %c0_80 = arith.constant 0 : index
    %c0_81 = arith.constant 0 : index
    %220 = vector.load %arg7[%c0_79, %c0_80, %c0_81] : memref<2x1x32xf32, #tpu.memory_space<vmem>>, vector<1x1x32xf32>
    %221 = vector.shape_cast %220 : vector<1x1x32xf32> to vector<1x32xf32>
    %222 = vector.broadcast %221 : vector<1x32xf32> to vector<16x32xf32>
    %223 = arith.addf %219, %222 : vector<16x32xf32>
    %224 = arith.addf %223, %22 : vector<16x32xf32>
    %c0_82 = arith.constant 0 : index
    %c0_83 = arith.constant 0 : index
    %c0_84 = arith.constant 0 : index
    %225 = vector.load %arg8[%c0_82, %c0_83, %c0_84] : memref<2x1x32xf32, #tpu.memory_space<vmem>>, vector<1x1x32xf32>
    %226 = vector.shape_cast %225 : vector<1x1x32xf32> to vector<1x32xf32>
    %c0_85 = arith.constant 0 : index
    %c0_86 = arith.constant 0 : index
    %c0_87 = arith.constant 0 : index
    %227 = vector.load %arg9[%c0_85, %c0_86, %c0_87] : memref<2x1x32xf32, #tpu.memory_space<vmem>>, vector<1x1x32xf32>
    %228 = vector.shape_cast %227 : vector<1x1x32xf32> to vector<1x32xf32>
    %cst_88 = arith.constant dense<0.000000e+00> : vector<16xf32>
    %229 = vector.multi_reduction <add>, %224, %cst_88 [1] : vector<16x32xf32> to vector<16xf32>
    %230 = vector.shape_cast %229 : vector<16xf32> to vector<16x1xf32>
    %cst_89 = arith.constant 3.200000e+01 : f32
    %231 = vector.broadcast %cst_89 : f32 to vector<16x1xf32>
    %232 = arith.divf %230, %231 : vector<16x1xf32>
    %233 = vector.broadcast %232 : vector<16x1xf32> to vector<16x32xf32>
    %234 = arith.subf %224, %233 : vector<16x32xf32>
    %235 = arith.mulf %234, %234 : vector<16x32xf32>
    %cst_90 = arith.constant dense<0.000000e+00> : vector<16xf32>
    %236 = vector.multi_reduction <add>, %235, %cst_90 [1] : vector<16x32xf32> to vector<16xf32>
    %237 = vector.shape_cast %236 : vector<16xf32> to vector<16x1xf32>
    %cst_91 = arith.constant 3.200000e+01 : f32
    %238 = vector.broadcast %cst_91 : f32 to vector<16x1xf32>
    %239 = arith.divf %237, %238 : vector<16x1xf32>
    %cst_92 = arith.constant 9.99999996E-13 : f32
    %240 = vector.broadcast %cst_92 : f32 to vector<16x1xf32>
    %241 = arith.addf %239, %240 : vector<16x1xf32>
    %242 = math.rsqrt %241 : vector<16x1xf32>
    %243 = vector.broadcast %242 : vector<16x1xf32> to vector<16x32xf32>
    %244 = arith.mulf %234, %243 : vector<16x32xf32>
    %245 = vector.broadcast %226 : vector<1x32xf32> to vector<16x32xf32>
    %246 = arith.mulf %244, %245 : vector<16x32xf32>
    %247 = vector.broadcast %228 : vector<1x32xf32> to vector<16x32xf32>
    %248 = arith.addf %246, %247 : vector<16x32xf32>
    %c0_93 = arith.constant 0 : index
    %c0_94 = arith.constant 0 : index
    %c0_95 = arith.constant 0 : index
    %249 = vector.load %arg10[%c0_93, %c0_94, %c0_95] : memref<2x32x64xf32, #tpu.memory_space<vmem>>, vector<1x32x64xf32>
    %250 = vector.shape_cast %249 : vector<1x32x64xf32> to vector<32x64xf32>
    %cst_96 = arith.constant dense<0.000000e+00> : vector<16x64xf32>
    %251 = tpu.matmul %248, %250, %cst_96 {dimension_numbers = #tpu.dot_dimension_numbers<[1], [0], [0], [1], [0, 0, 1, 1], [], []>} : vector<16x32xf32>, vector<32x64xf32>, vector<16x64xf32> -> vector<16x64xf32>
    %c0_97 = arith.constant 0 : index
    %c0_98 = arith.constant 0 : index
    %c0_99 = arith.constant 0 : index
    %252 = vector.load %arg11[%c0_97, %c0_98, %c0_99] : memref<2x1x64xf32, #tpu.memory_space<vmem>>, vector<1x1x64xf32>
    %253 = vector.shape_cast %252 : vector<1x1x64xf32> to vector<1x64xf32>
    %254 = vector.broadcast %253 : vector<1x64xf32> to vector<16x64xf32>
    %255 = arith.addf %251, %254 : vector<16x64xf32>
    %cst_100 = arith.constant 5.000000e-01 : f32
    %256 = vector.broadcast %cst_100 : f32 to vector<16x64xf32>
    %257 = arith.mulf %256, %255 : vector<16x64xf32>
    %cst_101 = arith.constant 0.707106769 : f32
    %258 = vector.broadcast %cst_101 : f32 to vector<16x64xf32>
    %259 = arith.mulf %255, %258 : vector<16x64xf32>
    %260 = math.erf %259 : vector<16x64xf32>
    %cst_102 = arith.constant 1.000000e+00 : f32
    %261 = vector.broadcast %cst_102 : f32 to vector<16x64xf32>
    %262 = arith.addf %261, %260 : vector<16x64xf32>
    %263 = arith.mulf %257, %262 : vector<16x64xf32>
    %c0_103 = arith.constant 0 : index
    %c0_104 = arith.constant 0 : index
    %c0_105 = arith.constant 0 : index
    %264 = vector.load %arg12[%c0_103, %c0_104, %c0_105] : memref<2x64x32xf32, #tpu.memory_space<vmem>>, vector<1x64x32xf32>
    %265 = vector.shape_cast %264 : vector<1x64x32xf32> to vector<64x32xf32>
    %cst_106 = arith.constant dense<0.000000e+00> : vector<16x32xf32>
    %266 = tpu.matmul %263, %265, %cst_106 {dimension_numbers = #tpu.dot_dimension_numbers<[1], [0], [0], [1], [0, 0, 1, 1], [], []>} : vector<16x64xf32>, vector<64x32xf32>, vector<16x32xf32> -> vector<16x32xf32>
    %c0_107 = arith.constant 0 : index
    %c0_108 = arith.constant 0 : index
    %c0_109 = arith.constant 0 : index
    %267 = vector.load %arg13[%c0_107, %c0_108, %c0_109] : memref<2x1x32xf32, #tpu.memory_space<vmem>>, vector<1x1x32xf32>
    %268 = vector.shape_cast %267 : vector<1x1x32xf32> to vector<1x32xf32>
    %269 = vector.broadcast %268 : vector<1x32xf32> to vector<16x32xf32>
    %270 = arith.addf %266, %269 : vector<16x32xf32>
    %271 = arith.addf %270, %248 : vector<16x32xf32>
    %c0_110 = arith.constant 0 : index
    %c0_111 = arith.constant 0 : index
    %c0_112 = arith.constant 0 : index
    %272 = vector.load %arg14[%c0_110, %c0_111, %c0_112] : memref<2x1x32xf32, #tpu.memory_space<vmem>>, vector<1x1x32xf32>
    %273 = vector.shape_cast %272 : vector<1x1x32xf32> to vector<1x32xf32>
    %c0_113 = arith.constant 0 : index
    %c0_114 = arith.constant 0 : index
    %c0_115 = arith.constant 0 : index
    %274 = vector.load %arg15[%c0_113, %c0_114, %c0_115] : memref<2x1x32xf32, #tpu.memory_space<vmem>>, vector<1x1x32xf32>
    %275 = vector.shape_cast %274 : vector<1x1x32xf32> to vector<1x32xf32>
    %cst_116 = arith.constant dense<0.000000e+00> : vector<16xf32>
    %276 = vector.multi_reduction <add>, %271, %cst_116 [1] : vector<16x32xf32> to vector<16xf32>
    %277 = vector.shape_cast %276 : vector<16xf32> to vector<16x1xf32>
    %cst_117 = arith.constant 3.200000e+01 : f32
    %278 = vector.broadcast %cst_117 : f32 to vector<16x1xf32>
    %279 = arith.divf %277, %278 : vector<16x1xf32>
    %280 = vector.broadcast %279 : vector<16x1xf32> to vector<16x32xf32>
    %281 = arith.subf %271, %280 : vector<16x32xf32>
    %282 = arith.mulf %281, %281 : vector<16x32xf32>
    %cst_118 = arith.constant dense<0.000000e+00> : vector<16xf32>
    %283 = vector.multi_reduction <add>, %282, %cst_118 [1] : vector<16x32xf32> to vector<16xf32>
    %284 = vector.shape_cast %283 : vector<16xf32> to vector<16x1xf32>
    %cst_119 = arith.constant 3.200000e+01 : f32
    %285 = vector.broadcast %cst_119 : f32 to vector<16x1xf32>
    %286 = arith.divf %284, %285 : vector<16x1xf32>
    %cst_120 = arith.constant 9.99999996E-13 : f32
    %287 = vector.broadcast %cst_120 : f32 to vector<16x1xf32>
    %288 = arith.addf %286, %287 : vector<16x1xf32>
    %289 = math.rsqrt %288 : vector<16x1xf32>
    %290 = vector.broadcast %289 : vector<16x1xf32> to vector<16x32xf32>
    %291 = arith.mulf %281, %290 : vector<16x32xf32>
    %292 = vector.broadcast %273 : vector<1x32xf32> to vector<16x32xf32>
    %293 = arith.mulf %291, %292 : vector<16x32xf32>
    %294 = vector.broadcast %275 : vector<1x32xf32> to vector<16x32xf32>
    %295 = arith.addf %293, %294 : vector<16x32xf32>
    %c1_121 = arith.constant 1 : index
    %c0_122 = arith.constant 0 : index
    %c0_123 = arith.constant 0 : index
    %296 = vector.load %arg4[%c1_121, %c0_122, %c0_123] : memref<2x32x96xf32, #tpu.memory_space<vmem>>, vector<1x32x96xf32>
    %297 = vector.shape_cast %296 : vector<1x32x96xf32> to vector<32x96xf32>
    %cst_124 = arith.constant dense<0.000000e+00> : vector<16x96xf32>
    %298 = tpu.matmul %295, %297, %cst_124 {dimension_numbers = #tpu.dot_dimension_numbers<[1], [0], [0], [1], [0, 0, 1, 1], [], []>} : vector<16x32xf32>, vector<32x96xf32>, vector<16x96xf32> -> vector<16x96xf32>
    %c1_125 = arith.constant 1 : index
    %c0_126 = arith.constant 0 : index
    %c0_127 = arith.constant 0 : index
    %299 = vector.load %arg5[%c1_125, %c0_126, %c0_127] : memref<2x1x96xf32, #tpu.memory_space<vmem>>, vector<1x1x96xf32>
    %300 = vector.shape_cast %299 : vector<1x1x96xf32> to vector<1x96xf32>
    %301 = vector.broadcast %300 : vector<1x96xf32> to vector<16x96xf32>
    %302 = arith.addf %298, %301 : vector<16x96xf32>
    %303 = vector.extract_strided_slice %302 {offsets = [0, 0], sizes = [16, 32], strides = [1, 1]} : vector<16x96xf32> to vector<16x32xf32>
    %304 = vector.extract_strided_slice %302 {offsets = [0, 32], sizes = [16, 32], strides = [1, 1]} : vector<16x96xf32> to vector<16x32xf32>
    %305 = vector.extract_strided_slice %302 {offsets = [0, 64], sizes = [16, 32], strides = [1, 1]} : vector<16x96xf32> to vector<16x32xf32>
    %c1_128 = arith.constant 1 : index
    %c0_129 = arith.constant 0 : index
    %c0_130 = arith.constant 0 : index
    %306 = vector.load %arg6[%c1_128, %c0_129, %c0_130] : memref<2x32x32xf32, #tpu.memory_space<vmem>>, vector<1x32x32xf32>
    %307 = vector.shape_cast %306 : vector<1x32x32xf32> to vector<32x32xf32>
    %c0_131 = arith.constant 0 : index
    %c0_132 = arith.constant 0 : index
    %c0_133 = arith.constant 0 : index
    %308 = vector.load %arg1[%c0_131, %c0_132, %c0_133] : memref<2x1x8xf32, #tpu.memory_space<vmem>>, vector<1x1x8xf32>
    %309 = vector.shape_cast %308 : vector<1x1x8xf32> to vector<1x8xf32>
    %cst_134 = arith.constant 0.000000e+00 : f32
    %310 = vector.broadcast %cst_134 : f32 to vector<8x32xf32>
    %311 = vector.extract_strided_slice %303 {offsets = [0, 0], sizes = [8, 8], strides = [1, 1]} : vector<16x32xf32> to vector<8x8xf32>
    %312 = vector.extract_strided_slice %304 {offsets = [0, 0], sizes = [8, 8], strides = [1, 1]} : vector<16x32xf32> to vector<8x8xf32>
    %313 = vector.extract_strided_slice %305 {offsets = [0, 0], sizes = [8, 8], strides = [1, 1]} : vector<16x32xf32> to vector<8x8xf32>
    %cst_135 = arith.constant dense<0.000000e+00> : vector<8x8xf32>
    %314 = tpu.matmul %311, %312, %cst_135 {dimension_numbers = #tpu.dot_dimension_numbers<[1], [1], [0], [0], [0, 0, 1, 0], [], []>} : vector<8x8xf32>, vector<8x8xf32>, vector<8x8xf32> -> vector<8x8xf32>
    %cst_136 = arith.constant 0.353553385 : f32
    %315 = vector.broadcast %cst_136 : f32 to vector<8x8xf32>
    %316 = arith.mulf %314, %315 : vector<8x8xf32>
    %317 = vector.broadcast %309 : vector<1x8xf32> to vector<8x8xf32>
    %318 = arith.addf %316, %317 : vector<8x8xf32>
    %cst_137 = arith.constant dense<0xFF800000> : vector<8xf32>
    %319 = vector.multi_reduction <maximumf>, %318, %cst_137 [1] : vector<8x8xf32> to vector<8xf32>
    %320 = vector.shape_cast %319 : vector<8xf32> to vector<8x1xf32>
    %321 = vector.broadcast %320 : vector<8x1xf32> to vector<8x8xf32>
    %322 = arith.subf %318, %321 : vector<8x8xf32>
    %323 = math.exp %322 : vector<8x8xf32>
    %cst_138 = arith.constant dense<0.000000e+00> : vector<8xf32>
    %324 = vector.multi_reduction <add>, %323, %cst_138 [1] : vector<8x8xf32> to vector<8xf32>
    %325 = vector.shape_cast %324 : vector<8xf32> to vector<8x1xf32>
    %326 = tpu.reciprocal %325 {approx = true} : vector<8x1xf32> -> vector<8x1xf32>
    %327 = vector.broadcast %326 : vector<8x1xf32> to vector<8x8xf32>
    %328 = arith.mulf %323, %327 : vector<8x8xf32>
    %cst_139 = arith.constant dense<0.000000e+00> : vector<8x8xf32>
    %329 = tpu.matmul %328, %313, %cst_139 {dimension_numbers = #tpu.dot_dimension_numbers<[1], [0], [0], [1], [0, 0, 1, 1], [], []>} : vector<8x8xf32>, vector<8x8xf32>, vector<8x8xf32> -> vector<8x8xf32>
    %330 = vector.extract_strided_slice %307 {offsets = [0, 0], sizes = [8, 32], strides = [1, 1]} : vector<32x32xf32> to vector<8x32xf32>
    %cst_140 = arith.constant dense<0.000000e+00> : vector<8x32xf32>
    %331 = tpu.matmul %329, %330, %cst_140 {dimension_numbers = #tpu.dot_dimension_numbers<[1], [0], [0], [1], [0, 0, 1, 1], [], []>} : vector<8x8xf32>, vector<8x32xf32>, vector<8x32xf32> -> vector<8x32xf32>
    %332 = arith.addf %310, %331 : vector<8x32xf32>
    %333 = vector.extract_strided_slice %303 {offsets = [0, 8], sizes = [8, 8], strides = [1, 1]} : vector<16x32xf32> to vector<8x8xf32>
    %334 = vector.extract_strided_slice %304 {offsets = [0, 8], sizes = [8, 8], strides = [1, 1]} : vector<16x32xf32> to vector<8x8xf32>
    %335 = vector.extract_strided_slice %305 {offsets = [0, 8], sizes = [8, 8], strides = [1, 1]} : vector<16x32xf32> to vector<8x8xf32>
    %cst_141 = arith.constant dense<0.000000e+00> : vector<8x8xf32>
    %336 = tpu.matmul %333, %334, %cst_141 {dimension_numbers = #tpu.dot_dimension_numbers<[1], [1], [0], [0], [0, 0, 1, 0], [], []>} : vector<8x8xf32>, vector<8x8xf32>, vector<8x8xf32> -> vector<8x8xf32>
    %cst_142 = arith.constant 0.353553385 : f32
    %337 = vector.broadcast %cst_142 : f32 to vector<8x8xf32>
    %338 = arith.mulf %336, %337 : vector<8x8xf32>
    %339 = vector.broadcast %309 : vector<1x8xf32> to vector<8x8xf32>
    %340 = arith.addf %338, %339 : vector<8x8xf32>
    %cst_143 = arith.constant dense<0xFF800000> : vector<8xf32>
    %341 = vector.multi_reduction <maximumf>, %340, %cst_143 [1] : vector<8x8xf32> to vector<8xf32>
    %342 = vector.shape_cast %341 : vector<8xf32> to vector<8x1xf32>
    %343 = vector.broadcast %342 : vector<8x1xf32> to vector<8x8xf32>
    %344 = arith.subf %340, %343 : vector<8x8xf32>
    %345 = math.exp %344 : vector<8x8xf32>
    %cst_144 = arith.constant dense<0.000000e+00> : vector<8xf32>
    %346 = vector.multi_reduction <add>, %345, %cst_144 [1] : vector<8x8xf32> to vector<8xf32>
    %347 = vector.shape_cast %346 : vector<8xf32> to vector<8x1xf32>
    %348 = tpu.reciprocal %347 {approx = true} : vector<8x1xf32> -> vector<8x1xf32>
    %349 = vector.broadcast %348 : vector<8x1xf32> to vector<8x8xf32>
    %350 = arith.mulf %345, %349 : vector<8x8xf32>
    %cst_145 = arith.constant dense<0.000000e+00> : vector<8x8xf32>
    %351 = tpu.matmul %350, %335, %cst_145 {dimension_numbers = #tpu.dot_dimension_numbers<[1], [0], [0], [1], [0, 0, 1, 1], [], []>} : vector<8x8xf32>, vector<8x8xf32>, vector<8x8xf32> -> vector<8x8xf32>
    %352 = vector.extract_strided_slice %307 {offsets = [8, 0], sizes = [8, 32], strides = [1, 1]} : vector<32x32xf32> to vector<8x32xf32>
    %cst_146 = arith.constant dense<0.000000e+00> : vector<8x32xf32>
    %353 = tpu.matmul %351, %352, %cst_146 {dimension_numbers = #tpu.dot_dimension_numbers<[1], [0], [0], [1], [0, 0, 1, 1], [], []>} : vector<8x8xf32>, vector<8x32xf32>, vector<8x32xf32> -> vector<8x32xf32>
    %354 = arith.addf %332, %353 : vector<8x32xf32>
    %355 = vector.extract_strided_slice %303 {offsets = [0, 16], sizes = [8, 8], strides = [1, 1]} : vector<16x32xf32> to vector<8x8xf32>
    %356 = vector.extract_strided_slice %304 {offsets = [0, 16], sizes = [8, 8], strides = [1, 1]} : vector<16x32xf32> to vector<8x8xf32>
    %357 = vector.extract_strided_slice %305 {offsets = [0, 16], sizes = [8, 8], strides = [1, 1]} : vector<16x32xf32> to vector<8x8xf32>
    %cst_147 = arith.constant dense<0.000000e+00> : vector<8x8xf32>
    %358 = tpu.matmul %355, %356, %cst_147 {dimension_numbers = #tpu.dot_dimension_numbers<[1], [1], [0], [0], [0, 0, 1, 0], [], []>} : vector<8x8xf32>, vector<8x8xf32>, vector<8x8xf32> -> vector<8x8xf32>
    %cst_148 = arith.constant 0.353553385 : f32
    %359 = vector.broadcast %cst_148 : f32 to vector<8x8xf32>
    %360 = arith.mulf %358, %359 : vector<8x8xf32>
    %361 = vector.broadcast %309 : vector<1x8xf32> to vector<8x8xf32>
    %362 = arith.addf %360, %361 : vector<8x8xf32>
    %cst_149 = arith.constant dense<0xFF800000> : vector<8xf32>
    %363 = vector.multi_reduction <maximumf>, %362, %cst_149 [1] : vector<8x8xf32> to vector<8xf32>
    %364 = vector.shape_cast %363 : vector<8xf32> to vector<8x1xf32>
    %365 = vector.broadcast %364 : vector<8x1xf32> to vector<8x8xf32>
    %366 = arith.subf %362, %365 : vector<8x8xf32>
    %367 = math.exp %366 : vector<8x8xf32>
    %cst_150 = arith.constant dense<0.000000e+00> : vector<8xf32>
    %368 = vector.multi_reduction <add>, %367, %cst_150 [1] : vector<8x8xf32> to vector<8xf32>
    %369 = vector.shape_cast %368 : vector<8xf32> to vector<8x1xf32>
    %370 = tpu.reciprocal %369 {approx = true} : vector<8x1xf32> -> vector<8x1xf32>
    %371 = vector.broadcast %370 : vector<8x1xf32> to vector<8x8xf32>
    %372 = arith.mulf %367, %371 : vector<8x8xf32>
    %cst_151 = arith.constant dense<0.000000e+00> : vector<8x8xf32>
    %373 = tpu.matmul %372, %357, %cst_151 {dimension_numbers = #tpu.dot_dimension_numbers<[1], [0], [0], [1], [0, 0, 1, 1], [], []>} : vector<8x8xf32>, vector<8x8xf32>, vector<8x8xf32> -> vector<8x8xf32>
    %374 = vector.extract_strided_slice %307 {offsets = [16, 0], sizes = [8, 32], strides = [1, 1]} : vector<32x32xf32> to vector<8x32xf32>
    %cst_152 = arith.constant dense<0.000000e+00> : vector<8x32xf32>
    %375 = tpu.matmul %373, %374, %cst_152 {dimension_numbers = #tpu.dot_dimension_numbers<[1], [0], [0], [1], [0, 0, 1, 1], [], []>} : vector<8x8xf32>, vector<8x32xf32>, vector<8x32xf32> -> vector<8x32xf32>
    %376 = arith.addf %354, %375 : vector<8x32xf32>
    %377 = vector.extract_strided_slice %303 {offsets = [0, 24], sizes = [8, 8], strides = [1, 1]} : vector<16x32xf32> to vector<8x8xf32>
    %378 = vector.extract_strided_slice %304 {offsets = [0, 24], sizes = [8, 8], strides = [1, 1]} : vector<16x32xf32> to vector<8x8xf32>
    %379 = vector.extract_strided_slice %305 {offsets = [0, 24], sizes = [8, 8], strides = [1, 1]} : vector<16x32xf32> to vector<8x8xf32>
    %cst_153 = arith.constant dense<0.000000e+00> : vector<8x8xf32>
    %380 = tpu.matmul %377, %378, %cst_153 {dimension_numbers = #tpu.dot_dimension_numbers<[1], [1], [0], [0], [0, 0, 1, 0], [], []>} : vector<8x8xf32>, vector<8x8xf32>, vector<8x8xf32> -> vector<8x8xf32>
    %cst_154 = arith.constant 0.353553385 : f32
    %381 = vector.broadcast %cst_154 : f32 to vector<8x8xf32>
    %382 = arith.mulf %380, %381 : vector<8x8xf32>
    %383 = vector.broadcast %309 : vector<1x8xf32> to vector<8x8xf32>
    %384 = arith.addf %382, %383 : vector<8x8xf32>
    %cst_155 = arith.constant dense<0xFF800000> : vector<8xf32>
    %385 = vector.multi_reduction <maximumf>, %384, %cst_155 [1] : vector<8x8xf32> to vector<8xf32>
    %386 = vector.shape_cast %385 : vector<8xf32> to vector<8x1xf32>
    %387 = vector.broadcast %386 : vector<8x1xf32> to vector<8x8xf32>
    %388 = arith.subf %384, %387 : vector<8x8xf32>
    %389 = math.exp %388 : vector<8x8xf32>
    %cst_156 = arith.constant dense<0.000000e+00> : vector<8xf32>
    %390 = vector.multi_reduction <add>, %389, %cst_156 [1] : vector<8x8xf32> to vector<8xf32>
    %391 = vector.shape_cast %390 : vector<8xf32> to vector<8x1xf32>
    %392 = tpu.reciprocal %391 {approx = true} : vector<8x1xf32> -> vector<8x1xf32>
    %393 = vector.broadcast %392 : vector<8x1xf32> to vector<8x8xf32>
    %394 = arith.mulf %389, %393 : vector<8x8xf32>
    %cst_157 = arith.constant dense<0.000000e+00> : vector<8x8xf32>
    %395 = tpu.matmul %394, %379, %cst_157 {dimension_numbers = #tpu.dot_dimension_numbers<[1], [0], [0], [1], [0, 0, 1, 1], [], []>} : vector<8x8xf32>, vector<8x8xf32>, vector<8x8xf32> -> vector<8x8xf32>
    %396 = vector.extract_strided_slice %307 {offsets = [24, 0], sizes = [8, 32], strides = [1, 1]} : vector<32x32xf32> to vector<8x32xf32>
    %cst_158 = arith.constant dense<0.000000e+00> : vector<8x32xf32>
    %397 = tpu.matmul %395, %396, %cst_158 {dimension_numbers = #tpu.dot_dimension_numbers<[1], [0], [0], [1], [0, 0, 1, 1], [], []>} : vector<8x8xf32>, vector<8x32xf32>, vector<8x32xf32> -> vector<8x32xf32>
    %398 = arith.addf %376, %397 : vector<8x32xf32>
    %c0_159 = arith.constant 0 : index
    %c0_160 = arith.constant 0 : index
    %399 = vector.load %arg19[%c0_159, %c0_160] : memref<16x32xf32, #tpu.memory_space<vmem>>, vector<8x32xf32>
    tpu.vector_store %arg19[%c0_159, %c0_160], %398 {strides = array<i32>} : memref<16x32xf32, #tpu.memory_space<vmem>>, vector<8x32xf32>,
    %c1_161 = arith.constant 1 : index
    %c0_162 = arith.constant 0 : index
    %c0_163 = arith.constant 0 : index
    %400 = vector.load %arg1[%c1_161, %c0_162, %c0_163] : memref<2x1x8xf32, #tpu.memory_space<vmem>>, vector<1x1x8xf32>
    %401 = vector.shape_cast %400 : vector<1x1x8xf32> to vector<1x8xf32>
    %cst_164 = arith.constant 0.000000e+00 : f32
    %402 = vector.broadcast %cst_164 : f32 to vector<8x32xf32>
    %403 = vector.extract_strided_slice %303 {offsets = [8, 0], sizes = [8, 8], strides = [1, 1]} : vector<16x32xf32> to vector<8x8xf32>
    %404 = vector.extract_strided_slice %304 {offsets = [8, 0], sizes = [8, 8], strides = [1, 1]} : vector<16x32xf32> to vector<8x8xf32>
    %405 = vector.extract_strided_slice %305 {offsets = [8, 0], sizes = [8, 8], strides = [1, 1]} : vector<16x32xf32> to vector<8x8xf32>
    %cst_165 = arith.constant dense<0.000000e+00> : vector<8x8xf32>
    %406 = tpu.matmul %403, %404, %cst_165 {dimension_numbers = #tpu.dot_dimension_numbers<[1], [1], [0], [0], [0, 0, 1, 0], [], []>} : vector<8x8xf32>, vector<8x8xf32>, vector<8x8xf32> -> vector<8x8xf32>
    %cst_166 = arith.constant 0.353553385 : f32
    %407 = vector.broadcast %cst_166 : f32 to vector<8x8xf32>
    %408 = arith.mulf %406, %407 : vector<8x8xf32>
    %409 = vector.broadcast %401 : vector<1x8xf32> to vector<8x8xf32>
    %410 = arith.addf %408, %409 : vector<8x8xf32>
    %cst_167 = arith.constant dense<0xFF800000> : vector<8xf32>
    %411 = vector.multi_reduction <maximumf>, %410, %cst_167 [1] : vector<8x8xf32> to vector<8xf32>
    %412 = vector.shape_cast %411 : vector<8xf32> to vector<8x1xf32>
    %413 = vector.broadcast %412 : vector<8x1xf32> to vector<8x8xf32>
    %414 = arith.subf %410, %413 : vector<8x8xf32>
    %415 = math.exp %414 : vector<8x8xf32>
    %cst_168 = arith.constant dense<0.000000e+00> : vector<8xf32>
    %416 = vector.multi_reduction <add>, %415, %cst_168 [1] : vector<8x8xf32> to vector<8xf32>
    %417 = vector.shape_cast %416 : vector<8xf32> to vector<8x1xf32>
    %418 = tpu.reciprocal %417 {approx = true} : vector<8x1xf32> -> vector<8x1xf32>
    %419 = vector.broadcast %418 : vector<8x1xf32> to vector<8x8xf32>
    %420 = arith.mulf %415, %419 : vector<8x8xf32>
    %cst_169 = arith.constant dense<0.000000e+00> : vector<8x8xf32>
    %421 = tpu.matmul %420, %405, %cst_169 {dimension_numbers = #tpu.dot_dimension_numbers<[1], [0], [0], [1], [0, 0, 1, 1], [], []>} : vector<8x8xf32>, vector<8x8xf32>, vector<8x8xf32> -> vector<8x8xf32>
    %422 = vector.extract_strided_slice %307 {offsets = [0, 0], sizes = [8, 32], strides = [1, 1]} : vector<32x32xf32> to vector<8x32xf32>
    %cst_170 = arith.constant dense<0.000000e+00> : vector<8x32xf32>
    %423 = tpu.matmul %421, %422, %cst_170 {dimension_numbers = #tpu.dot_dimension_numbers<[1], [0], [0], [1], [0, 0, 1, 1], [], []>} : vector<8x8xf32>, vector<8x32xf32>, vector<8x32xf32> -> vector<8x32xf32>
    %424 = arith.addf %402, %423 : vector<8x32xf32>
    %425 = vector.extract_strided_slice %303 {offsets = [8, 8], sizes = [8, 8], strides = [1, 1]} : vector<16x32xf32> to vector<8x8xf32>
    %426 = vector.extract_strided_slice %304 {offsets = [8, 8], sizes = [8, 8], strides = [1, 1]} : vector<16x32xf32> to vector<8x8xf32>
    %427 = vector.extract_strided_slice %305 {offsets = [8, 8], sizes = [8, 8], strides = [1, 1]} : vector<16x32xf32> to vector<8x8xf32>
    %cst_171 = arith.constant dense<0.000000e+00> : vector<8x8xf32>
    %428 = tpu.matmul %425, %426, %cst_171 {dimension_numbers = #tpu.dot_dimension_numbers<[1], [1], [0], [0], [0, 0, 1, 0], [], []>} : vector<8x8xf32>, vector<8x8xf32>, vector<8x8xf32> -> vector<8x8xf32>
    %cst_172 = arith.constant 0.353553385 : f32
    %429 = vector.broadcast %cst_172 : f32 to vector<8x8xf32>
    %430 = arith.mulf %428, %429 : vector<8x8xf32>
    %431 = vector.broadcast %401 : vector<1x8xf32> to vector<8x8xf32>
    %432 = arith.addf %430, %431 : vector<8x8xf32>
    %cst_173 = arith.constant dense<0xFF800000> : vector<8xf32>
    %433 = vector.multi_reduction <maximumf>, %432, %cst_173 [1] : vector<8x8xf32> to vector<8xf32>
    %434 = vector.shape_cast %433 : vector<8xf32> to vector<8x1xf32>
    %435 = vector.broadcast %434 : vector<8x1xf32> to vector<8x8xf32>
    %436 = arith.subf %432, %435 : vector<8x8xf32>
    %437 = math.exp %436 : vector<8x8xf32>
    %cst_174 = arith.constant dense<0.000000e+00> : vector<8xf32>
    %438 = vector.multi_reduction <add>, %437, %cst_174 [1] : vector<8x8xf32> to vector<8xf32>
    %439 = vector.shape_cast %438 : vector<8xf32> to vector<8x1xf32>
    %440 = tpu.reciprocal %439 {approx = true} : vector<8x1xf32> -> vector<8x1xf32>
    %441 = vector.broadcast %440 : vector<8x1xf32> to vector<8x8xf32>
    %442 = arith.mulf %437, %441 : vector<8x8xf32>
    %cst_175 = arith.constant dense<0.000000e+00> : vector<8x8xf32>
    %443 = tpu.matmul %442, %427, %cst_175 {dimension_numbers = #tpu.dot_dimension_numbers<[1], [0], [0], [1], [0, 0, 1, 1], [], []>} : vector<8x8xf32>, vector<8x8xf32>, vector<8x8xf32> -> vector<8x8xf32>
    %444 = vector.extract_strided_slice %307 {offsets = [8, 0], sizes = [8, 32], strides = [1, 1]} : vector<32x32xf32> to vector<8x32xf32>
    %cst_176 = arith.constant dense<0.000000e+00> : vector<8x32xf32>
    %445 = tpu.matmul %443, %444, %cst_176 {dimension_numbers = #tpu.dot_dimension_numbers<[1], [0], [0], [1], [0, 0, 1, 1], [], []>} : vector<8x8xf32>, vector<8x32xf32>, vector<8x32xf32> -> vector<8x32xf32>
    %446 = arith.addf %424, %445 : vector<8x32xf32>
    %447 = vector.extract_strided_slice %303 {offsets = [8, 16], sizes = [8, 8], strides = [1, 1]} : vector<16x32xf32> to vector<8x8xf32>
    %448 = vector.extract_strided_slice %304 {offsets = [8, 16], sizes = [8, 8], strides = [1, 1]} : vector<16x32xf32> to vector<8x8xf32>
    %449 = vector.extract_strided_slice %305 {offsets = [8, 16], sizes = [8, 8], strides = [1, 1]} : vector<16x32xf32> to vector<8x8xf32>
    %cst_177 = arith.constant dense<0.000000e+00> : vector<8x8xf32>
    %450 = tpu.matmul %447, %448, %cst_177 {dimension_numbers = #tpu.dot_dimension_numbers<[1], [1], [0], [0], [0, 0, 1, 0], [], []>} : vector<8x8xf32>, vector<8x8xf32>, vector<8x8xf32> -> vector<8x8xf32>
    %cst_178 = arith.constant 0.353553385 : f32
    %451 = vector.broadcast %cst_178 : f32 to vector<8x8xf32>
    %452 = arith.mulf %450, %451 : vector<8x8xf32>
    %453 = vector.broadcast %401 : vector<1x8xf32> to vector<8x8xf32>
    %454 = arith.addf %452, %453 : vector<8x8xf32>
    %cst_179 = arith.constant dense<0xFF800000> : vector<8xf32>
    %455 = vector.multi_reduction <maximumf>, %454, %cst_179 [1] : vector<8x8xf32> to vector<8xf32>
    %456 = vector.shape_cast %455 : vector<8xf32> to vector<8x1xf32>
    %457 = vector.broadcast %456 : vector<8x1xf32> to vector<8x8xf32>
    %458 = arith.subf %454, %457 : vector<8x8xf32>
    %459 = math.exp %458 : vector<8x8xf32>
    %cst_180 = arith.constant dense<0.000000e+00> : vector<8xf32>
    %460 = vector.multi_reduction <add>, %459, %cst_180 [1] : vector<8x8xf32> to vector<8xf32>
    %461 = vector.shape_cast %460 : vector<8xf32> to vector<8x1xf32>
    %462 = tpu.reciprocal %461 {approx = true} : vector<8x1xf32> -> vector<8x1xf32>
    %463 = vector.broadcast %462 : vector<8x1xf32> to vector<8x8xf32>
    %464 = arith.mulf %459, %463 : vector<8x8xf32>
    %cst_181 = arith.constant dense<0.000000e+00> : vector<8x8xf32>
    %465 = tpu.matmul %464, %449, %cst_181 {dimension_numbers = #tpu.dot_dimension_numbers<[1], [0], [0], [1], [0, 0, 1, 1], [], []>} : vector<8x8xf32>, vector<8x8xf32>, vector<8x8xf32> -> vector<8x8xf32>
    %466 = vector.extract_strided_slice %307 {offsets = [16, 0], sizes = [8, 32], strides = [1, 1]} : vector<32x32xf32> to vector<8x32xf32>
    %cst_182 = arith.constant dense<0.000000e+00> : vector<8x32xf32>
    %467 = tpu.matmul %465, %466, %cst_182 {dimension_numbers = #tpu.dot_dimension_numbers<[1], [0], [0], [1], [0, 0, 1, 1], [], []>} : vector<8x8xf32>, vector<8x32xf32>, vector<8x32xf32> -> vector<8x32xf32>
    %468 = arith.addf %446, %467 : vector<8x32xf32>
    %469 = vector.extract_strided_slice %303 {offsets = [8, 24], sizes = [8, 8], strides = [1, 1]} : vector<16x32xf32> to vector<8x8xf32>
    %470 = vector.extract_strided_slice %304 {offsets = [8, 24], sizes = [8, 8], strides = [1, 1]} : vector<16x32xf32> to vector<8x8xf32>
    %471 = vector.extract_strided_slice %305 {offsets = [8, 24], sizes = [8, 8], strides = [1, 1]} : vector<16x32xf32> to vector<8x8xf32>
    %cst_183 = arith.constant dense<0.000000e+00> : vector<8x8xf32>
    %472 = tpu.matmul %469, %470, %cst_183 {dimension_numbers = #tpu.dot_dimension_numbers<[1], [1], [0], [0], [0, 0, 1, 0], [], []>} : vector<8x8xf32>, vector<8x8xf32>, vector<8x8xf32> -> vector<8x8xf32>
    %cst_184 = arith.constant 0.353553385 : f32
    %473 = vector.broadcast %cst_184 : f32 to vector<8x8xf32>
    %474 = arith.mulf %472, %473 : vector<8x8xf32>
    %475 = vector.broadcast %401 : vector<1x8xf32> to vector<8x8xf32>
    %476 = arith.addf %474, %475 : vector<8x8xf32>
    %cst_185 = arith.constant dense<0xFF800000> : vector<8xf32>
    %477 = vector.multi_reduction <maximumf>, %476, %cst_185 [1] : vector<8x8xf32> to vector<8xf32>
    %478 = vector.shape_cast %477 : vector<8xf32> to vector<8x1xf32>
    %479 = vector.broadcast %478 : vector<8x1xf32> to vector<8x8xf32>
    %480 = arith.subf %476, %479 : vector<8x8xf32>
    %481 = math.exp %480 : vector<8x8xf32>
    %cst_186 = arith.constant dense<0.000000e+00> : vector<8xf32>
    %482 = vector.multi_reduction <add>, %481, %cst_186 [1] : vector<8x8xf32> to vector<8xf32>
    %483 = vector.shape_cast %482 : vector<8xf32> to vector<8x1xf32>
    %484 = tpu.reciprocal %483 {approx = true} : vector<8x1xf32> -> vector<8x1xf32>
    %485 = vector.broadcast %484 : vector<8x1xf32> to vector<8x8xf32>
    %486 = arith.mulf %481, %485 : vector<8x8xf32>
    %cst_187 = arith.constant dense<0.000000e+00> : vector<8x8xf32>
    %487 = tpu.matmul %486, %471, %cst_187 {dimension_numbers = #tpu.dot_dimension_numbers<[1], [0], [0], [1], [0, 0, 1, 1], [], []>} : vector<8x8xf32>, vector<8x8xf32>, vector<8x8xf32> -> vector<8x8xf32>
    %488 = vector.extract_strided_slice %307 {offsets = [24, 0], sizes = [8, 32], strides = [1, 1]} : vector<32x32xf32> to vector<8x32xf32>
    %cst_188 = arith.constant dense<0.000000e+00> : vector<8x32xf32>
    %489 = tpu.matmul %487, %488, %cst_188 {dimension_numbers = #tpu.dot_dimension_numbers<[1], [0], [0], [1], [0, 0, 1, 1], [], []>} : vector<8x8xf32>, vector<8x32xf32>, vector<8x32xf32> -> vector<8x32xf32>
    %490 = arith.addf %468, %489 : vector<8x32xf32>
    %c8_189 = arith.constant 8 : index
    %c0_190 = arith.constant 0 : index
    %491 = vector.load %arg19[%c8_189, %c0_190] : memref<16x32xf32, #tpu.memory_space<vmem>>, vector<8x32xf32>
    tpu.vector_store %arg19[%c8_189, %c0_190], %490 {strides = array<i32>} : memref<16x32xf32, #tpu.memory_space<vmem>>, vector<8x32xf32>,
    %c0_191 = arith.constant 0 : index
    %c0_192 = arith.constant 0 : index
    %492 = vector.load %arg19[%c0_191, %c0_192] : memref<16x32xf32, #tpu.memory_space<vmem>>, vector<16x32xf32>
    %c1_193 = arith.constant 1 : index
    %c0_194 = arith.constant 0 : index
    %c0_195 = arith.constant 0 : index
    %493 = vector.load %arg7[%c1_193, %c0_194, %c0_195] : memref<2x1x32xf32, #tpu.memory_space<vmem>>, vector<1x1x32xf32>
    %494 = vector.shape_cast %493 : vector<1x1x32xf32> to vector<1x32xf32>
    %495 = vector.broadcast %494 : vector<1x32xf32> to vector<16x32xf32>
    %496 = arith.addf %492, %495 : vector<16x32xf32>
    %497 = arith.addf %496, %295 : vector<16x32xf32>
    %c1_196 = arith.constant 1 : index
    %c0_197 = arith.constant 0 : index
    %c0_198 = arith.constant 0 : index
    %498 = vector.load %arg8[%c1_196, %c0_197, %c0_198] : memref<2x1x32xf32, #tpu.memory_space<vmem>>, vector<1x1x32xf32>
    %499 = vector.shape_cast %498 : vector<1x1x32xf32> to vector<1x32xf32>
    %c1_199 = arith.constant 1 : index
    %c0_200 = arith.constant 0 : index
    %c0_201 = arith.constant 0 : index
    %500 = vector.load %arg9[%c1_199, %c0_200, %c0_201] : memref<2x1x32xf32, #tpu.memory_space<vmem>>, vector<1x1x32xf32>
    %501 = vector.shape_cast %500 : vector<1x1x32xf32> to vector<1x32xf32>
    %cst_202 = arith.constant dense<0.000000e+00> : vector<16xf32>
    %502 = vector.multi_reduction <add>, %497, %cst_202 [1] : vector<16x32xf32> to vector<16xf32>
    %503 = vector.shape_cast %502 : vector<16xf32> to vector<16x1xf32>
    %cst_203 = arith.constant 3.200000e+01 : f32
    %504 = vector.broadcast %cst_203 : f32 to vector<16x1xf32>
    %505 = arith.divf %503, %504 : vector<16x1xf32>
    %506 = vector.broadcast %505 : vector<16x1xf32> to vector<16x32xf32>
    %507 = arith.subf %497, %506 : vector<16x32xf32>
    %508 = arith.mulf %507, %507 : vector<16x32xf32>
    %cst_204 = arith.constant dense<0.000000e+00> : vector<16xf32>
    %509 = vector.multi_reduction <add>, %508, %cst_204 [1] : vector<16x32xf32> to vector<16xf32>
    %510 = vector.shape_cast %509 : vector<16xf32> to vector<16x1xf32>
    %cst_205 = arith.constant 3.200000e+01 : f32
    %511 = vector.broadcast %cst_205 : f32 to vector<16x1xf32>
    %512 = arith.divf %510, %511 : vector<16x1xf32>
    %cst_206 = arith.constant 9.99999996E-13 : f32
    %513 = vector.broadcast %cst_206 : f32 to vector<16x1xf32>
    %514 = arith.addf %512, %513 : vector<16x1xf32>
    %515 = math.rsqrt %514 : vector<16x1xf32>
    %516 = vector.broadcast %515 : vector<16x1xf32> to vector<16x32xf32>
    %517 = arith.mulf %507, %516 : vector<16x32xf32>
    %518 = vector.broadcast %499 : vector<1x32xf32> to vector<16x32xf32>
    %519 = arith.mulf %517, %518 : vector<16x32xf32>
    %520 = vector.broadcast %501 : vector<1x32xf32> to vector<16x32xf32>
    %521 = arith.addf %519, %520 : vector<16x32xf32>
    %c1_207 = arith.constant 1 : index
    %c0_208 = arith.constant 0 : index
    %c0_209 = arith.constant 0 : index
    %522 = vector.load %arg10[%c1_207, %c0_208, %c0_209] : memref<2x32x64xf32, #tpu.memory_space<vmem>>, vector<1x32x64xf32>
    %523 = vector.shape_cast %522 : vector<1x32x64xf32> to vector<32x64xf32>
    %cst_210 = arith.constant dense<0.000000e+00> : vector<16x64xf32>
    %524 = tpu.matmul %521, %523, %cst_210 {dimension_numbers = #tpu.dot_dimension_numbers<[1], [0], [0], [1], [0, 0, 1, 1], [], []>} : vector<16x32xf32>, vector<32x64xf32>, vector<16x64xf32> -> vector<16x64xf32>
    %c1_211 = arith.constant 1 : index
    %c0_212 = arith.constant 0 : index
    %c0_213 = arith.constant 0 : index
    %525 = vector.load %arg11[%c1_211, %c0_212, %c0_213] : memref<2x1x64xf32, #tpu.memory_space<vmem>>, vector<1x1x64xf32>
    %526 = vector.shape_cast %525 : vector<1x1x64xf32> to vector<1x64xf32>
    %527 = vector.broadcast %526 : vector<1x64xf32> to vector<16x64xf32>
    %528 = arith.addf %524, %527 : vector<16x64xf32>
    %cst_214 = arith.constant 5.000000e-01 : f32
    %529 = vector.broadcast %cst_214 : f32 to vector<16x64xf32>
    %530 = arith.mulf %529, %528 : vector<16x64xf32>
    %cst_215 = arith.constant 0.707106769 : f32
    %531 = vector.broadcast %cst_215 : f32 to vector<16x64xf32>
    %532 = arith.mulf %528, %531 : vector<16x64xf32>
    %533 = math.erf %532 : vector<16x64xf32>
    %cst_216 = arith.constant 1.000000e+00 : f32
    %534 = vector.broadcast %cst_216 : f32 to vector<16x64xf32>
    %535 = arith.addf %534, %533 : vector<16x64xf32>
    %536 = arith.mulf %530, %535 : vector<16x64xf32>
    %c1_217 = arith.constant 1 : index
    %c0_218 = arith.constant 0 : index
    %c0_219 = arith.constant 0 : index
    %537 = vector.load %arg12[%c1_217, %c0_218, %c0_219] : memref<2x64x32xf32, #tpu.memory_space<vmem>>, vector<1x64x32xf32>
    %538 = vector.shape_cast %537 : vector<1x64x32xf32> to vector<64x32xf32>
    %cst_220 = arith.constant dense<0.000000e+00> : vector<16x32xf32>
    %539 = tpu.matmul %536, %538, %cst_220 {dimension_numbers = #tpu.dot_dimension_numbers<[1], [0], [0], [1], [0, 0, 1, 1], [], []>} : vector<16x64xf32>, vector<64x32xf32>, vector<16x32xf32> -> vector<16x32xf32>
    %c1_221 = arith.constant 1 : index
    %c0_222 = arith.constant 0 : index
    %c0_223 = arith.constant 0 : index
    %540 = vector.load %arg13[%c1_221, %c0_222, %c0_223] : memref<2x1x32xf32, #tpu.memory_space<vmem>>, vector<1x1x32xf32>
    %541 = vector.shape_cast %540 : vector<1x1x32xf32> to vector<1x32xf32>
    %542 = vector.broadcast %541 : vector<1x32xf32> to vector<16x32xf32>
    %543 = arith.addf %539, %542 : vector<16x32xf32>
    %544 = arith.addf %543, %521 : vector<16x32xf32>
    %c1_224 = arith.constant 1 : index
    %c0_225 = arith.constant 0 : index
    %c0_226 = arith.constant 0 : index
    %545 = vector.load %arg14[%c1_224, %c0_225, %c0_226] : memref<2x1x32xf32, #tpu.memory_space<vmem>>, vector<1x1x32xf32>
    %546 = vector.shape_cast %545 : vector<1x1x32xf32> to vector<1x32xf32>
    %c1_227 = arith.constant 1 : index
    %c0_228 = arith.constant 0 : index
    %c0_229 = arith.constant 0 : index
    %547 = vector.load %arg15[%c1_227, %c0_228, %c0_229] : memref<2x1x32xf32, #tpu.memory_space<vmem>>, vector<1x1x32xf32>
    %548 = vector.shape_cast %547 : vector<1x1x32xf32> to vector<1x32xf32>
    %cst_230 = arith.constant dense<0.000000e+00> : vector<16xf32>
    %549 = vector.multi_reduction <add>, %544, %cst_230 [1] : vector<16x32xf32> to vector<16xf32>
    %550 = vector.shape_cast %549 : vector<16xf32> to vector<16x1xf32>
    %cst_231 = arith.constant 3.200000e+01 : f32
    %551 = vector.broadcast %cst_231 : f32 to vector<16x1xf32>
    %552 = arith.divf %550, %551 : vector<16x1xf32>
    %553 = vector.broadcast %552 : vector<16x1xf32> to vector<16x32xf32>
    %554 = arith.subf %544, %553 : vector<16x32xf32>
    %555 = arith.mulf %554, %554 : vector<16x32xf32>
    %cst_232 = arith.constant dense<0.000000e+00> : vector<16xf32>
    %556 = vector.multi_reduction <add>, %555, %cst_232 [1] : vector<16x32xf32> to vector<16xf32>
    %557 = vector.shape_cast %556 : vector<16xf32> to vector<16x1xf32>
    %cst_233 = arith.constant 3.200000e+01 : f32
    %558 = vector.broadcast %cst_233 : f32 to vector<16x1xf32>
    %559 = arith.divf %557, %558 : vector<16x1xf32>
    %cst_234 = arith.constant 9.99999996E-13 : f32
    %560 = vector.broadcast %cst_234 : f32 to vector<16x1xf32>
    %561 = arith.addf %559, %560 : vector<16x1xf32>
    %562 = math.rsqrt %561 : vector<16x1xf32>
    %563 = vector.broadcast %562 : vector<16x1xf32> to vector<16x32xf32>
    %564 = arith.mulf %554, %563 : vector<16x32xf32>
    %565 = vector.broadcast %546 : vector<1x32xf32> to vector<16x32xf32>
    %566 = arith.mulf %564, %565 : vector<16x32xf32>
    %567 = vector.broadcast %548 : vector<1x32xf32> to vector<16x32xf32>
    %568 = arith.addf %566, %567 : vector<16x32xf32>
    %c0_235 = arith.constant 0 : index
    %c0_236 = arith.constant 0 : index
    %569 = vector.load %arg16[%c0_235, %c0_236] : memref<32x128xf32, #tpu.memory_space<vmem>>, vector<32x128xf32>
    %cst_237 = arith.constant dense<0.000000e+00> : vector<16x128xf32>
    %570 = tpu.matmul %568, %569, %cst_237 {dimension_numbers = #tpu.dot_dimension_numbers<[1], [0], [0], [1], [0, 0, 1, 1], [], []>} : vector<16x32xf32>, vector<32x128xf32>, vector<16x128xf32> -> vector<16x128xf32>
    %c0_238 = arith.constant 0 : index
    %c0_239 = arith.constant 0 : index
    %571 = vector.load %arg17[%c0_238, %c0_239] : memref<1x128xf32, #tpu.memory_space<vmem>>, vector<1x128xf32>
    %572 = vector.broadcast %571 : vector<1x128xf32> to vector<16x128xf32>
    %573 = arith.addf %570, %572 : vector<16x128xf32>
    %c0_240 = arith.constant 0 : index
    %c0_241 = arith.constant 0 : index
    %574 = vector.load %arg18[%c0_240, %c0_241] : memref<16x128xf32, #tpu.memory_space<vmem>>, vector<16x128xf32>
    tpu.vector_store %arg18[%c0_240, %c0_241], %573 {strides = array<i32>} : memref<16x128xf32, #tpu.memory_space<vmem>>, vector<16x128xf32>,
    return
  }
}

</mosaic_0001>

<bundles_post_ra>
// kernel: model_forward.1
= control target key start
LH: loop header
LB: loop body
LE: loop exit
PB: predicated region body
PF: predicated region fallthrough
CT: control target
= control target key end

     0   :  { %vm63_vm0 = vcmask 261120   ;;  %v2550_v2 = vmov 32.0   ;;  %s2551_s19 = smov 88   ;;  %s2553_s20 = smov 96   ;;  %vm170_vm5 = vcmask 64512   ;;  %s3299_s0 = inlined_call_operand.vmem [shape: f32[16,32], index: 0, kind: input, shape index: {}]   ;;  %s3300_s2 = inlined_call_operand.vmem [shape: f32[1,32], index: 2, kind: input, shape index: {}]   ;;  %s3301_s3 = inlined_call_operand.vmem [shape: f32[1,32], index: 3, kind: input, shape index: {}]   ;;  %s3302_s5 = inlined_call_operand.vmem [shape: f32[2,1,96], index: 5, kind: input, shape index: {}]   ;;  %s3303_s4 = inlined_call_operand.vmem [shape: f32[2,32,96], index: 4, kind: input, shape index: {}]   ;;  %s3304_s1 = inlined_call_operand.vmem [shape: f32[2,1,8], index: 1, kind: input, shape index: {}]   ;;  %s3305_s6 = inlined_call_operand.vmem [shape: f32[2,32,32], index: 6, kind: input, shape index: {}]   ;;  %s3306_s7 = inlined_call_operand.vmem [shape: f32[2,1,32], index: 7, kind: input, shape index: {}]   ;;  %s3307_s8 = inlined_call_operand.vmem [shape: f32[2,1,32], index: 8, kind: input, shape index: {}]   ;;  %s3308_s9 = inlined_call_operand.vmem [shape: f32[2,1,32], index: 9, kind: input, shape index: {}]   ;;  %s3309_s11 = inlined_call_operand.vmem [shape: f32[2,1,64], index: 11, kind: input, shape index: {}]   ;;  %s3310_s10 = inlined_call_operand.vmem [shape: f32[2,32,64], index: 10, kind: input, shape index: {}]   ;;  %s3311_s12 = inlined_call_operand.vmem [shape: f32[2,64,32], index: 12, kind: input, shape index: {}]   ;;  %s3312_s13 = inlined_call_operand.vmem [shape: f32[2,1,32], index: 13, kind: input, shape index: {}]   ;;  %s3313_s14 = inlined_call_operand.vmem [shape: f32[2,1,32], index: 14, kind: input, shape index: {}]   ;;  %s3314_s15 = inlined_call_operand.vmem [shape: f32[2,1,32], index: 15, kind: input, shape index: {}]   ;;  %s3315_s17 = inlined_call_operand.vmem [shape: f32[1,128], index: 17, kind: input, shape index: {}]   ;;  %s3316_s16 = inlined_call_operand.vmem [shape: f32[32,128], index: 16, kind: input, shape index: {}]   ;;  %s3317_s18 = inlined_call_operand.vmem [shape: f32[16,128], index: 18, kind: output, shape index: {}]  }
   0x1   :  { %3327 = sst [smem:[#allocation3_spill]] %s3299_s0  ;;  %2456 = vrcp.f32 %v2550_v2  ;;  %v128_v14 = vld [vmem:[%s3303_s4 + $0x18] sm:$0xff]  ;;  %v127_v15 = vld [vmem:[%s3303_s4 + $0x10] sm:$0xff]  ;;  %v126_v16 = vld [vmem:[%s3303_s4 + $0x8] sm:$0xff]  ;;  %s2555_s23 = smov 80  }
   0x2   :  { %3328 = sst [smem:[#allocation4_spill]] %s3300_s2  ;;  %151 = vmatpush.msra.mxu0 %v128_v14  ;;  %v125_v17 = vld [vmem:[%s3303_s4] sm:$0xff]  ;;  %s3323_s2 = smov 64   ;;  %v2747_v61 = vld [vmem:[%s3305_s6 + $0x8] sm:$0xff] }
   0x3   :  { %3329 = sst [smem:[#allocation5_spill]] %s3301_s3  ;;  %v2697_v33 = vld [vmem:[%s3302_s5] ss:$0 sm:$0xff]  ;;  %s3325_s3 = smov 56  }
   0x4   :  { %s3330_s29 = sld [smem:[#allocation3_spill]]  ;;  %152 = vmatpush.msra.mxu0 %v127_v15  ;;  %v2715_v39 = vld [vmem:[%s3304_s1] ss:$0 sm:$0xff]  ;;  %s2556_s24 = smov 120  }
   0x5   :  { %s3331_s25 = sld [smem:[#allocation4_spill]]  ;;  %v2732_v55 = vld [vmem:[%s3305_s6] sm:$0xff]  ;;  %s2557_s27 = smov 112  }
   0x6   :  { %153 = vmatpush.msra.mxu0 %v126_v16  ;;  %s3332_s28 = sld [smem:[#allocation5_spill]]  ;;  %345 = vmatpush.msra.mxu3 %v2732_v55  ;;  %s2559_s30 = smov 104  }
   0x7   :  { %v2457_v3 = vpop.eup %2456  ;;  %s3321_s26 = smov 72   ;;  %s3333_s22 = smov 56  }
   0x8   :  { %v71_v4 = vmul.f32 32.0, %v2457_v3  ;;  %vm75_vm1 = vweird.f32 %v2457_v3  ;;  %154 = vmatpush.msra.mxu0 %v125_v17 }
   0xa   :  { %v59_v0 = vld [vmem:[%s3330_s29] sm:$0xff]  ;;  %v72_v5 = vsub.f32 1.0, %v71_v4 }
   0xb   :  { %v64_v1 = vsel %vm63_vm0, %v59_v0, 0.0  ;;  %v2681_v27 = vld [vmem:[%s3331_s25] ss:$0 sm:$0xff]  ;;  %s3334_s25 = smov 64  }
   0xc   :  { %65 = vadd.xlane.f32.xlu0 %v64_v1  ;;  %v73_v6 = vmul.f32 %v2457_v3, %v72_v5  ;;  %v2686_v30 = vld [vmem:[%s3332_s28] ss:$0 sm:$0xff]  ;;  %s2558_s28 = smov 48  }
   0xe   :  { %v74_v7 = vadd.f32 %v2457_v3, %v73_v6 }
  0x10   :  { %v2661_v8 = vsel %vm75_vm1, %v2457_v3, %v74_v7  ;;  %v60_v3 = vld [vmem:[%s3330_s29 + $0x8] sm:$0xff]  ;;  %s3319_s29 = smov 40   ;;  %vm1103_vm1 = vcmask 523264  }
  0x11   :  { %v67_v4 = vsel %vm63_vm0, %v60_v3, 0.0 }
  0x7f   :  { %v66_v9 = vpop.xlane.xlu0 %65 }
  0x80   :  { %v77_v10 = vmul.f32 %v2661_v8, %v66_v9 }
  0x82   :  { %v79_v11 = vsub.f32 %v59_v0, %v77_v10 }
  0x84   :  { %v81_v12 = vmul.f32 %v79_v11, %v79_v11 }
  0x86   :  { %v83_v13 = vsel %vm63_vm0, %v81_v12, 0.0 }
  0x87   :  { %84 = vadd.xlane.f32.xlu0 %v83_v13 }
  0xfa   :  { %v85_v18 = vpop.xlane.xlu0 %84 }
  0xfb   :  { %v89_v19 = vmul.f32 %v85_v18, %v2661_v8 }
  0xfd   :  { %v91_v20 = vadd.f32 1e-12, %v89_v19 }
  0xff   :  { %2458 = vrsqrt.f32 %v91_v20  ;;  %vm99_vm3 = vweird.f32 %v91_v20 }
 0x105   :  { %v2459_v21 = vpop.eup %2458 }
 0x106   :  { %v94_v22 = vmul.f32 %v2459_v21, %v91_v20  ;;  %vm100_vm2 = vweird.f32 %v2459_v21 }
 0x107   :  { %vm101_vm4 = vmor %vm99_vm3, %vm100_vm2 }
 0x108   :  { %v95_v23 = vmul.f32 %v2459_v21, %v94_v22 }
 0x10a   :  { %v96_v24 = vmul.f32 0.5, %v95_v23 }
 0x10c   :  { %v97_v25 = vsub.f32 1.5, %v96_v24 }
 0x10e   :  { %v98_v26 = vmul.f32 %v2459_v21, %v97_v25 }
 0x110   :  { %v102_v28 = vsel %vm101_vm4, %v2459_v21, %v98_v26 }
 0x111   :  { %v113_v29 = vmul.f32 %v102_v28, %v79_v11 }
 0x113   :  { %v118_v31 = vmul.f32 %v2681_v27, %v113_v29 }
 0x115   :  { %v2690_v32 = vadd.f32 %v2686_v30, %v118_v31 }
 0x117   :  { %2309 = vmatmul.msk.f32.vlgmr.msra.gmra.mxu0 %vm63_vm0, %v2690_v32 }
 0x194   :  { %v156_v34 = vpop.f32.mrf.mxu0 }
 0x195   :  { %v2700_v35 = vadd.f32 %v2697_v33, %v156_v34 }
 0x197   :  { %239 = vrot.lane.b32.xlu0 %v2700_v35, %s2551_s19  ;;  %211 = vrot.lane.b32.xlu2 %v2700_v35, %s3323_s2 }
 0x198   :  { %168 = vrot.lane.b32.xlu1 %v2700_v35, %s2553_s20 }
 0x1f1   :  { %v212_v36 = vpop.permute.xlu2 %211 }
 0x1f2   :  { %232 = vmatpush.msra.mxu2 %v212_v36 }
 0x209   :  { %v240_v37 = vpop.permute.xlu0 %239 }
 0x20a   :  { %v169_v38 = vpop.permute.xlu1 %168  ;;  %2314 = vmatpush.xpose.msk.msrb.mxu2 %vm170_vm5, %v240_v37 }
 0x20b   :  { %2311 = vmatpush.xpose.msk.msra.mxu1 %vm170_vm5, %v169_v38 }
 0x20e   :  { %2312 = vmatmul.msk.f32.vlgmr.msra.gmra.mxu1 %vm170_vm5, %v2700_v35 }
 0x20f   :  { %322 = vmatpush.msrb.mxu1 %v2747_v61 }
 0x28b   :  { %v192_v40 = vpop.f32.mrf.mxu1 }
 0x28c   :  { %v195_v41 = vmul.f32 0.35355338, %v192_v40 }
 0x28e   :  { %v199_v42 = vadd.f32 %v2715_v39, %v195_v41 }
 0x290   :  { %v200_v43 = vsel %vm170_vm5, %v199_v42, -inf }
 0x291   :  { %201 = vmax.xlane.f32.xlu1 %v200_v43 }
 0x2aa   :  { %278 = vrot.lane.b32.xlu1 %v2700_v35, %s3325_s3 }
 0x2b2   :  { %352 = vrot.lane.b32.xlu1 %v2700_v35, %s2555_s23 }
 0x304   :  { %v202_v44 = vpop.xlane.xlu1 %201 }
 0x305   :  { %v203_v45 = vsub.f32 %v199_v42, %v202_v44 }
 0x307   :  { %v204_v46 = vmul.f32 1.442695, %v203_v45 }
 0x309   :  { %2460 = vpow2.f32 %v204_v46 }
 0x30f   :  { %v2461_v47 = vpop.eup %2460 }
 0x310   :  { %v206_v48 = vsel %vm170_vm5, %v2461_v47, 0.0 }
 0x311   :  { %207 = vadd.xlane.f32.xlu2 %v206_v48 }
 0x31c   :  { %v279_v51 = vpop.permute.xlu1 %278 }
 0x324   :  { %v353_v54 = vpop.permute.xlu1 %352 }
 0x329   :  { %237 = vrot.lane.b32.xlu2 %v2700_v35, %s2556_s24 }
 0x384   :  { %v208_v49 = vpop.xlane.xlu2 %207 }
 0x385   :  { %2462 = vrcp.f32 %v208_v49 }
 0x38b   :  { %v2463_v50 = vpop.eup %2462 }
 0x38c   :  { %v210_v52 = vmul.f32 %v2463_v50, %v2461_v47  ;;  %v238_v53 = vpop.permute.xlu2 %237 }
 0x38e   :  { %2313 = vmatmul.msk.f32.vlgmr.msra.gmra.mxu2 %vm170_vm5, %v210_v52 }
 0x38f   :  { %299 = vmatpush.msra.mxu2 %v279_v51 }
 0x396   :  { %2315 = vmatmul.msk.f32.vlgmr.msrb.gmra.mxu2 %vm170_vm5, %v238_v53 }
 0x397   :  { %2319 = vmatpush.xpose.msk.msrb.mxu2 %vm170_vm5, %v353_v54 }
 0x411   :  { %v234_v56 = vpop.f32.mrf.mxu2 }
 0x412   :  { %2318 = vmatmul.msk.f32.vlgmr.msra.gmra.mxu3 %vm170_vm5, %v234_v56 }
 0x419   :  { %v262_v57 = vpop.f32.mrf.mxu2 }
 0x41a   :  { %v265_v58 = vmul.f32 0.35355338, %v262_v57 }
 0x41c   :  { %v266_v59 = vadd.f32 %v2715_v39, %v265_v58 }
 0x41e   :  { %v267_v60 = vsel %vm170_vm5, %v266_v59, -inf }
 0x41f   :  { %268 = vmax.xlane.f32.xlu0 %v267_v60 }
 0x433   :  { %350 = vrot.lane.b32.xlu0 %v2700_v35, %s2557_s27 }
 0x43b   :  { %391 = vrot.lane.b32.xlu0 %v2700_v35, %s2558_s28 }
 0x443   :  { %441 = vrot.lane.b32.xlu0 %v2700_v35, %s2559_s30 }
 0x492   :  { %v269_v62 = vpop.xlane.xlu0 %268 }
 0x493   :  { %v270_v63 = vsub.f32 %v266_v59, %v269_v62 }
 0x495   :  { %v271_v0 = vmul.f32 1.442695, %v270_v63  ;;  %v2802_v58 = vpop.f32.mrf.mxu3 }
 0x497   :  { %2464 = vpow2.f32 %v271_v0  ;;  %v2808_v0 = vld [vmem:[%s3304_s1 + $0x1] ss:$0 sm:$0xff] }
 0x49d   :  { %v2465_v1 = vpop.eup %2464 }
 0x49e   :  { %v273_v2 = vsel %vm170_vm5, %v2465_v1, 0.0 }
 0x49f   :  { %274 = vadd.xlane.f32.xlu2 %v273_v2 }
 0x4a5   :  { %v351_v5 = vpop.permute.xlu0 %350 }
 0x4a7   :  { %68 = vadd.xlane.f32.xlu2 %v67_v4 }
 0x4ad   :  { %v392_v6 = vpop.permute.xlu0 %391 }
 0x4ae   :  { %412 = vmatpush.msra.mxu1 %v392_v6 }
 0x512   :  { %v275_v7 = vpop.xlane.xlu2 %274 }
 0x513   :  { %2466 = vrcp.f32 %v275_v7 }
 0x519   :  { %v2467_v9 = vpop.eup %2466 }
 0x51a   :  { %v277_v10 = vmul.f32 %v2467_v9, %v2465_v1  ;;  %v69_v11 = vpop.xlane.xlu2 %68 }
 0x51b   :  { %v78_v12 = vmul.f32 %v2661_v8, %v69_v11 }
 0x51c   :  { %2316 = vmatmul.msk.f32.vlgmr.msra.gmra.mxu2 %vm170_vm5, %v277_v10 }
 0x51d   :  { %v80_v13 = vsub.f32 %v60_v3, %v78_v12 }
 0x51f   :  { %v82_v14 = vmul.f32 %v80_v13, %v80_v13 }
 0x521   :  { %v86_v15 = vsel %vm63_vm0, %v82_v14, 0.0 }
 0x522   :  { %87 = vadd.xlane.f32.xlu1 %v86_v15 }
 0x524   :  { %2320 = vmatmul.msk.f32.vlgmr.msrb.gmra.mxu2 %vm170_vm5, %v351_v5 }
 0x53b   :  { %482 = vrot.lane.b32.xlu1 %v2700_v35, %s3319_s29 }
 0x595   :  { %v88_v16 = vpop.xlane.xlu1 %87 }
 0x596   :  { %v90_v17 = vmul.f32 %v88_v16, %v2661_v8 }
 0x598   :  { %v92_v18 = vadd.f32 1e-12, %v90_v17 }
 0x59a   :  { %2468 = vrsqrt.f32 %v92_v18  ;;  %vm109_vm6 = vweird.f32 %v92_v18 }
 0x59f   :  { %v301_v19 = vpop.f32.mrf.mxu2 }
 0x5a0   :  { %v2469_v20 = vpop.eup %2468  ;;  %2317 = vmatmul.msk.f32.vlgmr.msrb.gmra.mxu1 %vm170_vm5, %v301_v19 }
 0x5a1   :  { %v104_v21 = vmul.f32 %v2469_v20, %v92_v18  ;;  %vm110_vm7 = vweird.f32 %v2469_v20  ;;  %v2828_v18 = vld [vmem:[%s3305_s6 + $0x18] sm:$0xff] }
 0x5a2   :  { %vm111_vm8 = vmor %vm109_vm6, %vm110_vm7  ;;  %526 = vmatpush.msrb.mxu1 %v2828_v18 }
 0x5a3   :  { %v105_v22 = vmul.f32 %v2469_v20, %v104_v21 }
 0x5a5   :  { %v106_v23 = vmul.f32 0.5, %v105_v22 }
 0x5a7   :  { %v107_v24 = vsub.f32 1.5, %v106_v23  ;;  %v375_v25 = vpop.f32.mrf.mxu2 }
 0x5a8   :  { %v378_v26 = vmul.f32 0.35355338, %v375_v25 }
 0x5a9   :  { %v108_v28 = vmul.f32 %v2469_v20, %v107_v24 }
 0x5aa   :  { %v379_v29 = vadd.f32 %v2715_v39, %v378_v26 }
 0x5ab   :  { %v112_v31 = vsel %vm111_vm8, %v2469_v20, %v108_v28 }
 0x5ac   :  { %v380_v34 = vsel %vm170_vm5, %v379_v29, -inf  ;;  %v114_v36 = vmul.f32 %v112_v31, %v80_v13 }
 0x5ad   :  { %381 = vmax.xlane.f32.xlu2 %v380_v34  ;;  %v483_v37 = vpop.permute.xlu1 %482 }
 0x5ae   :  { %503 = vmatpush.msra.mxu2 %v483_v37  ;;  %v119_v38 = vmul.f32 %v2681_v27, %v114_v36  ;;  %v164_v27 = vld [vmem:[%s3305_s6 + $0x10] sm:$0xff] }
 0x5af   :  { %435 = vmatpush.msrb.mxu3 %v164_v27 }
 0x5b0   :  { %v2767_v40 = vadd.f32 %v2686_v30, %v119_v38  ;;  %v442_v30 = vpop.permute.xlu0 %441 }
 0x5b2   :  { %2310 = vmatmul.msk.f32.gmra.mxu0 %vm63_vm0, %v2767_v40 }
 0x620   :  { %v382_v41 = vpop.xlane.xlu2 %381 }
 0x621   :  { %v383_v42 = vsub.f32 %v379_v29, %v382_v41 }
 0x623   :  { %v384_v43 = vmul.f32 1.442695, %v383_v42 }
 0x625   :  { %2470 = vpow2.f32 %v384_v43 }
 0x62b   :  { %v2471_v44 = vpop.eup %2470 }
 0x62c   :  { %v386_v45 = vsel %vm170_vm5, %v2471_v44, 0.0 }
 0x62d   :  { %387 = vadd.xlane.f32.xlu2 %v386_v45 }
 0x62f   :  { %v159_v46 = vpop.f32.mrf.mxu0 }
 0x630   :  { %v2773_v47 = vadd.f32 %v2697_v33, %v159_v46 }
 0x632   :  { %536 = vrot.lane.b32.xlu0 %v2773_v47, %s2553_s20 }
 0x645   :  { %443 = vrot.lane.b32.xlu2 %v2700_v35, %s3321_s26  ;;  %v2786_v35 = vpop.f32.mrf.mxu1 }
 0x646   :  { %v348_v37 = vadd.f32 %v2802_v58, %v2786_v35 }
 0x6a0   :  { %v388_v48 = vpop.xlane.xlu2 %387 }
 0x6a1   :  { %2472 = vrcp.f32 %v388_v48 }
 0x6a4   :  { %v537_v49 = vpop.permute.xlu0 %536 }
 0x6a5   :  { %2328 = vmatpush.xpose.msk.msra.mxu3 %vm170_vm5, %v537_v49 }
 0x6a7   :  { %v2473_v33 = vpop.eup %2472 }
 0x6a8   :  { %v390_v50 = vmul.f32 %v2473_v33, %v2471_v44  ;;  %v444_v51 = vpop.permute.xlu2 %443 }
 0x6a9   :  { %2323 = vmatpush.xpose.msk.msrb.mxu0 %vm170_vm5, %v444_v51 }
 0x6aa   :  { %2321 = vmatmul.msk.f32.vlgmr.msra.gmra.mxu1 %vm170_vm5, %v390_v50 }
 0x6ac   :  { %2324 = vmatmul.msk.f32.vlgmr.msrb.gmra.mxu0 %vm170_vm5, %v442_v30 }
 0x727   :  { %v414_v52 = vpop.f32.mrf.mxu1 }
 0x728   :  { %2322 = vmatmul.msk.f32.vlgmr.msrb.gmra.mxu3 %vm170_vm5, %v414_v52 }
 0x729   :  { %v466_v53 = vpop.f32.mrf.mxu0  ;;  %689 = vmatpush.msrb.mxu3 %v2747_v61 }
 0x72a   :  { %v469_v54 = vmul.f32 0.35355338, %v466_v53 }
 0x72c   :  { %v470_v56 = vadd.f32 %v2715_v39, %v469_v54  ;;  %v2854_v54 = vld [vmem:[%s3306_s7] ss:$0 sm:$0xff] }
 0x72e   :  { %v471_v57 = vsel %vm170_vm5, %v470_v56, -inf }
 0x72f   :  { %472 = vmax.xlane.f32.xlu0 %v471_v57 }
 0x730   :  { %2329 = vmatmul.msk.f32.vlgmr.msra.gmra.mxu3 %vm170_vm5, %v2773_v47 }
 0x731   :  { %802 = vmatpush.msra.mxu3 %v164_v27 }
 0x743   :  { %604 = vrot.lane.b32.xlu0 %v2773_v47, %s2556_s24 }
 0x74b   :  { %717 = vrot.lane.b32.xlu0 %v2773_v47, %s2557_s27 }
 0x753   :  { %578 = vrot.lane.b32.xlu0 %v2773_v47, %s3323_s2 }
 0x75b   :  { %808 = vrot.lane.b32.xlu0 %v2773_v47, %s2559_s30 }
 0x7a2   :  { %v473_v39 = vpop.xlane.xlu0 %472 }
 0x7a3   :  { %v474_v59 = vsub.f32 %v470_v56, %v473_v39 }
 0x7a5   :  { %v475_v60 = vmul.f32 1.442695, %v474_v59 }
 0x7a7   :  { %2474 = vpow2.f32 %v475_v60 }
 0x7ab   :  { %v437_v61 = vpop.f32.mrf.mxu3 }
 0x7ac   :  { %v440_v38 = vadd.f32 %v437_v61, %v348_v37 }
 0x7ad   :  { %v2475_v62 = vpop.eup %2474 }
 0x7ae   :  { %v477_v63 = vsel %vm170_vm5, %v2475_v62, 0.0 }
 0x7af   :  { %478 = vadd.xlane.f32.xlu2 %v477_v63 }
 0x7b3   :  { %v559_v1 = vpop.f32.mrf.mxu3 }
 0x7b4   :  { %v562_v2 = vmul.f32 0.35355338, %v559_v1 }
 0x7b5   :  { %v605_v3 = vpop.permute.xlu0 %604 }
 0x7b6   :  { %v566_v4 = vadd.f32 %v2808_v0, %v562_v2 }
 0x7b8   :  { %v567_v5 = vsel %vm170_vm5, %v566_v4, -inf }
 0x7b9   :  { %568 = vmax.xlane.f32.xlu1 %v567_v5 }
 0x7bd   :  { %v718_v6 = vpop.permute.xlu0 %717 }
 0x7c5   :  { %v579_v7 = vpop.permute.xlu0 %578 }
 0x7c6   :  { %599 = vmatpush.msra.mxu0 %v579_v7 }
 0x7c7   :  { %719 = vrot.lane.b32.xlu2 %v2773_v47, %s2555_s23 }
 0x7c8   :  { %712 = vmatpush.msrb.mxu0 %v2732_v55 }
 0x7cd   :  { %v809_v44 = vpop.permute.xlu0 %808 }
 0x7cf   :  { %810 = vrot.lane.b32.xlu2 %v2773_v47, %s3321_s26 }
 0x7d2   :  { %606 = vrot.lane.b32.xlu1 %v2773_v47, %s2551_s19 }
 0x822   :  { %v479_v9 = vpop.xlane.xlu2 %478 }
 0x823   :  { %2476 = vrcp.f32 %v479_v9 }
 0x829   :  { %v2477_v10 = vpop.eup %2476 }
 0x82a   :  { %v481_v11 = vmul.f32 %v2477_v10, %v2475_v62  ;;  %v720_v17 = vpop.permute.xlu2 %719 }
 0x82c   :  { %2325 = vmatmul.msk.f32.vlgmr.msra.gmra.mxu2 %vm170_vm5, %v481_v11  ;;  %v569_v12 = vpop.xlane.xlu1 %568 }
 0x82d   :  { %v570_v13 = vsub.f32 %v566_v4, %v569_v12 }
 0x82f   :  { %v571_v14 = vmul.f32 1.442695, %v570_v13 }
 0x831   :  { %2478 = vpow2.f32 %v571_v14 }
 0x832   :  { %v811_v23 = vpop.permute.xlu2 %810 }
 0x837   :  { %v2479_v15 = vpop.eup %2478 }
 0x838   :  { %v573_v16 = vsel %vm170_vm5, %v2479_v15, 0.0 }
 0x839   :  { %574 = vadd.xlane.f32.xlu1 %v573_v16 }
 0x844   :  { %v607_v55 = vpop.permute.xlu1 %606 }
 0x845   :  { %2331 = vmatpush.xpose.msk.msrb.mxu2 %vm170_vm5, %v607_v55 }
 0x848   :  { %2332 = vmatmul.msk.f32.vlgmr.msrb.gmra.mxu2 %vm170_vm5, %v605_v3 }
 0x849   :  { %2336 = vmatpush.xpose.msk.msra.mxu2 %vm170_vm5, %v720_v17  ;;  %v969_v17 = vld [vmem:[%s3310_s10 + $0x18] sm:$0xff] }
 0x850   :  { %2337 = vmatmul.msk.f32.vlgmr.msra.gmra.mxu2 %vm170_vm5, %v718_v6 }
 0x8ac   :  { %v575_v19 = vpop.xlane.xlu1 %574 }
 0x8ad   :  { %2480 = vrcp.f32 %v575_v19  ;;  %v967_v19 = vld [vmem:[%s3310_s10 + $0x8] sm:$0xff] }
 0x8af   :  { %v505_v20 = vpop.f32.mrf.mxu2 }
 0x8b0   :  { %2326 = vmatmul.msk.f32.vlgmr.msrb.gmra.mxu1 %vm170_vm5, %v505_v20  ;;  %v966_v20 = vld [vmem:[%s3310_s10] sm:$0xff] }
 0x8b3   :  { %v2481_v21 = vpop.eup %2480 }
 0x8b4   :  { %v577_v22 = vmul.f32 %v2481_v21, %v2479_v15 }
 0x8b6   :  { %2330 = vmatmul.msk.f32.vlgmr.msra.gmra.mxu0 %vm170_vm5, %v577_v22 }
 0x8b7   :  { %2340 = vmatpush.xpose.msk.msra.mxu0 %vm170_vm5, %v811_v23 }
 0x8cb   :  { %v629_v24 = vpop.f32.mrf.mxu2 }
 0x8cc   :  { %v632_v25 = vmul.f32 0.35355338, %v629_v24 }
 0x8ce   :  { %v633_v26 = vadd.f32 %v2808_v0, %v632_v25 }
 0x8d0   :  { %v634_v28 = vsel %vm170_vm5, %v633_v26, -inf }
 0x8d1   :  { %635 = vmax.xlane.f32.xlu2 %v634_v28 }
 0x8d3   :  { %v742_v29 = vpop.f32.mrf.mxu2 }
 0x8d4   :  { %v745_v31 = vmul.f32 0.35355338, %v742_v29 }
 0x8d6   :  { %v746_v34 = vadd.f32 %v2808_v0, %v745_v31 }
 0x8d8   :  { %v747_v36 = vsel %vm170_vm5, %v746_v34, -inf }
 0x8d9   :  { %748 = vmax.xlane.f32.xlu0 %v747_v36 }
 0x8e9   :  { %758 = vrot.lane.b32.xlu2 %v2773_v47, %s2558_s28 }
 0x8f1   :  { %849 = vrot.lane.b32.xlu2 %v2773_v47, %s3319_s29 }
 0x92d   :  { %v528_v41 = vpop.f32.mrf.mxu1 }
 0x92e   :  { %v531_v42 = vadd.f32 %v528_v41, %v440_v38  ;;  %v2892_v38 = vld [vmem:[%s3308_s9] ss:$0 sm:$0xff] }
 0x930   :  { %532 = vst.msk [vmem:[#allocation2] sm:$0xff] %vm63_vm0, %v531_v42 }
 0x933   :  { %v601_v43 = vpop.f32.mrf.mxu0 }
 0x934   :  { %2335 = vmatmul.msk.f32.vlgmr.msrb.gmra.mxu0 %vm170_vm5, %v601_v43 }
 0x937   :  { %v900_v56 = vld [vmem:[#allocation2] sm:$0xff] }
 0x938   :  { %v906_v57 = vadd.f32 %v2854_v54, %v900_v56 }
 0x93a   :  { %v908_v39 = vadd.f32 %v906_v57, %v2690_v32 }
 0x93c   :  { %2341 = vmatmul.msk.f32.vlgmr.msra.gmra.mxu0 %vm170_vm5, %v809_v44  ;;  %v912_v58 = vsel %vm63_vm0, %v908_v39, 0.0 }
 0x944   :  { %v636_v45 = vpop.xlane.xlu2 %635 }
 0x945   :  { %v637_v46 = vsub.f32 %v633_v26, %v636_v45 }
 0x947   :  { %v638_v27 = vmul.f32 1.442695, %v637_v46 }
 0x949   :  { %2482 = vpow2.f32 %v638_v27 }
 0x94c   :  { %v749_v30 = vpop.xlane.xlu0 %748  ;;  %v759_v48 = vpop.permute.xlu2 %758 }
 0x94d   :  { %v750_v49 = vsub.f32 %v746_v34, %v749_v30  ;;  %v2887_v34 = vld [vmem:[%s3307_s8] ss:$0 sm:$0xff] }
 0x94f   :  { %v2483_v33 = vpop.eup %2482  ;;  %v751_v50 = vmul.f32 1.442695, %v750_v49  ;;  %v2907_v49 = vld [vmem:[%s3309_s11] ss:$0 sm:$0xff] }
 0x950   :  { %v640_v51 = vsel %vm170_vm5, %v2483_v33, 0.0 }
 0x951   :  { %2484 = vpow2.f32 %v751_v50  ;;  %641 = vadd.xlane.f32.xlu1 %v640_v51 }
 0x954   :  { %v850_v35 = vpop.permute.xlu2 %849 }
 0x955   :  { %870 = vmatpush.msrb.mxu2 %v850_v35 }
 0x957   :  { %v2485_v52 = vpop.eup %2484 }
 0x958   :  { %v753_v53 = vsel %vm170_vm5, %v2485_v52, 0.0 }
 0x959   :  { %754 = vadd.xlane.f32.xlu1 %v753_v53  ;;  %v1098_v53 = vld [vmem:[%s3311_s12 + $0x38] sm:$0xff] }
 0x95a   :  { %1118 = vmatpush.msrb.mxu0 %v1098_v53 }
 0x972   :  { %645 = vrot.lane.b32.xlu1 %v2773_v47, %s3325_s3 }
 0x99c   :  { %913 = vadd.xlane.f32.xlu1 %v912_v58 }
 0x9b1   :  { %v2859_v59 = vpop.f32.mrf.mxu0 }
 0x9b9   :  { %v833_v60 = vpop.f32.mrf.mxu0 }
 0x9ba   :  { %v836_v61 = vmul.f32 0.35355338, %v833_v60  ;;  %v1096_v60 = vld [vmem:[%s3311_s12 + $0x28] sm:$0xff] }
 0x9bc   :  { %v837_v62 = vadd.f32 %v2808_v0, %v836_v61 }
 0x9be   :  { %v838_v47 = vsel %vm170_vm5, %v837_v62, -inf }
 0x9bf   :  { %839 = vmax.xlane.f32.xlu0 %v838_v47  ;;  %v1095_v47 = vld [vmem:[%s3311_s12 + $0x20] sm:$0xff] }
 0x9c4   :  { %v642_v63 = vpop.xlane.xlu1 %641 }
 0x9c5   :  { %2486 = vrcp.f32 %v642_v63 }
 0x9cb   :  { %v2487_v2 = vpop.eup %2486 }
 0x9cc   :  { %v755_v1 = vpop.xlane.xlu1 %754  ;;  %v644_v3 = vmul.f32 %v2487_v2, %v2483_v33 }
 0x9cd   :  { %2488 = vrcp.f32 %v755_v1  ;;  %v1094_v1 = vld [vmem:[%s3311_s12 + $0x18] sm:$0xff] }
 0x9d3   :  { %v2489_v32 = vpop.eup %2488 }
 0x9d4   :  { %v757_v5 = vmul.f32 %v2489_v32, %v2485_v52 }
 0x9e4   :  { %v646_v4 = vpop.permute.xlu1 %645 }
 0x9e5   :  { %666 = vmatpush.msra.mxu1 %v646_v4  ;;  %v1093_v4 = vld [vmem:[%s3311_s12 + $0x10] sm:$0xff] }
 0x9e6   :  { %2333 = vmatmul.msk.f32.vlgmr.msra.gmra.mxu1 %vm170_vm5, %v644_v3 }
 0x9e7   :  { %779 = vmatpush.msrb.mxu1 %v759_v48 }
 0x9e9   :  { %893 = vmatpush.msra.mxu1 %v2828_v18  ;;  %v968_v18 = vld [vmem:[%s3310_s10 + $0x10] sm:$0xff] }
 0x9ee   :  { %2338 = vmatmul.msk.f32.vlgmr.msrb.gmra.mxu1 %vm170_vm5, %v757_v5  ;;  %v1092_v5 = vld [vmem:[%s3311_s12 + $0x8] sm:$0xff] }
 0xa0f   :  { %v914_v0 = vpop.xlane.xlu1 %913 }
 0xa10   :  { %v918_v6 = vmul.f32 %v914_v0, %v2661_v8 }
 0xa12   :  { %v920_v7 = vsub.f32 %v908_v39, %v918_v6  ;;  %v1097_v39 = vld [vmem:[%s3311_s12 + $0x30] sm:$0xff]  ;;  %v1091_v6 = vld [vmem:[%s3311_s12] sm:$0xff] }
 0xa13   :  { %1119 = vmatpush.msrb.mxu0 %v1097_v39 }
 0xa14   :  { %v922_v9 = vmul.f32 %v920_v7, %v920_v7 }
 0xa15   :  { %1120 = vmatpush.msrb.mxu0 %v1096_v60 }
 0xa16   :  { %v924_v10 = vsel %vm63_vm0, %v922_v9, 0.0 }
 0xa17   :  { %925 = vadd.xlane.f32.xlu0 %v924_v10  ;;  %1121 = vmatpush.msrb.mxu0 %v1095_v47 }
 0xa19   :  { %1122 = vmatpush.msrb.mxu0 %v1094_v1  ;;  %v2353_v1 = vld [vmem:[%s3303_s4 + $0x38] sm:$0xff] }
 0xa1a   :  { %1219 = vmatpush.msra.mxu2 %v2353_v1 }
 0xa1b   :  { %1123 = vmatpush.msrb.mxu0 %v1093_v4  ;;  %v2351_v4 = vld [vmem:[%s3303_s4 + $0x28] sm:$0xff] }
 0xa1d   :  { %1124 = vmatpush.msrb.mxu0 %v1092_v5  ;;  %v2350_v5 = vld [vmem:[%s3303_s4 + $0x20] sm:$0xff] }
 0xa1f   :  { %1125 = vmatpush.msrb.mxu0 %v1091_v6 }
 0xa32   :  { %v840_v11 = vpop.xlane.xlu0 %839 }
 0xa33   :  { %v841_v12 = vsub.f32 %v837_v62, %v840_v11 }
 0xa35   :  { %v842_v13 = vmul.f32 1.442695, %v841_v12 }
 0xa37   :  { %2490 = vpow2.f32 %v842_v13 }
 0xa3d   :  { %v2491_v14 = vpop.eup %2490 }
 0xa3e   :  { %v844_v15 = vsel %vm170_vm5, %v2491_v14, 0.0 }
 0xa3f   :  { %845 = vadd.xlane.f32.xlu0 %v844_v15 }
 0xa63   :  { %v668_v16 = vpop.f32.mrf.mxu1 }
 0xa64   :  { %2334 = vmatmul.msk.f32.vlgmr.msrb.gmra.mxu3 %vm170_vm5, %v668_v16 }
 0xa65   :  { %992 = vmatpush.msrb.mxu3 %v969_v17 }
 0xa67   :  { %993 = vmatpush.msrb.mxu3 %v968_v18 }
 0xa69   :  { %994 = vmatpush.msrb.mxu3 %v967_v19 }
 0xa6b   :  { %v781_v55 = vpop.f32.mrf.mxu1  ;;  %995 = vmatpush.msrb.mxu3 %v966_v20 }
 0xa6c   :  { %2339 = vmatmul.msk.f32.vlgmr.msra.gmra.mxu3 %vm170_vm5, %v781_v55 }
 0xa8a   :  { %v926_v21 = vpop.xlane.xlu0 %925 }
 0xa8b   :  { %v930_v22 = vmul.f32 %v926_v21, %v2661_v8 }
 0xa8d   :  { %v932_v23 = vadd.f32 1e-12, %v930_v22 }
 0xa8f   :  { %2492 = vrsqrt.f32 %v932_v23  ;;  %vm940_vm10 = vweird.f32 %v932_v23 }
 0xa95   :  { %v2493_v24 = vpop.eup %2492 }
 0xa96   :  { %v935_v25 = vmul.f32 %v2493_v24, %v932_v23  ;;  %vm941_vm9 = vweird.f32 %v2493_v24 }
 0xa97   :  { %vm942_vm11 = vmor %vm940_vm10, %vm941_vm9 }
 0xa98   :  { %v936_v26 = vmul.f32 %v2493_v24, %v935_v25 }
 0xa9a   :  { %v937_v28 = vmul.f32 0.5, %v936_v26 }
 0xa9c   :  { %v938_v29 = vsub.f32 1.5, %v937_v28 }
 0xa9e   :  { %v939_v31 = vmul.f32 %v2493_v24, %v938_v29 }
 0xaa0   :  { %v943_v36 = vsel %vm942_vm11, %v2493_v24, %v939_v31 }
 0xaa1   :  { %v954_v37 = vmul.f32 %v943_v36, %v920_v7 }
 0xaa3   :  { %v959_v41 = vmul.f32 %v2887_v34, %v954_v37 }
 0xaa5   :  { %v2896_v42 = vadd.f32 %v2892_v38, %v959_v41 }
 0xaa7   :  { %2344 = vmatmul.msk.f32.vlgmr.msrb.gmra.mxu3 %vm63_vm0, %v2896_v42 }
 0xab2   :  { %v846_v43 = vpop.xlane.xlu0 %845 }
 0xab3   :  { %2494 = vrcp.f32 %v846_v43 }
 0xab9   :  { %v2495_v44 = vpop.eup %2494 }
 0xaba   :  { %v848_v45 = vmul.f32 %v2495_v44, %v2491_v14 }
 0xabc   :  { %2342 = vmatmul.msk.f32.vlgmr.msrb.gmra.mxu2 %vm170_vm5, %v848_v45 }
 0xae7   :  { %v691_v46 = vpop.f32.mrf.mxu3 }
 0xae8   :  { %v715_v27 = vadd.f32 %v2859_v59, %v691_v46 }
 0xaef   :  { %v804_v30 = vpop.f32.mrf.mxu3 }
 0xaf0   :  { %v2902_v48 = vadd.f32 %v804_v30, %v715_v27 }
 0xb2a   :  { %v997_v33 = vpop.f32.mrf.mxu3 }
 0xb2b   :  { %v998_v50 = vadd.f32 %v2907_v49, %v997_v33  ;;  %v2944_v33 = vld [vmem:[%s3312_s13] ss:$0 sm:$0xff] }
 0xb2d   :  { %v1005_v51 = vmul.f32 0.70710677, %v998_v50  ;;  %v1003_v36 = vmul.f32 0.5, %v998_v50 }
 0xb2f   :  { %v1007_v35 = vmul.f32 %v1005_v51, %v1005_v51 }
 0xb31   :  { %v1008_v52 = vmin.f32 %v1007_v35, 16.0 }
 0xb33   :  { %v1009_v56 = vmul.f32 2.1237322e-06, %v1008_v52  ;;  %v1020_v57 = vmul.f32 3.8918573e-05, %v1008_v52 }
 0xb35   :  { %v1010_v58 = vadd.f32 0.00028619796, %v1009_v56  ;;  %v1021_v59 = vadd.f32 0.001143296, %v1020_v57 }
 0xb37   :  { %v1011_v61 = vmul.f32 %v1010_v58, %v1008_v52  ;;  %v1022_v62 = vmul.f32 %v1021_v59, %v1008_v52 }
 0xb39   :  { %v1023_v63 = vadd.f32 0.014752088, %v1022_v62  ;;  %v1012_v2 = vadd.f32 0.0036580483, %v1011_v61 }
 0xb3b   :  { %v1024_v3 = vmul.f32 %v1023_v63, %v1008_v52  ;;  %v1013_v0 = vmul.f32 %v1012_v2, %v1008_v52 }
 0xb3d   :  { %v1025_v32 = vadd.f32 0.112945676, %v1024_v3  ;;  %v1014_v11 = vadd.f32 0.05243302, %v1013_v0  ;;  %v2352_v3 = vld [vmem:[%s3303_s4 + $0x30] sm:$0xff]  ;;  %s3335_s4 = smov 72  }
 0xb3e   :  { %1220 = vmatpush.msra.mxu2 %v2352_v3 }
 0xb3f   :  { %v1026_v7 = vmul.f32 %v1025_v32, %v1008_v52  ;;  %v872_v9 = vpop.f32.mrf.mxu2  ;;  %v1015_v14 = vmul.f32 %v1014_v11, %v1008_v52 }
 0xb40   :  { %2343 = vmatmul.msk.f32.vlgmr.msra.gmra.mxu1 %vm170_vm5, %v872_v9  ;;  %1221 = vmatpush.msra.mxu2 %v2351_v4 }
 0xb41   :  { %v1027_v10 = vadd.f32 0.4994258, %v1026_v7  ;;  %v1016_v15 = vadd.f32 0.18741608, %v1015_v14 }
 0xb42   :  { %1222 = vmatpush.msra.mxu2 %v2350_v5 }
 0xb43   :  { %v1028_v12 = vmul.f32 %v1027_v10, %v1008_v52  ;;  %v1017_v55 = vmul.f32 %v1016_v15, %v1008_v52 }
 0xb45   :  { %v1029_v13 = vadd.f32 1.0, %v1028_v12  ;;  %v1018_v20 = vadd.f32 1.1283791, %v1017_v55 }
 0xb47   :  { %2496 = vrcp.f32 %v1029_v13  ;;  %v1041_v19 = vand.u32 2147483648, %v1029_v13  ;;  %v1039_v22 = vand.u32 2147483647, %v1029_v13  ;;  %vm1035_vm13 = vweird.f32 %v1029_v13 }
 0xb48   :  { %v1019_v25 = vmul.f32 %v1018_v20, %v1005_v51  ;;  %v2976_v20 = vld [vmem:[%s3313_s14] ss:$0 sm:$0xff] }
 0xb49   :  { %v1042_v24 = vor.u32 1.1754944e-38, %v1041_v19  ;;  %vm1040_vm15 = vcmp.eq.f32.partialorder %v1039_v22, 8.507059e+37 }
 0xb4d   :  { %v2497_v16 = vpop.eup %2496 }
 0xb4e   :  { %v1031_v17 = vmul.f32 %v2497_v16, %v1029_v13  ;;  %vm1036_vm12 = vweird.f32 %v2497_v16 }
 0xb4f   :  { %vm1037_vm14 = vmor %vm1035_vm13, %vm1036_vm12 }
 0xb50   :  { %v1032_v18 = vsub.f32 1.0, %v1031_v17 }
 0xb52   :  { %v1033_v21 = vmul.f32 %v2497_v16, %v1032_v18 }
 0xb54   :  { %v1034_v23 = vadd.f32 %v2497_v16, %v1033_v21  ;;  %v2981_v21 = vld [vmem:[%s3314_s15] ss:$0 sm:$0xff] }
 0xb56   :  { %v1038_v26 = vsel %vm1037_vm14, %v2497_v16, %v1034_v23 }
 0xb57   :  { %v1043_v28 = vsel %vm1040_vm15, %v1042_v24, %v1038_v26 }
 0xb58   :  { %v1044_v29 = vmul.f32 %v1043_v28, %v1019_v25 }
 0xb5a   :  { %v2346_v31 = vclamps-f32 %v1044_v29, 1.0 }
 0xb5c   :  { %v1087_v37 = vadd.f32 1.0, %v2346_v31 }
 0xb5e   :  { %v1089_v41 = vmul.f32 %v1087_v37, %v1003_v36 }
 0xb60   :  { %2348 = vmatmul.msk.f32.vlgmr.msrb.gmra.mxu0 %vm1103_vm1, %v1089_v41 }
 0xbbd   :  { %v895_v43 = vpop.f32.mrf.mxu1 }
 0xbbe   :  { %v898_v44 = vadd.f32 %v895_v43, %v2902_v48 }
 0xbc0   :  { %899 = vst.msk [vmem:[#allocation2 + $0x8] sm:$0xff] %vm63_vm0, %v898_v44 }
 0xbc7   :  { %v901_v45 = vld [vmem:[#allocation2 + $0x8] sm:$0xff] }
 0xbc8   :  { %v907_v46 = vadd.f32 %v2854_v54, %v901_v45 }
 0xbca   :  { %v909_v27 = vadd.f32 %v907_v46, %v2767_v40 }
 0xbcc   :  { %v915_v30 = vsel %vm63_vm0, %v909_v27, 0.0 }
 0xbcd   :  { %916 = vadd.xlane.f32.xlu0 %v915_v30 }
 0xbdd   :  { %v1127_v50 = vpop.f32.mrf.mxu0 }
 0xbde   :  { %v1128_v51 = vadd.f32 %v2944_v33, %v1127_v50  ;;  %v2993_v50 = vld [vmem:[%s3302_s5 + $0x1] ss:$0 sm:$0xff] }
 0xbe0   :  { %v1133_v48 = vadd.f32 %v1128_v51, %v2896_v42 }
 0xbe2   :  { %v1137_v35 = vsel %vm63_vm0, %v1133_v48, 0.0 }
 0xbe3   :  { %1138 = vadd.xlane.f32.xlu2 %v1137_v35 }
 0xc40   :  { %v917_v52 = vpop.xlane.xlu0 %916 }
 0xc41   :  { %v919_v54 = vmul.f32 %v917_v52, %v2661_v8 }
 0xc43   :  { %v921_v40 = vsub.f32 %v909_v27, %v919_v54 }
 0xc45   :  { %v923_v53 = vmul.f32 %v921_v40, %v921_v40 }
 0xc47   :  { %v927_v56 = vsel %vm63_vm0, %v923_v53, 0.0 }
 0xc48   :  { %928 = vadd.xlane.f32.xlu0 %v927_v56 }
 0xc56   :  { %v1139_v57 = vpop.xlane.xlu2 %1138 }
 0xc57   :  { %v1143_v39 = vmul.f32 %v1139_v57, %v2661_v8 }
 0xc59   :  { %v1145_v58 = vsub.f32 %v1133_v48, %v1143_v39 }
 0xc5b   :  { %v1147_v59 = vmul.f32 %v1145_v58, %v1145_v58 }
 0xc5d   :  { %v1149_v60 = vsel %vm63_vm0, %v1147_v59, 0.0 }
 0xc5e   :  { %1150 = vadd.xlane.f32.xlu0 %v1149_v60 }
 0xcbb   :  { %v929_v42 = vpop.xlane.xlu0 %928 }
 0xcbc   :  { %v931_v61 = vmul.f32 %v929_v42, %v2661_v8 }
 0xcbe   :  { %v933_v62 = vadd.f32 1e-12, %v931_v61 }
 0xcc0   :  { %2498 = vrsqrt.f32 %v933_v62  ;;  %vm950_vm3 = vweird.f32 %v933_v62 }
 0xcc6   :  { %v2499_v47 = vpop.eup %2498 }
 0xcc7   :  { %v945_v63 = vmul.f32 %v2499_v47, %v933_v62  ;;  %vm951_vm2 = vweird.f32 %v2499_v47 }
 0xcc8   :  { %vm952_vm4 = vmor %vm950_vm3, %vm951_vm2 }
 0xcc9   :  { %v946_v2 = vmul.f32 %v2499_v47, %v945_v63 }
 0xccb   :  { %v947_v32 = vmul.f32 0.5, %v946_v2 }
 0xccd   :  { %v948_v0 = vsub.f32 1.5, %v947_v32 }
 0xccf   :  { %v949_v6 = vmul.f32 %v2499_v47, %v948_v0 }
 0xcd1   :  { %v953_v7 = vsel %vm952_vm4, %v2499_v47, %v949_v6  ;;  %v1151_v9 = vpop.xlane.xlu0 %1150 }
 0xcd2   :  { %v1155_v10 = vmul.f32 %v1151_v9, %v2661_v8  ;;  %v955_v11 = vmul.f32 %v953_v7, %v921_v40 }
 0xcd4   :  { %v1157_v12 = vadd.f32 1e-12, %v1155_v10  ;;  %v960_v13 = vmul.f32 %v2887_v34, %v955_v11 }
 0xcd6   :  { %2500 = vrsqrt.f32 %v1157_v12  ;;  %v2969_v14 = vadd.f32 %v2892_v38, %v960_v13  ;;  %vm1165_vm7 = vweird.f32 %v1157_v12 }
 0xcd8   :  { %2345 = vmatmul.msk.f32.gmra.mxu3 %vm63_vm0, %v2969_v14 }
 0xcdc   :  { %v2501_v15 = vpop.eup %2500 }
 0xcdd   :  { %v1160_v16 = vmul.f32 %v2501_v15, %v1157_v12  ;;  %vm1166_vm6 = vweird.f32 %v2501_v15 }
 0xcde   :  { %vm1167_vm8 = vmor %vm1165_vm7, %vm1166_vm6 }
 0xcdf   :  { %v1161_v55 = vmul.f32 %v2501_v15, %v1160_v16 }
 0xce1   :  { %v1162_v17 = vmul.f32 0.5, %v1161_v55 }
 0xce3   :  { %v1163_v18 = vsub.f32 1.5, %v1162_v17 }
 0xce5   :  { %v1164_v19 = vmul.f32 %v2501_v15, %v1163_v18  ;;  %v3022_v18 = vld [vmem:[%s3304_s1] ss:$0 sm:$0xff] }
 0xce7   :  { %v1168_v34 = vsel %vm1167_vm8, %v2501_v15, %v1164_v19 }
 0xce8   :  { %v1179_v38 = vmul.f32 %v1168_v34, %v1145_v58 }
 0xcea   :  { %v1184_v22 = vmul.f32 %v2976_v20, %v1179_v38 }
 0xcec   :  { %v2985_v23 = vadd.f32 %v2981_v21, %v1184_v22 }
 0xcee   :  { %2355 = vmatmul.msk.f32.vlgmr.msra.gmra.mxu2 %vm63_vm0, %v2985_v23 }
 0xd5b   :  { %v1000_v24 = vpop.f32.mrf.mxu3 }
 0xd5c   :  { %v1001_v25 = vadd.f32 %v2907_v49, %v1000_v24 }
 0xd5e   :  { %v1006_v26 = vmul.f32 0.70710677, %v1001_v25  ;;  %v1004_v0 = vmul.f32 0.5, %v1001_v25 }
 0xd60   :  { %v1047_v28 = vmul.f32 %v1006_v26, %v1006_v26 }
 0xd62   :  { %v1048_v29 = vmin.f32 %v1047_v28, 16.0 }
 0xd64   :  { %v1049_v31 = vmul.f32 2.1237322e-06, %v1048_v29  ;;  %v1060_v36 = vmul.f32 3.8918573e-05, %v1048_v29 }
 0xd66   :  { %v1050_v37 = vadd.f32 0.00028619796, %v1049_v31  ;;  %v1061_v41 = vadd.f32 0.001143296, %v1060_v36 }
 0xd68   :  { %v1051_v43 = vmul.f32 %v1050_v37, %v1048_v29  ;;  %v1062_v44 = vmul.f32 %v1061_v41, %v1048_v29 }
 0xd6a   :  { %v1063_v45 = vadd.f32 0.014752088, %v1062_v44  ;;  %v1052_v46 = vadd.f32 0.0036580483, %v1051_v43 }
 0xd6c   :  { %v1064_v27 = vmul.f32 %v1063_v45, %v1048_v29  ;;  %v1053_v51 = vmul.f32 %v1052_v46, %v1048_v29 }
 0xd6e   :  { %v1065_v30 = vadd.f32 0.112945676, %v1064_v27  ;;  %v1054_v54 = vadd.f32 0.05243302, %v1053_v51 }
 0xd70   :  { %v1066_v49 = vmul.f32 %v1065_v30, %v1048_v29  ;;  %v1055_v56 = vmul.f32 %v1054_v54, %v1048_v29 }
 0xd71   :  { %v1224_v48 = vpop.f32.mrf.mxu2 }
 0xd72   :  { %v1067_v35 = vadd.f32 0.4994258, %v1066_v49  ;;  %v2996_v52 = vadd.f32 %v2993_v50, %v1224_v48  ;;  %v1056_v57 = vadd.f32 0.18741608, %v1055_v56 }
 0xd74   :  { %v1068_v40 = vmul.f32 %v1067_v35, %v1048_v29  ;;  %1418 = vrot.lane.b32.xlu2 %v2996_v52, %s2557_s27  ;;  %1305 = vrot.lane.b32.xlu0 %v2996_v52, %s2556_s24  ;;  %v1057_v58 = vmul.f32 %v1056_v57, %v1048_v29 }
 0xd75   :  { %1307 = vrot.lane.b32.xlu1 %v2996_v52, %s2551_s19 }
 0xd76   :  { %v1069_v53 = vadd.f32 1.0, %v1068_v40  ;;  %v1058_v61 = vadd.f32 1.1283791, %v1057_v58 }
 0xd78   :  { %2502 = vrcp.f32 %v1069_v53  ;;  %v1081_v42 = vand.u32 2147483648, %v1069_v53  ;;  %v1079_v47 = vand.u32 2147483647, %v1069_v53  ;;  %vm1075_vm10 = vweird.f32 %v1069_v53 }
 0xd79   :  { %v1059_v2 = vmul.f32 %v1058_v61, %v1006_v26 }
 0xd7a   :  { %v1082_v1 = vor.u32 1.1754944e-38, %v1081_v42  ;;  %vm1080_vm12 = vcmp.eq.f32.partialorder %v1079_v47, 8.507059e+37 }
 0xd7c   :  { %1237 = vrot.lane.b32.xlu0 %v2996_v52, %s2553_s20 }
 0xd7d   :  { %1420 = vrot.lane.b32.xlu1 %v2996_v52, %s2555_s23 }
 0xd7e   :  { %v2503_v39 = vpop.eup %2502 }
 0xd7f   :  { %v1071_v59 = vmul.f32 %v2503_v39, %v1069_v53  ;;  %vm1076_vm9 = vweird.f32 %v2503_v39 }
 0xd80   :  { %vm1077_vm11 = vmor %vm1075_vm10, %vm1076_vm9 }
 0xd81   :  { %v1072_v60 = vsub.f32 1.0, %v1071_v59 }
 0xd83   :  { %v1073_v62 = vmul.f32 %v2503_v39, %v1072_v60 }
 0xd85   :  { %v1074_v63 = vadd.f32 %v2503_v39, %v1073_v62 }
 0xd87   :  { %v1078_v3 = vsel %vm1077_vm11, %v2503_v39, %v1074_v63 }
 0xd88   :  { %v1083_v4 = vsel %vm1080_vm12, %v1082_v1, %v1078_v3 }
 0xd89   :  { %v1084_v32 = vmul.f32 %v1083_v4, %v1059_v2  ;;  %v2357_v2 = vld [vmem:[%s3305_s6 + $0x20] sm:$0xff] }
 0xd8b   :  { %v2347_v5 = vclamps-f32 %v1084_v32, 1.0 }
 0xd8d   :  { %v1088_v6 = vadd.f32 1.0, %v2347_v5 }
 0xd8f   :  { %v1090_v7 = vmul.f32 %v1088_v6, %v1004_v0 }
 0xd91   :  { %2349 = vmatmul.msk.f32.gmra.mxu0 %vm1103_vm1, %v1090_v7 }
 0xdce   :  { %v1419_v13 = vpop.permute.xlu2 %1418 }
 0xde6   :  { %v1306_v9 = vpop.permute.xlu0 %1305 }
 0xde7   :  { %v1308_v10 = vpop.permute.xlu1 %1307 }
 0xde8   :  { %2364 = vmatpush.xpose.msk.msra.mxu3 %vm170_vm5, %v1308_v10 }
 0xdeb   :  { %2365 = vmatmul.msk.f32.vlgmr.msra.gmra.mxu3 %vm170_vm5, %v1306_v9 }
 0xdec   :  { %1413 = vmatpush.msrb.mxu3 %v2357_v2 }
 0xdee   :  { %v1238_v11 = vpop.permute.xlu0 %1237 }
 0xdef   :  { %v1421_v12 = vpop.permute.xlu1 %1420  ;;  %2361 = vmatpush.xpose.msk.msrb.mxu1 %vm170_vm5, %v1238_v11 }
 0xdf0   :  { %2369 = vmatpush.xpose.msk.msra.mxu0 %vm170_vm5, %v1421_v12 }
 0xdf2   :  { %2362 = vmatmul.msk.f32.vlgmr.msrb.gmra.mxu1 %vm170_vm5, %v2996_v52 }
 0xdf3   :  { %2370 = vmatmul.msk.f32.vlgmr.msra.gmra.mxu0 %vm170_vm5, %v1419_v13 }
 0xe0e   :  { %v1130_v15 = vpop.f32.mrf.mxu0 }
 0xe0f   :  { %v1131_v16 = vadd.f32 %v2944_v33, %v1130_v15 }
 0xe11   :  { %v1134_v55 = vadd.f32 %v1131_v16, %v2969_v14 }
 0xe13   :  { %v1140_v17 = vsel %vm63_vm0, %v1134_v55, 0.0 }
 0xe14   :  { %1141 = vadd.xlane.f32.xlu1 %v1140_v17  ;;  %v2358_v17 = vld [vmem:[%s3305_s6 + $0x28] sm:$0xff] }
 0xe6e   :  { %v1330_v19 = vpop.f32.mrf.mxu3 }
 0xe6f   :  { %v1333_v34 = vmul.f32 0.35355338, %v1330_v19  ;;  %v1260_v30 = vpop.f32.mrf.mxu1 }
 0xe70   :  { %v1443_v38 = vpop.f32.mrf.mxu0  ;;  %v1263_v48 = vmul.f32 0.35355338, %v1260_v30 }
 0xe71   :  { %v1446_v22 = vmul.f32 0.35355338, %v1443_v38  ;;  %v1334_v24 = vadd.f32 %v3022_v18, %v1333_v34 }
 0xe72   :  { %v1267_v54 = vadd.f32 %v3022_v18, %v1263_v48 }
 0xe73   :  { %v1335_v25 = vsel %vm170_vm5, %v1334_v24, -inf  ;;  %v1447_v33 = vadd.f32 %v3022_v18, %v1446_v22 }
 0xe74   :  { %1336 = vmax.xlane.f32.xlu0 %v1335_v25  ;;  %v1268_v40 = vsel %vm170_vm5, %v1267_v54, -inf }
 0xe75   :  { %v1448_v14 = vsel %vm170_vm5, %v1447_v33, -inf }
 0xe76   :  { %1449 = vmax.xlane.f32.xlu1 %v1448_v14 }
 0xe87   :  { %v1142_v26 = vpop.xlane.xlu1 %1141 }
 0xe88   :  { %v1144_v28 = vmul.f32 %v1142_v26, %v2661_v8 }
 0xe8a   :  { %v1146_v29 = vsub.f32 %v1134_v55, %v1144_v28 }
 0xe8c   :  { %v1148_v31 = vmul.f32 %v1146_v29, %v1146_v29 }
 0xe8e   :  { %v1152_v36 = vsel %vm63_vm0, %v1148_v31, 0.0  ;;  %v3086_v31 = vld [vmem:[%s3304_s1 + $0x1] ss:$0 sm:$0xff]  ;;  %s3336_s1 = smov 40  }
 0xe8f   :  { %1153 = vadd.xlane.f32.xlu2 %v1152_v36 }
 0xea7   :  { %1459 = vrot.lane.b32.xlu2 %v2996_v52, %s2558_s28 }
 0xeaf   :  { %1509 = vrot.lane.b32.xlu2 %v2996_v52, %s2559_s30 }
 0xee7   :  { %v1337_v37 = vpop.xlane.xlu0 %1336 }
 0xee8   :  { %v1338_v41 = vsub.f32 %v1334_v24, %v1337_v37 }
 0xee9   :  { %v1450_v43 = vpop.xlane.xlu1 %1449 }
 0xeea   :  { %v1339_v44 = vmul.f32 1.442695, %v1338_v41  ;;  %v1451_v45 = vsub.f32 %v1447_v33, %v1450_v43 }
 0xeec   :  { %2504 = vpow2.f32 %v1339_v44  ;;  %v1452_v46 = vmul.f32 1.442695, %v1451_v45 }
 0xeee   :  { %2506 = vpow2.f32 %v1452_v46 }
 0xef2   :  { %v2505_v27 = vpop.eup %2504 }
 0xef3   :  { %v1341_v51 = vsel %vm170_vm5, %v2505_v27, 0.0 }
 0xef4   :  { %v2507_v49 = vpop.eup %2506  ;;  %1342 = vadd.xlane.f32.xlu0 %v1341_v51 }
 0xef5   :  { %v1454_v35 = vsel %vm170_vm5, %v2507_v49, 0.0 }
 0xef6   :  { %1455 = vadd.xlane.f32.xlu1 %v1454_v35 }
 0xefe   :  { %1269 = vmax.xlane.f32.xlu1 %v1268_v40 }
 0xf02   :  { %v1154_v53 = vpop.xlane.xlu2 %1153 }
 0xf03   :  { %v1156_v56 = vmul.f32 %v1154_v53, %v2661_v8 }
 0xf05   :  { %v1158_v57 = vadd.f32 1e-12, %v1156_v56 }
 0xf07   :  { %2508 = vrsqrt.f32 %v1158_v57  ;;  %vm1175_vm14 = vweird.f32 %v1158_v57 }
 0xf08   :  { %1346 = vrot.lane.b32.xlu0 %v2996_v52, %s3333_s22 }
 0xf0a   :  { %v1460_v9 = vpop.permute.xlu2 %1459 }
 0xf0d   :  { %v2509_v39 = vpop.eup %2508 }
 0xf0e   :  { %v1170_v58 = vmul.f32 %v2509_v39, %v1158_v57  ;;  %vm1176_vm13 = vweird.f32 %v2509_v39 }
 0xf0f   :  { %vm1177_vm15 = vmor %vm1175_vm14, %vm1176_vm13 }
 0xf10   :  { %v1171_v59 = vmul.f32 %v2509_v39, %v1170_v58  ;;  %1279 = vrot.lane.b32.xlu0 %v2996_v52, %s3334_s25 }
 0xf12   :  { %v1172_v60 = vmul.f32 0.5, %v1171_v59  ;;  %v1510_v26 = vpop.permute.xlu2 %1509 }
 0xf14   :  { %v1173_v42 = vsub.f32 1.5, %v1172_v60 }
 0xf16   :  { %v1174_v61 = vmul.f32 %v2509_v39, %v1173_v42 }
 0xf18   :  { %v1178_v62 = vsel %vm1177_vm15, %v2509_v39, %v1174_v61  ;;  %1511 = vrot.lane.b32.xlu0 %v2996_v52, %s3335_s4 }
 0xf19   :  { %v1180_v47 = vmul.f32 %v1178_v62, %v1146_v29 }
 0xf1b   :  { %v1185_v63 = vmul.f32 %v2976_v20, %v1180_v47 }
 0xf1d   :  { %v3047_v1 = vadd.f32 %v2981_v21, %v1185_v63 }
 0xf1f   :  { %2356 = vmatmul.msk.f32.gmra.mxu2 %vm63_vm0, %v3047_v1 }
 0xf67   :  { %v1343_v4 = vpop.xlane.xlu0 %1342 }
 0xf68   :  { %2510 = vrcp.f32 %v1343_v4 }
 0xf69   :  { %v1456_v3 = vpop.xlane.xlu1 %1455 }
 0xf6e   :  { %v2511_v6 = vpop.eup %2510 }
 0xf6f   :  { %v1345_v20 = vmul.f32 %v2511_v6, %v2505_v27 }
 0xf71   :  { %v1270_v32 = vpop.xlane.xlu1 %1269 }
 0xf72   :  { %v1271_v5 = vsub.f32 %v1267_v54, %v1270_v32 }
 0xf74   :  { %v1272_v0 = vmul.f32 1.442695, %v1271_v5  ;;  %v3122_v5 = vld [vmem:[%s3305_s6 + $0x38] sm:$0xff] }
 0xf76   :  { %2512 = vpow2.f32 %v1272_v0 }
 0xf77   :  { %2514 = vrcp.f32 %v1456_v3 }
 0xf7a   :  { %v1347_v21 = vpop.permute.xlu0 %1346 }
 0xf7b   :  { %1367 = vmatpush.msrb.mxu2 %v1347_v21 }
 0xf7c   :  { %v2513_v7 = vpop.eup %2512  ;;  %2366 = vmatmul.msk.f32.vlgmr.msrb.gmra.mxu2 %vm170_vm5, %v1345_v20 }
 0xf7d   :  { %1480 = vmatpush.msra.mxu2 %v1460_v9  ;;  %v1274_v10 = vsel %vm170_vm5, %v2513_v7, 0.0  ;;  %v2515_v11 = vpop.eup %2514 }
 0xf7e   :  { %1275 = vadd.xlane.f32.xlu1 %v1274_v10  ;;  %v1458_v12 = vmul.f32 %v2515_v11, %v2507_v49 }
 0xf7f   :  { %1594 = vmatpush.msrb.mxu2 %v3122_v5 }
 0xf82   :  { %v1280_v13 = vpop.permute.xlu0 %1279 }
 0xf83   :  { %1300 = vmatpush.msra.mxu1 %v1280_v13 }
 0xf84   :  { %2371 = vmatmul.msk.f32.vlgmr.msra.gmra.mxu2 %vm170_vm5, %v1458_v12 }
 0xf85   :  { %1390 = vmatpush.msrb.mxu1 %v2358_v17 }
 0xf8a   :  { %v1512_v15 = vpop.permute.xlu0 %1511 }
 0xf8b   :  { %2373 = vmatpush.xpose.msk.msra.mxu3 %vm170_vm5, %v1512_v15 }
 0xfa2   :  { %v1227_v16 = vpop.f32.mrf.mxu2 }
 0xfa3   :  { %v3059_v55 = vadd.f32 %v2993_v50, %v1227_v16  ;;  %v2359_v50 = vld [vmem:[%s3305_s6 + $0x30] sm:$0xff] }
 0xfa5   :  { %1603 = vrot.lane.b32.xlu1 %v3059_v55, %s2553_s20 }
 0xfad   :  { %1645 = vrot.lane.b32.xlu1 %v3059_v55, %s3334_s25 }
 0xff1   :  { %v1276_v19 = vpop.xlane.xlu1 %1275 }
 0xff2   :  { %2516 = vrcp.f32 %v1276_v19 }
 0xff8   :  { %v2517_v34 = vpop.eup %2516 }
 0xff9   :  { %v1278_v38 = vmul.f32 %v2517_v34, %v2513_v7 }
 0xffb   :  { %2363 = vmatmul.msk.f32.vlgmr.msra.gmra.mxu1 %vm170_vm5, %v1278_v38 }
 0xffc   :  { %1503 = vmatpush.msra.mxu1 %v2359_v50 }
 0xfff   :  { %v1369_v22 = vpop.f32.mrf.mxu2 }
0x1003   :  { %2367 = vmatmul.msk.f32.vlgmr.msrb.gmra.mxu1 %vm170_vm5, %v1369_v22 }
0x1007   :  { %v1482_v24 = vpop.f32.mrf.mxu2 }
0x100b   :  { %2372 = vmatmul.msk.f32.vlgmr.msra.gmra.mxu1 %vm170_vm5, %v1482_v24 }
0x1017   :  { %v1604_v25 = vpop.permute.xlu1 %1603 }
0x1018   :  { %2378 = vmatpush.xpose.msk.msrb.mxu1 %vm170_vm5, %v1604_v25 }
0x101b   :  { %2379 = vmatmul.msk.f32.vlgmr.msrb.gmra.mxu1 %vm170_vm5, %v3059_v55 }
0x101c   :  { %1756 = vmatpush.msra.mxu1 %v2358_v17 }
0x101e   :  { %1869 = vmatpush.msrb.mxu1 %v2359_v50 }
0x101f   :  { %v1646_v14 = vpop.permute.xlu1 %1645 }
0x1078   :  { %v1302_v33 = vpop.f32.mrf.mxu1 }
0x1079   :  { %2368 = vmatmul.msk.f32.vlgmr.msrb.gmra.mxu3 %vm170_vm5, %v1302_v33 }
0x107a   :  { %1666 = vmatpush.msrb.mxu3 %v1646_v14  ;;  %v3143_v14 = vld [vmem:[%s3306_s7 + $0x1] ss:$0 sm:$0xff] }
0x1080   :  { %v3079_v28 = vpop.f32.mrf.mxu1 }
0x1081   :  { %2374 = vmatmul.msk.f32.vlgmr.msra.gmra.mxu3 %vm170_vm5, %v1510_v26 }
0x1082   :  { %1779 = vmatpush.msra.mxu3 %v2357_v2 }
0x1088   :  { %v3081_v29 = vpop.f32.mrf.mxu1 }
0x1098   :  { %v1626_v36 = vpop.f32.mrf.mxu1 }
0x1099   :  { %v1629_v37 = vmul.f32 0.35355338, %v1626_v36 }
0x109b   :  { %v1633_v41 = vadd.f32 %v3086_v31, %v1629_v37 }
0x109d   :  { %v1634_v43 = vsel %vm170_vm5, %v1633_v41, -inf }
0x109e   :  { %1635 = vmax.xlane.f32.xlu0 %v1634_v43 }
0x10fc   :  { %v3090_v44 = vpop.f32.mrf.mxu3 }
0x10fd   :  { %v1416_v34 = vadd.f32 %v3090_v44, %v3079_v28 }
0x10ff   :  { %v1508_v38 = vadd.f32 %v3081_v29, %v1416_v34  ;;  %v3186_v34 = vld [vmem:[%s3308_s9 + $0x1] ss:$0 sm:$0xff] }
0x1104   :  { %v1534_v45 = vpop.f32.mrf.mxu3 }
0x1105   :  { %v1537_v46 = vmul.f32 0.35355338, %v1534_v45 }
0x1107   :  { %v1538_v27 = vadd.f32 %v3022_v18, %v1537_v46 }
0x1109   :  { %v1539_v30 = vsel %vm170_vm5, %v1538_v27, -inf }
0x110a   :  { %1540 = vmax.xlane.f32.xlu1 %v1539_v30 }
0x1111   :  { %v1636_v51 = vpop.xlane.xlu0 %1635 }
0x1112   :  { %v1637_v49 = vsub.f32 %v1633_v41, %v1636_v51 }
0x1114   :  { %v1638_v48 = vmul.f32 1.442695, %v1637_v49 }
0x1116   :  { %2518 = vpow2.f32 %v1638_v48 }
0x111c   :  { %v2519_v35 = vpop.eup %2518 }
0x111d   :  { %v1640_v54 = vsel %vm170_vm5, %v2519_v35, 0.0 }
0x111e   :  { %1641 = vadd.xlane.f32.xlu2 %v1640_v54 }
0x1123   :  { %1671 = vrot.lane.b32.xlu1 %v3059_v55, %s2556_s24 }
0x1136   :  { %1550 = vrot.lane.b32.xlu2 %v2996_v52, %s3336_s1 }
0x113e   :  { %1877 = vrot.lane.b32.xlu2 %v3059_v55, %s3335_s4 }
0x1146   :  { %1786 = vrot.lane.b32.xlu2 %v3059_v55, %s2555_s23 }
0x117d   :  { %v1541_v18 = vpop.xlane.xlu1 %1540 }
0x117e   :  { %v1542_v40 = vsub.f32 %v1538_v27, %v1541_v18 }
0x1180   :  { %v1543_v53 = vmul.f32 1.442695, %v1542_v40 }
0x1182   :  { %2520 = vpow2.f32 %v1543_v53 }
0x1188   :  { %v2521_v56 = vpop.eup %2520 }
0x1189   :  { %v1545_v57 = vsel %vm170_vm5, %v2521_v56, 0.0 }
0x118a   :  { %1546 = vadd.xlane.f32.xlu0 %v1545_v57 }
0x1191   :  { %v1642_v39 = vpop.xlane.xlu2 %1641 }
0x1192   :  { %2522 = vrcp.f32 %v1642_v39 }
0x1195   :  { %v1672_v2 = vpop.permute.xlu1 %1671 }
0x1198   :  { %v2523_v58 = vpop.eup %2522 }
0x1199   :  { %v1644_v59 = vmul.f32 %v2523_v58, %v2519_v35  ;;  %v1551_v60 = vpop.permute.xlu2 %1550 }
0x119a   :  { %1571 = vmatpush.msrb.mxu0 %v1551_v60 }
0x119b   :  { %2380 = vmatmul.msk.f32.vlgmr.msrb.gmra.mxu3 %vm170_vm5, %v1644_v59 }
0x119e   :  { %1673 = vrot.lane.b32.xlu0 %v3059_v55, %s2551_s19 }
0x11a1   :  { %v1878_v52 = vpop.permute.xlu2 %1877 }
0x11a2   :  { %2390 = vmatpush.xpose.msk.msrb.mxu3 %vm170_vm5, %v1878_v52 }
0x11a6   :  { %1875 = vrot.lane.b32.xlu0 %v3059_v55, %s2559_s30 }
0x11a9   :  { %v1787_v63 = vpop.permute.xlu2 %1786 }
0x11ae   :  { %1784 = vrot.lane.b32.xlu0 %v3059_v55, %s2557_s27 }
0x11fd   :  { %v1547_v42 = vpop.xlane.xlu0 %1546 }
0x11fe   :  { %2524 = vrcp.f32 %v1547_v42 }
0x1204   :  { %v2525_v61 = vpop.eup %2524 }
0x1205   :  { %v1549_v62 = vmul.f32 %v2525_v61, %v2521_v56 }
0x1207   :  { %2375 = vmatmul.msk.f32.vlgmr.msrb.gmra.mxu0 %vm170_vm5, %v1549_v62 }
0x1210   :  { %v1674_v47 = vpop.permute.xlu0 %1673 }
0x1211   :  { %2381 = vmatpush.xpose.msk.msra.mxu0 %vm170_vm5, %v1674_v47 }
0x1214   :  { %2382 = vmatmul.msk.f32.vlgmr.msra.gmra.mxu0 %vm170_vm5, %v1672_v2 }
0x1215   :  { %2386 = vmatpush.xpose.msk.msrb.mxu0 %vm170_vm5, %v1787_v63 }
0x1218   :  { %v1876_v3 = vpop.permute.xlu0 %1875 }
0x121e   :  { %v1668_v4 = vpop.f32.mrf.mxu3 }
0x121f   :  { %2385 = vmatmul.msk.f32.vlgmr.msra.gmra.mxu3 %vm170_vm5, %v1668_v4  ;;  %v2400_v4 = vld [vmem:[%s3310_s10 + $0x38] sm:$0xff] }
0x1220   :  { %v1785_v32 = vpop.permute.xlu0 %1784 }
0x1221   :  { %2387 = vmatmul.msk.f32.vlgmr.msrb.gmra.mxu0 %vm170_vm5, %v1785_v32 }
0x1227   :  { %2391 = vmatmul.msk.f32.vlgmr.msrb.gmra.mxu3 %vm170_vm5, %v1876_v3 }
0x1284   :  { %v1573_v0 = vpop.f32.mrf.mxu0 }
0x1285   :  { %2376 = vmatmul.msk.f32.vlgmr.msrb.gmra.mxu2 %vm170_vm5, %v1573_v0 }
0x1291   :  { %v1696_v6 = vpop.f32.mrf.mxu0 }
0x1292   :  { %v1699_v20 = vmul.f32 0.35355338, %v1696_v6  ;;  %v2399_v6 = vld [vmem:[%s3310_s10 + $0x30] sm:$0xff] }
0x1294   :  { %v1700_v21 = vadd.f32 %v3086_v31, %v1699_v20 }
0x1296   :  { %v1701_v7 = vsel %vm170_vm5, %v1700_v21, -inf }
0x1297   :  { %1702 = vmax.xlane.f32.xlu2 %v1701_v7 }
0x129e   :  { %v1809_v9 = vpop.f32.mrf.mxu0 }
0x129f   :  { %v1812_v10 = vmul.f32 0.35355338, %v1809_v9 }
0x12a1   :  { %v1813_v11 = vadd.f32 %v3086_v31, %v1812_v10 }
0x12a2   :  { %v3129_v12 = vpop.f32.mrf.mxu3 }
0x12a3   :  { %v1814_v13 = vsel %vm170_vm5, %v1813_v11, -inf }
0x12a4   :  { %1815 = vmax.xlane.f32.xlu0 %v1814_v13 }
0x12aa   :  { %v1900_v15 = vpop.f32.mrf.mxu3 }
0x12ab   :  { %v1903_v16 = vmul.f32 0.35355338, %v1900_v15  ;;  %v3179_v15 = vld [vmem:[%s3307_s8 + $0x1] ss:$0 sm:$0xff] }
0x12ad   :  { %v1904_v17 = vadd.f32 %v3086_v31, %v1903_v16 }
0x12af   :  { %v1905_v19 = vsel %vm170_vm5, %v1904_v17, -inf }
0x12b0   :  { %1906 = vmax.xlane.f32.xlu1 %v1905_v19 }
0x12c9   :  { %1712 = vrot.lane.b32.xlu1 %v3059_v55, %s3333_s22 }
0x1308   :  { %v1596_v50 = vpop.f32.mrf.mxu2 }
0x1309   :  { %v1599_v22 = vadd.f32 %v1596_v50, %v1508_v38 }
0x130a   :  { %v1703_v24 = vpop.xlane.xlu2 %1702 }
0x130b   :  { %1600 = vst.msk [vmem:[#allocation2] sm:$0xff] %vm63_vm0, %v1599_v22  ;;  %v1704_v25 = vsub.f32 %v1700_v21, %v1703_v24  ;;  %v2397_v21 = vld [vmem:[%s3310_s10 + $0x20] sm:$0xff] }
0x130d   :  { %v1705_v33 = vmul.f32 1.442695, %v1704_v25 }
0x130f   :  { %2526 = vpow2.f32 %v1705_v33 }
0x1312   :  { %v1967_v26 = vld [vmem:[#allocation2] sm:$0xff] }
0x1313   :  { %v1974_v31 = vadd.f32 %v3143_v14, %v1967_v26 }
0x1315   :  { %v2527_v36 = vpop.eup %2526  ;;  %v1976_v28 = vadd.f32 %v1974_v31, %v2985_v23  ;;  %v3198_v31 = vld [vmem:[%s3309_s11 + $0x1] ss:$0 sm:$0xff] }
0x1316   :  { %v1707_v29 = vsel %vm170_vm5, %v2527_v36, 0.0 }
0x1317   :  { %v1816_v37 = vpop.xlane.xlu0 %1815  ;;  %1708 = vadd.xlane.f32.xlu2 %v1707_v29  ;;  %v1982_v41 = vsel %vm63_vm0, %v1976_v28, 0.0 }
0x1318   :  { %v1817_v43 = vsub.f32 %v1813_v11, %v1816_v37  ;;  %1983 = vadd.xlane.f32.xlu1 %v1982_v41 }
0x131a   :  { %v1818_v44 = vmul.f32 1.442695, %v1817_v43 }
0x131c   :  { %2528 = vpow2.f32 %v1818_v44 }
0x1322   :  { %v2529_v45 = vpop.eup %2528 }
0x1323   :  { %v1820_v46 = vsel %vm170_vm5, %v2529_v45, 0.0  ;;  %v1907_v27 = vpop.xlane.xlu1 %1906 }
0x1324   :  { %1821 = vadd.xlane.f32.xlu0 %v1820_v46  ;;  %v1908_v30 = vsub.f32 %v1904_v17, %v1907_v27 }
0x1326   :  { %v1909_v51 = vmul.f32 1.442695, %v1908_v30 }
0x1328   :  { %2530 = vpow2.f32 %v1909_v51  ;;  %v2412_v51 = vld [vmem:[%s3311_s12 + $0x70] sm:$0xff] }
0x132e   :  { %v2531_v49 = vpop.eup %2530 }
0x132f   :  { %v1911_v23 = vsel %vm170_vm5, %v2531_v49, 0.0 }
0x1330   :  { %1912 = vadd.xlane.f32.xlu2 %v1911_v23 }
0x1338   :  { %1825 = vrot.lane.b32.xlu0 %v3059_v55, %s2558_s28 }
0x133b   :  { %v1713_v48 = vpop.permute.xlu1 %1712 }
0x133c   :  { %1733 = vmatpush.msra.mxu2 %v1713_v48 }
0x1348   :  { %1916 = vrot.lane.b32.xlu2 %v3059_v55, %s3336_s1 }
0x138a   :  { %v1709_v35 = vpop.xlane.xlu2 %1708 }
0x138b   :  { %2532 = vrcp.f32 %v1709_v35  ;;  %v1984_v54 = vpop.xlane.xlu1 %1983  ;;  %v2410_v35 = vld [vmem:[%s3311_s12 + $0x60] sm:$0xff] }
0x138c   :  { %v1988_v18 = vmul.f32 %v1984_v54, %v2661_v8 }
0x138e   :  { %v1990_v40 = vsub.f32 %v1976_v28, %v1988_v18  ;;  %v2409_v18 = vld [vmem:[%s3311_s12 + $0x58] sm:$0xff] }
0x1390   :  { %v1992_v53 = vmul.f32 %v1990_v40, %v1990_v40 }
0x1391   :  { %v2533_v56 = vpop.eup %2532 }
0x1392   :  { %v1711_v57 = vmul.f32 %v2533_v56, %v2527_v36  ;;  %v1994_v39 = vsel %vm63_vm0, %v1992_v53, 0.0  ;;  %v2408_v56 = vld [vmem:[%s3311_s12 + $0x50] sm:$0xff] }
0x1393   :  { %1995 = vadd.xlane.f32.xlu2 %v1994_v39  ;;  %v2407_v39 = vld [vmem:[%s3311_s12 + $0x48] sm:$0xff] }
0x1394   :  { %2383 = vmatmul.msk.f32.vlgmr.msra.gmra.mxu2 %vm170_vm5, %v1711_v57 }
0x1397   :  { %v1822_v58 = vpop.xlane.xlu0 %1821 }
0x1398   :  { %2534 = vrcp.f32 %v1822_v58 }
0x139e   :  { %v2535_v60 = vpop.eup %2534 }
0x139f   :  { %v1824_v52 = vmul.f32 %v2535_v60, %v2529_v45  ;;  %v2413_v45 = vld [vmem:[%s3311_s12 + $0x78] sm:$0xff] }
0x13a0   :  { %2191 = vmatpush.msra.mxu3 %v2413_v45 }
0x13a2   :  { %2192 = vmatpush.msra.mxu3 %v2412_v51 }
0x13a3   :  { %v1913_v59 = vpop.xlane.xlu2 %1912 }
0x13a4   :  { %2536 = vrcp.f32 %v1913_v59  ;;  %v2406_v59 = vld [vmem:[%s3311_s12 + $0x40] sm:$0xff] }
0x13aa   :  { %v2537_v55 = vpop.eup %2536  ;;  %v1826_v42 = vpop.permute.xlu0 %1825 }
0x13ab   :  { %v1915_v61 = vmul.f32 %v2537_v55, %v2531_v49  ;;  %1846 = vmatpush.msrb.mxu2 %v1826_v42  ;;  %v1917_v62 = vpop.permute.xlu2 %1916 }
0x13ac   :  { %2388 = vmatmul.msk.f32.vlgmr.msrb.gmra.mxu2 %vm170_vm5, %v1824_v52  ;;  %1937 = vmatpush.msra.mxu0 %v1917_v62 }
0x13ad   :  { %2392 = vmatmul.msk.f32.vlgmr.msra.gmra.mxu0 %vm170_vm5, %v1915_v61  ;;  %1960 = vmatpush.msra.mxu2 %v3122_v5  ;;  %v2398_v5 = vld [vmem:[%s3310_s10 + $0x28] sm:$0xff] }
0x1406   :  { %v1996_v47 = vpop.xlane.xlu2 %1995 }
0x1407   :  { %v2000_v63 = vmul.f32 %v1996_v47, %v2661_v8 }
0x1409   :  { %v2002_v2 = vadd.f32 1e-12, %v2000_v63 }
0x140b   :  { %2538 = vrsqrt.f32 %v2002_v2  ;;  %vm2010_vm3 = vweird.f32 %v2002_v2 }
0x1411   :  { %v2539_v3 = vpop.eup %2538 }
0x1412   :  { %v2005_v32 = vmul.f32 %v2539_v3, %v2002_v2  ;;  %vm2011_vm2 = vweird.f32 %v2539_v3 }
0x1413   :  { %vm2012_vm4 = vmor %vm2010_vm3, %vm2011_vm2 }
0x1414   :  { %v2006_v20 = vmul.f32 %v2539_v3, %v2005_v32 }
0x1416   :  { %v2007_v7 = vmul.f32 0.5, %v2006_v20 }
0x1417   :  { %v1735_v0 = vpop.f32.mrf.mxu2 }
0x1418   :  { %2384 = vmatmul.msk.f32.vlgmr.msra.gmra.mxu1 %vm170_vm5, %v1735_v0  ;;  %v2008_v9 = vsub.f32 1.5, %v2007_v7 }
0x1419   :  { %2064 = vmatpush.msra.mxu1 %v2400_v4 }
0x141a   :  { %v2009_v10 = vmul.f32 %v2539_v3, %v2008_v9 }
0x141b   :  { %2065 = vmatpush.msra.mxu1 %v2399_v6 }
0x141c   :  { %v2013_v13 = vsel %vm2012_vm4, %v2539_v3, %v2009_v10 }
0x141d   :  { %2066 = vmatpush.msra.mxu1 %v2398_v5  ;;  %v2024_v16 = vmul.f32 %v2013_v13, %v1990_v40 }
0x141f   :  { %2067 = vmatpush.msra.mxu1 %v2397_v21  ;;  %v2029_v19 = vmul.f32 %v3179_v15, %v2024_v16 }
0x1421   :  { %v3189_v38 = vadd.f32 %v3186_v34, %v2029_v19 }
0x142a   :  { %v1939_v11 = vpop.f32.mrf.mxu0 }
0x142b   :  { %2393 = vmatmul.msk.f32.vlgmr.msra.gmra.mxu2 %vm170_vm5, %v1939_v11 }
0x142f   :  { %v1848_v17 = vpop.f32.mrf.mxu2 }
0x1430   :  { %2389 = vmatmul.msk.f32.vlgmr.msrb.gmra.mxu1 %vm170_vm5, %v1848_v17 }
0x1438   :  { %2402 = vmatmul.msk.f32.vlgmr.msra.gmra.mxu1 %vm63_vm0, %v3189_v38 }
0x1495   :  { %v1758_v50 = vpop.f32.mrf.mxu1 }
0x1496   :  { %v1782_v22 = vadd.f32 %v3129_v12, %v1758_v50 }
0x14ad   :  { %v1871_v24 = vpop.f32.mrf.mxu1 }
0x14ae   :  { %v1874_v25 = vadd.f32 %v1871_v24, %v1782_v22  ;;  %v1962_v33 = vpop.f32.mrf.mxu2 }
0x14b0   :  { %v1965_v26 = vadd.f32 %v1962_v33, %v1874_v25 }
0x14b2   :  { %1966 = vst.msk [vmem:[#allocation2 + $0x8] sm:$0xff] %vm63_vm0, %v1965_v26  ;;  %v3238_v26 = vld [vmem:[%s3312_s13 + $0x1] ss:$0 sm:$0xff] }
0x14b5   :  { %v2069_v36 = vpop.f32.mrf.mxu1 }
0x14b6   :  { %v2070_v28 = vadd.f32 %v3198_v31, %v2069_v36 }
0x14b8   :  { %v2077_v29 = vmul.f32 0.70710677, %v2070_v28  ;;  %v2075_v16 = vmul.f32 0.5, %v2070_v28 }
0x14b9   :  { %v1968_v37 = vld [vmem:[#allocation2 + $0x8] sm:$0xff] }
0x14ba   :  { %v2079_v41 = vmul.f32 %v2077_v29, %v2077_v29  ;;  %v1975_v43 = vadd.f32 %v3143_v14, %v1968_v37 }
0x14bc   :  { %v2080_v12 = vmin.f32 %v2079_v41, 16.0  ;;  %v3203_v44 = vadd.f32 %v1975_v43, %v3047_v1  ;;  %v2411_v1 = vld [vmem:[%s3311_s12 + $0x68] sm:$0xff] }
0x14bd   :  { %2193 = vmatpush.msra.mxu3 %v2411_v1 }
0x14be   :  { %v2081_v46 = vmul.f32 2.1237322e-06, %v2080_v12  ;;  %v2092_v27 = vmul.f32 3.8918573e-05, %v2080_v12  ;;  %v1985_v30 = vsel %vm63_vm0, %v3203_v44, 0.0 }
0x14bf   :  { %1986 = vadd.xlane.f32.xlu0 %v1985_v30  ;;  %2194 = vmatpush.msra.mxu3 %v2410_v35 }
0x14c0   :  { %v2082_v14 = vadd.f32 0.00028619796, %v2081_v46  ;;  %v2093_v49 = vadd.f32 0.001143296, %v2092_v27 }
0x14c1   :  { %2195 = vmatpush.msra.mxu3 %v2409_v18 }
0x14c2   :  { %v2083_v23 = vmul.f32 %v2082_v14, %v2080_v12  ;;  %v2094_v48 = vmul.f32 %v2093_v49, %v2080_v12 }
0x14c3   :  { %2196 = vmatpush.msra.mxu3 %v2408_v56 }
0x14c4   :  { %v2095_v54 = vadd.f32 0.014752088, %v2094_v48  ;;  %v2084_v40 = vadd.f32 0.0036580483, %v2083_v23 }
0x14c5   :  { %2197 = vmatpush.msra.mxu3 %v2407_v39 }
0x14c6   :  { %v2096_v53 = vmul.f32 %v2095_v54, %v2080_v12  ;;  %v2085_v58 = vmul.f32 %v2084_v40, %v2080_v12 }
0x14c7   :  { %2198 = vmatpush.msra.mxu3 %v2406_v59 }
0x14c8   :  { %v2097_v57 = vadd.f32 0.112945676, %v2096_v53  ;;  %v2086_v52 = vadd.f32 0.05243302, %v2085_v58 }
0x14ca   :  { %v2098_v60 = vmul.f32 %v2097_v57, %v2080_v12  ;;  %v2087_v62 = vmul.f32 %v2086_v52, %v2080_v12 }
0x14cc   :  { %v2099_v55 = vadd.f32 0.4994258, %v2098_v60  ;;  %v2088_v47 = vadd.f32 0.18741608, %v2087_v62  ;;  %v2269_v62 = vld [vmem:[%s3316_s16 + $0x18] sm:$0xff] }
0x14cd   :  { %2292 = vmatpush.msrb.mxu0 %v2269_v62 }
0x14ce   :  { %v2100_v42 = vmul.f32 %v2099_v55, %v2080_v12  ;;  %v2089_v2 = vmul.f32 %v2088_v47, %v2080_v12  ;;  %v2268_v47 = vld [vmem:[%s3316_s16 + $0x10] sm:$0xff] }
0x14cf   :  { %2293 = vmatpush.msrb.mxu0 %v2268_v47 }
0x14d0   :  { %v2101_v61 = vadd.f32 1.0, %v2100_v42  ;;  %v2090_v0 = vadd.f32 1.1283791, %v2089_v2  ;;  %v2267_v2 = vld [vmem:[%s3316_s16 + $0x8] sm:$0xff] }
0x14d1   :  { %2294 = vmatpush.msrb.mxu0 %v2267_v2 }
0x14d2   :  { %2540 = vrcp.f32 %v2101_v61  ;;  %v2113_v32 = vand.u32 2147483648, %v2101_v61  ;;  %v2111_v5 = vand.u32 2147483647, %v2101_v61  ;;  %vm2107_vm6 = vweird.f32 %v2101_v61 }
0x14d3   :  { %v2091_v7 = vmul.f32 %v2090_v0, %v2077_v29 }
0x14d4   :  { %v2114_v21 = vor.u32 1.1754944e-38, %v2113_v32  ;;  %vm2112_vm8 = vcmp.eq.f32.partialorder %v2111_v5, 8.507059e+37 }
0x14d8   :  { %v2541_v63 = vpop.eup %2540 }
0x14d9   :  { %v2103_v3 = vmul.f32 %v2541_v63, %v2101_v61  ;;  %vm2108_vm5 = vweird.f32 %v2541_v63 }
0x14da   :  { %vm2109_vm7 = vmor %vm2107_vm6, %vm2108_vm5 }
0x14db   :  { %v2104_v4 = vsub.f32 1.0, %v2103_v3 }
0x14dd   :  { %v2105_v6 = vmul.f32 %v2541_v63, %v2104_v4  ;;  %v2266_v4 = vld [vmem:[%s3316_s16] sm:$0xff] }
0x14de   :  { %2295 = vmatpush.msrb.mxu0 %v2266_v4 }
0x14df   :  { %v2106_v20 = vadd.f32 %v2541_v63, %v2105_v6 }
0x14e1   :  { %v2110_v9 = vsel %vm2109_vm7, %v2541_v63, %v2106_v20 }
0x14e2   :  { %v2115_v10 = vsel %vm2112_vm8, %v2114_v21, %v2110_v9 }
0x14e3   :  { %v2116_v11 = vmul.f32 %v2115_v10, %v2091_v7 }
0x14e5   :  { %v2404_v13 = vclamps-f32 %v2116_v11, 1.0 }
0x14e7   :  { %v2159_v17 = vadd.f32 1.0, %v2404_v13 }
0x14e9   :  { %v2161_v19 = vmul.f32 %v2159_v17, %v2075_v16 }
0x14eb   :  { %2415 = vmatmul.msk.f32.vlgmr.msra.gmra.mxu3 %vm1103_vm1, %v2161_v19 }
0x1532   :  { %v1987_v50 = vpop.xlane.xlu0 %1986 }
0x1533   :  { %v1989_v22 = vmul.f32 %v1987_v50, %v2661_v8 }
0x1535   :  { %v1991_v24 = vsub.f32 %v3203_v44, %v1989_v22 }
0x1537   :  { %v1993_v25 = vmul.f32 %v1991_v24, %v1991_v24 }
0x1539   :  { %v1997_v33 = vsel %vm63_vm0, %v1993_v25, 0.0 }
0x153a   :  { %1998 = vadd.xlane.f32.xlu1 %v1997_v33 }
0x156e   :  { %v2200_v36 = vpop.f32.mrf.mxu3 }
0x156f   :  { %v2201_v28 = vadd.f32 %v3238_v26, %v2200_v36 }
0x1571   :  { %v2206_v29 = vadd.f32 %v2201_v28, %v3189_v38 }
0x1573   :  { %v2212_v37 = vsel %vm63_vm0, %v2206_v29, 0.0 }
0x1574   :  { %2213 = vadd.xlane.f32.xlu0 %v2212_v37 }
0x15ad   :  { %v1999_v41 = vpop.xlane.xlu1 %1998 }
0x15ae   :  { %v2001_v43 = vmul.f32 %v1999_v41, %v2661_v8 }
0x15b0   :  { %v2003_v12 = vadd.f32 1e-12, %v2001_v43 }
0x15b2   :  { %2542 = vrsqrt.f32 %v2003_v12  ;;  %vm2020_vm10 = vweird.f32 %v2003_v12 }
0x15b8   :  { %v2543_v44 = vpop.eup %2542 }
0x15b9   :  { %v2015_v45 = vmul.f32 %v2543_v44, %v2003_v12  ;;  %vm2021_vm9 = vweird.f32 %v2543_v44 }
0x15ba   :  { %vm2022_vm11 = vmor %vm2020_vm10, %vm2021_vm9 }
0x15bb   :  { %v2016_v46 = vmul.f32 %v2543_v44, %v2015_v45 }
0x15bd   :  { %v2017_v27 = vmul.f32 0.5, %v2016_v46 }
0x15bf   :  { %v2018_v30 = vsub.f32 1.5, %v2017_v27  ;;  %v2453_v27 = vld [vmem:[%s3313_s14 + $0x1] ss:$0 sm:$0xff] }
0x15c1   :  { %v2019_v51 = vmul.f32 %v2543_v44, %v2018_v30 }
0x15c3   :  { %v2023_v14 = vsel %vm2022_vm11, %v2543_v44, %v2019_v51 }
0x15c4   :  { %v2025_v49 = vmul.f32 %v2023_v14, %v1991_v24 }
0x15c6   :  { %v2030_v38 = vmul.f32 %v3179_v15, %v2025_v49 }
0x15c8   :  { %v3246_v1 = vadd.f32 %v3186_v34, %v2030_v38 }
0x15ca   :  { %2403 = vmatmul.msk.f32.gmra.mxu1 %vm63_vm0, %v3246_v1 }
0x15e7   :  { %v2214_v23 = vpop.xlane.xlu0 %2213 }
0x15e8   :  { %v2218_v48 = vmul.f32 %v2214_v23, %v2661_v8  ;;  %v2454_v23 = vld [vmem:[%s3314_s15 + $0x1] ss:$0 sm:$0xff] }
0x15ea   :  { %v3251_v35 = vsub.f32 %v2206_v29, %v2218_v48 }
0x15ec   :  { %v2222_v54 = vmul.f32 %v3251_v35, %v3251_v35 }
0x15ee   :  { %v2224_v18 = vsel %vm63_vm0, %v2222_v54, 0.0 }
0x15ef   :  { %2225 = vadd.xlane.f32.xlu2 %v2224_v18 }
0x1647   :  { %v2072_v40 = vpop.f32.mrf.mxu1 }
0x1648   :  { %v3257_v15 = vadd.f32 %v3198_v31, %v2072_v40  ;;  %v2455_v40 = vld [vmem:[%s3315_s17] ss:$0 sm:$0xff] }
0x164a   :  { %v2078_v34 = vmul.f32 0.70710677, %v3257_v15  ;;  %v2076_v14 = vmul.f32 0.5, %v3257_v15 }
0x164c   :  { %v2119_v53 = vmul.f32 %v2078_v34, %v2078_v34 }
0x164e   :  { %v2120_v56 = vmin.f32 %v2119_v53, 16.0 }
0x1650   :  { %v2121_v57 = vmul.f32 2.1237322e-06, %v2120_v56  ;;  %v2132_v39 = vmul.f32 3.8918573e-05, %v2120_v56 }
0x1652   :  { %v2122_v58 = vadd.f32 0.00028619796, %v2121_v57  ;;  %v2133_v59 = vadd.f32 0.001143296, %v2132_v39 }
0x1654   :  { %v2123_v60 = vmul.f32 %v2122_v58, %v2120_v56  ;;  %v2134_v55 = vmul.f32 %v2133_v59, %v2120_v56 }
0x1656   :  { %v2135_v52 = vadd.f32 0.014752088, %v2134_v55  ;;  %v2124_v42 = vadd.f32 0.0036580483, %v2123_v60 }
0x1658   :  { %v2136_v61 = vmul.f32 %v2135_v52, %v2120_v56  ;;  %v2125_v63 = vmul.f32 %v2124_v42, %v2120_v56 }
0x165a   :  { %v2137_v31 = vadd.f32 0.112945676, %v2136_v61  ;;  %v2126_v0 = vadd.f32 0.05243302, %v2125_v63 }
0x165c   :  { %v2138_v3 = vmul.f32 %v2137_v31, %v2120_v56  ;;  %v2127_v21 = vmul.f32 %v2126_v0, %v2120_v56 }
0x165e   :  { %v2139_v32 = vadd.f32 0.4994258, %v2138_v3  ;;  %v2128_v10 = vadd.f32 0.18741608, %v2127_v21 }
0x1660   :  { %v2140_v6 = vmul.f32 %v2139_v32, %v2120_v56  ;;  %v2129_v13 = vmul.f32 %v2128_v10, %v2120_v56 }
0x1662   :  { %v2141_v5 = vadd.f32 1.0, %v2140_v6  ;;  %v2226_v20 = vpop.xlane.xlu2 %2225  ;;  %v2130_v24 = vadd.f32 1.1283791, %v2129_v13 }
0x1663   :  { %v2230_v7 = vmul.f32 %v2226_v20, %v2661_v8 }
0x1664   :  { %2544 = vrcp.f32 %v2141_v5  ;;  %v2153_v50 = vand.u32 2147483648, %v2141_v5  ;;  %v2151_v33 = vand.u32 2147483647, %v2141_v5  ;;  %vm2147_vm13 = vweird.f32 %v2141_v5 }
0x1665   :  { %v2232_v9 = vadd.f32 1e-12, %v2230_v7  ;;  %v2131_v41 = vmul.f32 %v2130_v24, %v2078_v34 }
0x1666   :  { %v2154_v29 = vor.u32 1.1754944e-38, %v2153_v50  ;;  %vm2152_vm15 = vcmp.eq.f32.partialorder %v2151_v33, 8.507059e+37 }
0x1667   :  { %2546 = vrsqrt.f32 %v2232_v9  ;;  %vm2240_vm3 = vweird.f32 %v2232_v9 }
0x166a   :  { %v2545_v11 = vpop.eup %2544 }
0x166b   :  { %v2143_v16 = vmul.f32 %v2545_v11, %v2141_v5  ;;  %vm2148_vm12 = vweird.f32 %v2545_v11 }
0x166c   :  { %vm2149_vm14 = vmor %vm2147_vm13, %vm2148_vm12 }
0x166d   :  { %v2547_v17 = vpop.eup %2546  ;;  %v2144_v19 = vsub.f32 1.0, %v2143_v16 }
0x166e   :  { %v2235_v22 = vmul.f32 %v2547_v17, %v2232_v9  ;;  %vm2241_vm2 = vweird.f32 %v2547_v17 }
0x166f   :  { %v2145_v25 = vmul.f32 %v2545_v11, %v2144_v19  ;;  %vm2242_vm4 = vmor %vm2240_vm3, %vm2241_vm2 }
0x1670   :  { %v2236_v36 = vmul.f32 %v2547_v17, %v2235_v22 }
0x1671   :  { %v2146_v28 = vadd.f32 %v2545_v11, %v2145_v25 }
0x1672   :  { %v2237_v37 = vmul.f32 0.5, %v2236_v36 }
0x1673   :  { %v2150_v43 = vsel %vm2149_vm14, %v2545_v11, %v2146_v28 }
0x1674   :  { %v2155_v12 = vsel %vm2152_vm15, %v2154_v29, %v2150_v43  ;;  %v2238_v44 = vsub.f32 1.5, %v2237_v37 }
0x1675   :  { %v2156_v45 = vmul.f32 %v2155_v12, %v2131_v41 }
0x1676   :  { %v2239_v46 = vmul.f32 %v2547_v17, %v2238_v44 }
0x1677   :  { %v2405_v30 = vclamps-f32 %v2156_v45, 1.0 }
0x1678   :  { %v2243_v51 = vsel %vm2242_vm4, %v2547_v17, %v2239_v46 }
0x1679   :  { %v2254_v49 = vmul.f32 %v2243_v51, %v3251_v35  ;;  %v2160_v38 = vadd.f32 1.0, %v2405_v30 }
0x167b   :  { %v2259_v48 = vmul.f32 %v2453_v27, %v2254_v49  ;;  %v2162_v54 = vmul.f32 %v2160_v38, %v2076_v14 }
0x167d   :  { %2416 = vmatmul.msk.f32.gmra.mxu3 %vm1103_vm1, %v2162_v54  ;;  %v2264_v18 = vadd.f32 %v2454_v23, %v2259_v48 }
0x167f   :  { %2419 = vmatmul.msk.f32.vlgmr.msrb.gmra.mxu0 %vm63_vm0, %v2264_v18 }
0x16fc   :  { %v2297_v34 = vpop.f32.mrf.mxu0 }
0x16fd   :  { %v2298_v15 = vadd.f32 %v2455_v40, %v2297_v34 }
0x16ff   :  { %2303 = vst [vmem:[%s3317_s18] sm:$0xff] %v2298_v15 }
0x1700   :  { %v2203_v35 = vpop.f32.mrf.mxu3 }
0x1701   :  { %v2204_v53 = vadd.f32 %v3238_v26, %v2203_v35 }
0x1703   :  { %v2207_v56 = vadd.f32 %v2204_v53, %v3246_v1 }
0x1705   :  { %v2215_v57 = vsel %vm63_vm0, %v2207_v56, 0.0 }
0x1706   :  { %2216 = vadd.xlane.f32.xlu1 %v2215_v57 }
0x1779   :  { %v2217_v39 = vpop.xlane.xlu1 %2216 }
0x177a   :  { %v2219_v58 = vmul.f32 %v2217_v39, %v2661_v8 }
0x177c   :  { %v2221_v59 = vsub.f32 %v2207_v56, %v2219_v58 }
0x177e   :  { %v2223_v60 = vmul.f32 %v2221_v59, %v2221_v59 }
0x1780   :  { %v2227_v55 = vsel %vm63_vm0, %v2223_v60, 0.0 }
0x1781   :  { %2228 = vadd.xlane.f32.xlu0 %v2227_v55 }
0x17f4   :  { %v2229_v52 = vpop.xlane.xlu0 %2228 }
0x17f5   :  { %v2231_v42 = vmul.f32 %v2229_v52, %v2661_v8 }
0x17f7   :  { %v2233_v61 = vadd.f32 1e-12, %v2231_v42 }
0x17f9   :  { %2548 = vrsqrt.f32 %v2233_v61  ;;  %vm2250_vm5 = vweird.f32 %v2233_v61 }
0x17ff   :  { %v2549_v62 = vpop.eup %2548 }
0x1800   :  { %v2245_v26 = vmul.f32 %v2549_v62, %v2233_v61  ;;  %vm2251_vm1 = vweird.f32 %v2549_v62 }
0x1801   :  { %vm2252_vm6 = vmor %vm2250_vm5, %vm2251_vm1 }
0x1802   :  { %v2246_v31 = vmul.f32 %v2549_v62, %v2245_v26 }
0x1804   :  { %v2247_v1 = vmul.f32 0.5, %v2246_v31 }
0x1806   :  { %v2248_v47 = vsub.f32 1.5, %v2247_v1 }
0x1808   :  { %v2249_v63 = vmul.f32 %v2549_v62, %v2248_v47 }
0x180a   :  { %v2253_v2 = vsel %vm2252_vm6, %v2549_v62, %v2249_v63 }
0x180b   :  { %v2255_v3 = vmul.f32 %v2253_v2, %v2221_v59 }
0x180d   :  { %v2260_v4 = vmul.f32 %v2453_v27, %v2255_v3 }
0x180f   :  { %v2265_v32 = vadd.f32 %v2454_v23, %v2260_v4 }
0x1811   :  { %2420 = vmatmul.msk.f32.gmra.mxu0 %vm63_vm0, %v2265_v32 }
0x188e   :  { %v2300_v0 = vpop.f32.mrf.mxu0 }
0x188f   :  { %v2301_v6 = vadd.f32 %v2455_v40, %v2300_v0 }
0x1891   :  { %2304 = vst [vmem:[%s3317_s18 + $0x8] sm:$0xff] %v2301_v6 }

</bundles_post_ra>
